<compile_context>
chip_gen: v5e
topology: v5e:2x2
jax: 0.10.0
libtpu: 0.0.40
codegen_flags: <defaults>
</compile_context>

<pallas_src>
import math

import jax
import jax.numpy as jnp
import numpy as np
from jax import lax
from jax.experimental import pallas as pl
from jax.experimental.pallas import tpu as pltpu

H, W = 22, 4                 # conv spatial size (preserved by both convs)
HP, WP = H + 4, W + 4        # zero-padded spatial size (pad=2, k=5): 26, 8
C1, C2 = 16, 32              # conv1 / conv2 output channels
K1 = 5 * WP + 1              # conv1 matmul K: 5 kh-taps * 8 widths + bias col
K2 = 5 * WP * C1             # conv2 matmul K: 5 kh-taps * 128 lanes = 640
NL = W * C2                  # conv output lane width: 128
K_MED = 12 * 64              # med matmul K: 11 pooled rows * 64 + a zero slot
HID, HID_PAD = 500, 512      # `med` width, padded to a lane multiple
OUT_PAD = 128                # padded lane width of the logits slab
MXU_DTYPE = jnp.bfloat16     # matmul operand dtype (accumulation is f32)


# ------------------------------ fused kernel -------------------------------


def _make_kernel(B):
    R = B * HP               # rows per grid step (26-rows-per-sample layout)

    def kernel(xg_ref, m1_ref, m2_ref, b2_ref, wm_ref, bmed_ref,
               wout_ref, bout_ref, o_ref, a1_ref, h2_ref):
        f32 = jnp.float32

        # ---- conv1 (+bias via ones column) + ReLU --------------------------
        # xg rows: b*26 + hp; rows hp in {0,1,24,25} are all-zero (height
        # padding), so they stay exactly 0 after matmul + ReLU.
        acc1 = jnp.dot(xg_ref[...].astype(MXU_DTYPE), m1_ref[...],
                       preferred_element_type=f32)                 # (R, 128)
        a1_ref[0:R, :] = jnp.maximum(acc1, 0.0)
        a1_ref[R:, :] = jnp.zeros((8, NL), f32)   # tail feeds only junk rows

        # ---- conv2 + ReLU: one K=640 matmul over 5 height-shifted views ----
        lhs2 = jnp.concatenate(
            [a1_ref[kh:kh + R, :].astype(MXU_DTYPE) for kh in range(5)],
            axis=1)                                                # (R, 640)
        acc2 = jnp.dot(lhs2, m2_ref[...], preferred_element_type=f32)
        h2_ref[...] = jnp.maximum(acc2 + b2_ref[...], 0.0)         # (R, 128)

        # ---- MaxPool2d(2) fused with `med` and `out` -----------------------
        # h2 lanes are packed q*64 + p*32 + c with output width w = 2p + q:
        # width pooling = max(lane, lane+64); height pooling pairs rows
        # (2k, 2k+1) via two stride-26 sublane reads.
        lane = lax.broadcasted_iota(jnp.int32, (B, NL), 1)
        lo = lane < 64
        wps = []
        for k in range(H // 2):
            r0 = h2_ref[pl.ds(2 * k, B, stride=HP), :]             # (B, 128)
            r1 = h2_ref[pl.ds(2 * k + 1, B, stride=HP), :]
            hp_k = jnp.maximum(r0, r1)                             # height pool
            wps.append(jnp.maximum(hp_k,
                                   pltpu.roll(hp_k, shift=64, axis=1)))
        pieces = [jnp.where(lo, wps[2 * j], wps[2 * j + 1]) for j in range(5)]
        pieces.append(wps[10])          # k=10 in low half; the high half hits
                                        # the zero k=11 slot of wm.
        med_lhs = jnp.concatenate(pieces, axis=1).astype(MXU_DTYPE)  # (B,768)

        med = jnp.dot(med_lhs, wm_ref[...],
                      preferred_element_type=f32) + bmed_ref[...]    # (B,512)
        logits = jnp.dot(med.astype(MXU_DTYPE), wout_ref[...],
                         preferred_element_type=f32) + bout_ref[...]  # (B,128)
        o_ref[...] = logits

    return kernel


# ----------------------- weight repacking (layout only) --------------------


def _pack_conv1(w1, b1):
    # (41, 128): rows kh*8 + ww (40 taps) + one bias row; cols wo*16 + c.
    # Only padded output-width lanes wo in [2, 6) are live; the rest stay zero
    # so conv1's output is already width-padded for conv2.
    w1k = jnp.transpose(w1[:, 0], (1, 2, 0))                       # (kh, kw, c)
    ww = jnp.arange(WP)[:, None]
    wo = jnp.arange(WP)[None, :]
    kw = ww - (wo - 2)
    live = (wo >= 2) & (wo < 2 + W)
    valid = live & (kw >= 0) & (kw < 5)
    m1 = jnp.where(valid[None, :, :, None],
                   w1k[:, jnp.clip(kw, 0, 4), :], 0.0)             # (5,8,8,16)
    m1 = m1.reshape(5 * WP, WP * C1)                               # (40, 128)
    brow = (live.astype(jnp.float32).reshape(WP, 1)
            * b1[None, :]).reshape(1, WP * C1)                     # (1, 128)
    return jnp.concatenate([m1, brow], axis=0).astype(MXU_DTYPE)   # (41, 128)


def _pack_conv2(w2, b2):
    # (640, 128): rows kh*128 + ww*16 + ci; cols q*64 + p*32 + co (w = 2p+q).
    w2k = jnp.transpose(w2, (2, 3, 1, 0))                          # (kh,kw,ci,co)
    ww = jnp.arange(WP)[:, None]
    wo = jnp.arange(W)[None, :]
    kw = ww - wo
    valid = (kw >= 0) & (kw < 5)
    t = jnp.where(valid[None, :, :, None, None],
                  w2k[:, jnp.clip(kw, 0, 4), :, :], 0.0)     # (5, 8, 4, 16, 32)
    t = jnp.transpose(t, (0, 1, 3, 2, 4))                    # (kh, ww, ci, w, co)
    t = t.reshape(5, WP, C1, 2, 2, C2)                       # w -> (p, q)
    t = jnp.transpose(t, (0, 1, 2, 4, 3, 5))                 # (kh, ww, ci, q, p, co)
    m2 = t.reshape(K2, NL)                                   # (640, 128)
    b2row = jnp.tile(b2, (W,)).reshape(1, NL)                # lane l -> b2[l % 32]
    return m2.astype(MXU_DTYPE), b2row.astype(jnp.float32)


def _pack_med(w_med, b_med):
    # (768, 512): rows k*64 + p*32 + c for pooled (height k, width p, chan c);
    # PyTorch flatten order is c*22 + 2k + p.  Rows for the fake k=11 slot and
    # the 12 padded output lanes are zero.
    F = w_med.shape[0]
    wr = w_med.reshape(F, C2, H // 2, 2)                     # (o, c, k, p)
    wr = jnp.transpose(wr, (2, 3, 1, 0))                     # (k, p, c, o)
    wm = wr.reshape((H // 2) * 2 * C2, F)                    # (704, 500)
    wm = jnp.pad(wm, ((0, K_MED - wm.shape[0]), (0, HID_PAD - F)))
    bmed = jnp.pad(b_med, (0, HID_PAD - F)).reshape(1, HID_PAD)
    return wm.astype(MXU_DTYPE), bmed.astype(jnp.float32)


def _pack_out(w_out, b_out):
    m = w_out.shape[0]
    wo = jnp.zeros((HID_PAD, OUT_PAD), w_out.dtype).at[:HID, :m].set(w_out.T)
    bo = jnp.zeros((1, OUT_PAD), jnp.float32).at[0, :m].set(b_out)
    return wo.astype(MXU_DTYPE), bo


# --------------------------------- forward ---------------------------------


def cnn_forward(params, x, *, batch_block=8):
    B = batch_block
    assert B % 8 == 0, "batch_block must be a multiple of 8"
    N = x.shape[0]
    assert x.shape == (N, 1, H, W)
    m = params["w_out"].shape[0]
    N_pad = -(-N // B) * B

    # Host-side prep: H-only im2col of the zero-padded input + a ones column
    # (folds conv1's bias into the matmul), laid out 26 rows per sample so the
    # height padding needed by conv2 is already materialised.
    xpad = jnp.pad(x[:, 0], ((0, N_pad - N), (2, 2), (2, 2)))      # (Np, 26, 8)
    rows = jnp.arange(H)[:, None] + jnp.arange(5)[None, :]         # (22, 5)
    xg = xpad[:, rows, :].reshape(N_pad, H, 5 * WP)                # (Np, 22, 40)
    xg = jnp.concatenate([xg, jnp.ones((N_pad, H, 1), xg.dtype)], axis=-1)
    xg = jnp.pad(xg, ((0, 0), (2, 2), (0, 0)))                     # (Np, 26, 41)
    xg = xg.reshape(N_pad * HP, K1)                                # (Np*26, 41)

    m1g = _pack_conv1(params["w1"], params["b1"])
    m2g, b2row = _pack_conv2(params["w2"], params["b2"])
    wm, bmed = _pack_med(params["w_med"], params["b_med"])
    wout, bout = _pack_out(params["w_out"], params["b_out"])

    R = B * HP
    flops = 2 * N_pad * (HP * NL * (K1 + K2)
                         + K_MED * HID_PAD + HID_PAD * OUT_PAD)
    bytes_accessed = int(xg.size * 4 + N_pad * OUT_PAD * 4
                         + (m1g.size + m2g.size + wm.size + wout.size) * 2
                         + (b2row.size + bmed.size + bout.size) * 4)

    out = pl.pallas_call(
        _make_kernel(B),
        out_shape=jax.ShapeDtypeStruct((N_pad, OUT_PAD), jnp.float32),
        grid=(N_pad // B,),
        in_specs=[
            pl.BlockSpec((R, K1), lambda n: (n, 0)),               # xg
            pl.BlockSpec((K1, NL), lambda n: (0, 0)),              # conv1 w+b
            pl.BlockSpec((K2, NL), lambda n: (0, 0)),              # conv2 w
            pl.BlockSpec((1, NL), lambda n: (0, 0)),               # conv2 b
            pl.BlockSpec((K_MED, HID_PAD), lambda n: (0, 0)),      # med w
            pl.BlockSpec((1, HID_PAD), lambda n: (0, 0)),          # med b
            pl.BlockSpec((HID_PAD, OUT_PAD), lambda n: (0, 0)),    # out w
            pl.BlockSpec((1, OUT_PAD), lambda n: (0, 0)),          # out b
        ],
        out_specs=pl.BlockSpec((B, OUT_PAD), lambda n: (n, 0)),
        scratch_shapes=[
            pltpu.VMEM((R + 8, NL), jnp.float32),   # padded conv1 activation
            pltpu.VMEM((R, NL), jnp.float32),       # conv2 activation
        ],
        compiler_params=pltpu.CompilerParams(
            dimension_semantics=("parallel",)),
        cost_estimate=pl.CostEstimate(flops=flops, transcendentals=0,
                                      bytes_accessed=bytes_accessed),
    )(xg, m1g, m2g, b2row, wm, bmed, wout, bout)

    return out[:N, :m]


# ------------------------- pure-JAX reference (f32) -------------------------


def cnn_reference(params, x):
    def conv_relu(h, w, b):
        y = jax.lax.conv_general_dilated(
            h, w, window_strides=(1, 1), padding=((2, 2), (2, 2)),
            dimension_numbers=("NCHW", "OIHW", "NCHW"))
        return jax.nn.relu(y + b[None, :, None, None])

    h = conv_relu(x, params["w1"], params["b1"])     # MaxPool2d(1) == identity
    h = conv_relu(h, params["w2"], params["b2"])
    n, c, hh, ww = h.shape
    h = h.reshape(n, c, hh // 2, 2, ww // 2, 2).max(axis=(3, 5))
    h = h.reshape(n, -1)
    h = h @ params["w_med"].T + params["b_med"]
    return h @ params["w_out"].T + params["b_out"]


# ---------------------------- params / example ------------------------------


def init_params(key, m):
    def uniform(k, shape, fan_in):
        bound = 1.0 / math.sqrt(fan_in)
        return jax.random.uniform(k, shape, jnp.float32, -bound, bound)

    ks = jax.random.split(key, 8)
    return {
        "w1": uniform(ks[0], (C1, 1, 5, 5), 1 * 25),
        "b1": uniform(ks[1], (C1,), 1 * 25),
        "w2": uniform(ks[2], (C2, C1, 5, 5), C1 * 25),
        "b2": uniform(ks[3], (C2,), C1 * 25),
        "w_med": uniform(ks[4], (HID, C2 * (H // 2) * (W // 2)), 704),
        "b_med": uniform(ks[5], (HID,), 704),
        "w_out": uniform(ks[6], (m, HID), HID),
        "b_out": uniform(ks[7], (m,), HID),
    }


if __name__ == "__main__":
    key = jax.random.PRNGKey(0)
    kx, kp = jax.random.split(key)
    m = 10
    n = 16
    x = jax.random.normal(kx, (n, 1, H, W), jnp.float32)   # (16, 1, 22, 4)
    params = init_params(kp, m)

    out = jax.jit(cnn_forward)(params, x)
    jax.block_until_ready(out)
    assert out.shape == (n, m) and out.dtype == jnp.float32

    ref = cnn_reference(params, x)
    np.testing.assert_allclose(np.asarray(out), np.asarray(ref),
                               rtol=5e-2, atol=5e-2)
    print("KERNEL_OK")
</pallas_src>

<mosaic_0001>
module attributes {stable_mosaic.version = 11 : i64} {
  func.func @kernel(%arg0: i32, %arg1: memref<208x41xf32, #tpu.memory_space<vmem>>, %arg2: memref<41x128xbf16, #tpu.memory_space<vmem>>, %arg3: memref<640x128xbf16, #tpu.memory_space<vmem>>, %arg4: memref<1x128xf32, #tpu.memory_space<vmem>>, %arg5: memref<768x512xbf16, #tpu.memory_space<vmem>>, %arg6: memref<1x512xf32, #tpu.memory_space<vmem>>, %arg7: memref<512x128xbf16, #tpu.memory_space<vmem>>, %arg8: memref<1x128xf32, #tpu.memory_space<vmem>>, %arg9: memref<8x128xf32, #tpu.memory_space<vmem>>, %arg10: memref<216x128xf32, #tpu.memory_space<vmem>>, %arg11: memref<208x128xf32, #tpu.memory_space<vmem>>) attributes {dimension_semantics = [#tpu.dimension_semantics<parallel>], iteration_bounds = array<i64: 2>, scalar_prefetch = 0 : i64, scratch_operands = 2 : i64, tpu.core_type = #tpu.core_type<tc>, window_params = [{transform_indices = @transform_0, window_bounds = array<i64: 208, 41>}, {pipeline_mode = #tpu.pipeline_mode<synchronous>, transform_indices = @transform_1, window_bounds = array<i64: 41, 128>}, {pipeline_mode = #tpu.pipeline_mode<synchronous>, transform_indices = @transform_2, window_bounds = array<i64: 640, 128>}, {pipeline_mode = #tpu.pipeline_mode<synchronous>, transform_indices = @transform_3, window_bounds = array<i64: 1, 128>}, {pipeline_mode = #tpu.pipeline_mode<synchronous>, transform_indices = @transform_4, window_bounds = array<i64: 768, 512>}, {pipeline_mode = #tpu.pipeline_mode<synchronous>, transform_indices = @transform_5, window_bounds = array<i64: 1, 512>}, {pipeline_mode = #tpu.pipeline_mode<synchronous>, transform_indices = @transform_6, window_bounds = array<i64: 512, 128>}, {pipeline_mode = #tpu.pipeline_mode<synchronous>, transform_indices = @transform_7, window_bounds = array<i64: 1, 128>}, {transform_indices = @transform_8, window_bounds = array<i64: 8, 128>}]} {
    %c0 = arith.constant 0 : index
    %c0_0 = arith.constant 0 : index
    %0 = vector.load %arg1[%c0, %c0_0] : memref<208x41xf32, #tpu.memory_space<vmem>>, vector<208x41xf32>
    %1 = arith.truncf %0 : vector<208x41xf32> to vector<208x41xbf16>
    %c0_1 = arith.constant 0 : index
    %c0_2 = arith.constant 0 : index
    %2 = vector.load %arg2[%c0_1, %c0_2] : memref<41x128xbf16, #tpu.memory_space<vmem>>, vector<41x128xbf16>
    %cst = arith.constant dense<0.000000e+00> : vector<208x128xf32>
    %3 = tpu.matmul %1, %2, %cst {dimension_numbers = #tpu.dot_dimension_numbers<[1], [0], [0], [1], [0, 0, 1, 1], [], []>} : vector<208x41xbf16>, vector<41x128xbf16>, vector<208x128xf32> -> vector<208x128xf32>
    %cst_3 = arith.constant 0.000000e+00 : f32
    %4 = vector.broadcast %cst_3 : f32 to vector<208x128xf32>
    %5 = arith.maximumf %3, %4 : vector<208x128xf32>
    %c0_4 = arith.constant 0 : index
    %c0_5 = arith.constant 0 : index
    %6 = vector.load %arg10[%c0_4, %c0_5] : memref<216x128xf32, #tpu.memory_space<vmem>>, vector<208x128xf32>
    tpu.vector_store %arg10[%c0_4, %c0_5], %5 {strides = array<i32>} : memref<216x128xf32, #tpu.memory_space<vmem>>, vector<208x128xf32>,
    %cst_6 = arith.constant 0.000000e+00 : f32
    %7 = vector.broadcast %cst_6 : f32 to vector<8x128xf32>
    %c208 = arith.constant 208 : index
    %c0_7 = arith.constant 0 : index
    %8 = vector.load %arg10[%c208, %c0_7] : memref<216x128xf32, #tpu.memory_space<vmem>>, vector<8x128xf32>
    tpu.vector_store %arg10[%c208, %c0_7], %7 {strides = array<i32>} : memref<216x128xf32, #tpu.memory_space<vmem>>, vector<8x128xf32>,
    %c0_8 = arith.constant 0 : index
    %c0_9 = arith.constant 0 : index
    %9 = vector.load %arg10[%c0_8, %c0_9] : memref<216x128xf32, #tpu.memory_space<vmem>>, vector<208x128xf32>
    %10 = arith.truncf %9 : vector<208x128xf32> to vector<208x128xbf16>
    %c1 = arith.constant 1 : index
    %c0_10 = arith.constant 0 : index
    %11 = vector.load %arg10[%c1, %c0_10] : memref<216x128xf32, #tpu.memory_space<vmem>>, vector<208x128xf32>
    %12 = arith.truncf %11 : vector<208x128xf32> to vector<208x128xbf16>
    %c2 = arith.constant 2 : index
    %c0_11 = arith.constant 0 : index
    %13 = vector.load %arg10[%c2, %c0_11] : memref<216x128xf32, #tpu.memory_space<vmem>>, vector<208x128xf32>
    %14 = arith.truncf %13 : vector<208x128xf32> to vector<208x128xbf16>
    %c3 = arith.constant 3 : index
    %c0_12 = arith.constant 0 : index
    %15 = vector.load %arg10[%c3, %c0_12] : memref<216x128xf32, #tpu.memory_space<vmem>>, vector<208x128xf32>
    %16 = arith.truncf %15 : vector<208x128xf32> to vector<208x128xbf16>
    %c4 = arith.constant 4 : index
    %c0_13 = arith.constant 0 : index
    %17 = vector.load %arg10[%c4, %c0_13] : memref<216x128xf32, #tpu.memory_space<vmem>>, vector<208x128xf32>
    %18 = arith.truncf %17 : vector<208x128xf32> to vector<208x128xbf16>
    %19 = tpu.concatenate %10, %12, %14, %16, %18 in 1 : vector<208x128xbf16>, vector<208x128xbf16>, vector<208x128xbf16>, vector<208x128xbf16>, vector<208x128xbf16> -> vector<208x640xbf16>
    %c0_14 = arith.constant 0 : index
    %c0_15 = arith.constant 0 : index
    %20 = vector.load %arg3[%c0_14, %c0_15] : memref<640x128xbf16, #tpu.memory_space<vmem>>, vector<640x128xbf16>
    %cst_16 = arith.constant dense<0.000000e+00> : vector<208x128xf32>
    %21 = tpu.matmul %19, %20, %cst_16 {dimension_numbers = #tpu.dot_dimension_numbers<[1], [0], [0], [1], [0, 0, 1, 1], [], []>} : vector<208x640xbf16>, vector<640x128xbf16>, vector<208x128xf32> -> vector<208x128xf32>
    %c0_17 = arith.constant 0 : index
    %c0_18 = arith.constant 0 : index
    %22 = vector.load %arg4[%c0_17, %c0_18] : memref<1x128xf32, #tpu.memory_space<vmem>>, vector<1x128xf32>
    %23 = vector.broadcast %22 : vector<1x128xf32> to vector<208x128xf32>
    %24 = arith.addf %21, %23 : vector<208x128xf32>
    %cst_19 = arith.constant 0.000000e+00 : f32
    %25 = vector.broadcast %cst_19 : f32 to vector<208x128xf32>
    %26 = arith.maximumf %24, %25 : vector<208x128xf32>
    %c0_20 = arith.constant 0 : index
    %c0_21 = arith.constant 0 : index
    %27 = vector.load %arg11[%c0_20, %c0_21] : memref<208x128xf32, #tpu.memory_space<vmem>>, vector<208x128xf32>
    tpu.vector_store %arg11[%c0_20, %c0_21], %26 {strides = array<i32>} : memref<208x128xf32, #tpu.memory_space<vmem>>, vector<208x128xf32>,
    %28 = tpu.iota {dimensions = array<i32: 1>} : vector<8x128xi32>
    %c64_i32 = arith.constant 64 : i32
    %29 = vector.broadcast %c64_i32 : i32 to vector<8x128xi32>
    %30 = arith.cmpi slt, %28, %29 : vector<8x128xi32>
    %c0_22 = arith.constant 0 : index
    %c0_23 = arith.constant 0 : index
    %31 = tpu.strided_load %arg11[%c0_22, %c0_23] {strides = array<i32: 26, 1>} : memref<208x128xf32, #tpu.memory_space<vmem>>, vector<8x128xf32>
    %c1_24 = arith.constant 1 : index
    %c0_25 = arith.constant 0 : index
    %32 = tpu.strided_load %arg11[%c1_24, %c0_25] {strides = array<i32: 26, 1>} : memref<208x128xf32, #tpu.memory_space<vmem>>, vector<8x128xf32>
    %33 = arith.maximumf %31, %32 : vector<8x128xf32>
    %c64_i32_26 = arith.constant 64 : i32
    %34 = tpu.dynamic_rotate %33 by %c64_i32_26 dim 1 : vector<8x128xf32>, i32 -> vector<8x128xf32>
    %35 = arith.maximumf %33, %34 : vector<8x128xf32>
    %c2_27 = arith.constant 2 : index
    %c0_28 = arith.constant 0 : index
    %36 = tpu.strided_load %arg11[%c2_27, %c0_28] {strides = array<i32: 26, 1>} : memref<208x128xf32, #tpu.memory_space<vmem>>, vector<8x128xf32>
    %c3_29 = arith.constant 3 : index
    %c0_30 = arith.constant 0 : index
    %37 = tpu.strided_load %arg11[%c3_29, %c0_30] {strides = array<i32: 26, 1>} : memref<208x128xf32, #tpu.memory_space<vmem>>, vector<8x128xf32>
    %38 = arith.maximumf %36, %37 : vector<8x128xf32>
    %c64_i32_31 = arith.constant 64 : i32
    %39 = tpu.dynamic_rotate %38 by %c64_i32_31 dim 1 : vector<8x128xf32>, i32 -> vector<8x128xf32>
    %40 = arith.maximumf %38, %39 : vector<8x128xf32>
    %c4_32 = arith.constant 4 : index
    %c0_33 = arith.constant 0 : index
    %41 = tpu.strided_load %arg11[%c4_32, %c0_33] {strides = array<i32: 26, 1>} : memref<208x128xf32, #tpu.memory_space<vmem>>, vector<8x128xf32>
    %c5 = arith.constant 5 : index
    %c0_34 = arith.constant 0 : index
    %42 = tpu.strided_load %arg11[%c5, %c0_34] {strides = array<i32: 26, 1>} : memref<208x128xf32, #tpu.memory_space<vmem>>, vector<8x128xf32>
    %43 = arith.maximumf %41, %42 : vector<8x128xf32>
    %c64_i32_35 = arith.constant 64 : i32
    %44 = tpu.dynamic_rotate %43 by %c64_i32_35 dim 1 : vector<8x128xf32>, i32 -> vector<8x128xf32>
    %45 = arith.maximumf %43, %44 : vector<8x128xf32>
    %c6 = arith.constant 6 : index
    %c0_36 = arith.constant 0 : index
    %46 = tpu.strided_load %arg11[%c6, %c0_36] {strides = array<i32: 26, 1>} : memref<208x128xf32, #tpu.memory_space<vmem>>, vector<8x128xf32>
    %c7 = arith.constant 7 : index
    %c0_37 = arith.constant 0 : index
    %47 = tpu.strided_load %arg11[%c7, %c0_37] {strides = array<i32: 26, 1>} : memref<208x128xf32, #tpu.memory_space<vmem>>, vector<8x128xf32>
    %48 = arith.maximumf %46, %47 : vector<8x128xf32>
    %c64_i32_38 = arith.constant 64 : i32
    %49 = tpu.dynamic_rotate %48 by %c64_i32_38 dim 1 : vector<8x128xf32>, i32 -> vector<8x128xf32>
    %50 = arith.maximumf %48, %49 : vector<8x128xf32>
    %c8 = arith.constant 8 : index
    %c0_39 = arith.constant 0 : index
    %51 = tpu.strided_load %arg11[%c8, %c0_39] {strides = array<i32: 26, 1>} : memref<208x128xf32, #tpu.memory_space<vmem>>, vector<8x128xf32>
    %c9 = arith.constant 9 : index
    %c0_40 = arith.constant 0 : index
    %52 = tpu.strided_load %arg11[%c9, %c0_40] {strides = array<i32: 26, 1>} : memref<208x128xf32, #tpu.memory_space<vmem>>, vector<8x128xf32>
    %53 = arith.maximumf %51, %52 : vector<8x128xf32>
    %c64_i32_41 = arith.constant 64 : i32
    %54 = tpu.dynamic_rotate %53 by %c64_i32_41 dim 1 : vector<8x128xf32>, i32 -> vector<8x128xf32>
    %55 = arith.maximumf %53, %54 : vector<8x128xf32>
    %c10 = arith.constant 10 : index
    %c0_42 = arith.constant 0 : index
    %56 = tpu.strided_load %arg11[%c10, %c0_42] {strides = array<i32: 26, 1>} : memref<208x128xf32, #tpu.memory_space<vmem>>, vector<8x128xf32>
    %c11 = arith.constant 11 : index
    %c0_43 = arith.constant 0 : index
    %57 = tpu.strided_load %arg11[%c11, %c0_43] {strides = array<i32: 26, 1>} : memref<208x128xf32, #tpu.memory_space<vmem>>, vector<8x128xf32>
    %58 = arith.maximumf %56, %57 : vector<8x128xf32>
    %c64_i32_44 = arith.constant 64 : i32
    %59 = tpu.dynamic_rotate %58 by %c64_i32_44 dim 1 : vector<8x128xf32>, i32 -> vector<8x128xf32>
    %60 = arith.maximumf %58, %59 : vector<8x128xf32>
    %c12 = arith.constant 12 : index
    %c0_45 = arith.constant 0 : index
    %61 = tpu.strided_load %arg11[%c12, %c0_45] {strides = array<i32: 26, 1>} : memref<208x128xf32, #tpu.memory_space<vmem>>, vector<8x128xf32>
    %c13 = arith.constant 13 : index
    %c0_46 = arith.constant 0 : index
    %62 = tpu.strided_load %arg11[%c13, %c0_46] {strides = array<i32: 26, 1>} : memref<208x128xf32, #tpu.memory_space<vmem>>, vector<8x128xf32>
    %63 = arith.maximumf %61, %62 : vector<8x128xf32>
    %c64_i32_47 = arith.constant 64 : i32
    %64 = tpu.dynamic_rotate %63 by %c64_i32_47 dim 1 : vector<8x128xf32>, i32 -> vector<8x128xf32>
    %65 = arith.maximumf %63, %64 : vector<8x128xf32>
    %c14 = arith.constant 14 : index
    %c0_48 = arith.constant 0 : index
    %66 = tpu.strided_load %arg11[%c14, %c0_48] {strides = array<i32: 26, 1>} : memref<208x128xf32, #tpu.memory_space<vmem>>, vector<8x128xf32>
    %c15 = arith.constant 15 : index
    %c0_49 = arith.constant 0 : index
    %67 = tpu.strided_load %arg11[%c15, %c0_49] {strides = array<i32: 26, 1>} : memref<208x128xf32, #tpu.memory_space<vmem>>, vector<8x128xf32>
    %68 = arith.maximumf %66, %67 : vector<8x128xf32>
    %c64_i32_50 = arith.constant 64 : i32
    %69 = tpu.dynamic_rotate %68 by %c64_i32_50 dim 1 : vector<8x128xf32>, i32 -> vector<8x128xf32>
    %70 = arith.maximumf %68, %69 : vector<8x128xf32>
    %c16 = arith.constant 16 : index
    %c0_51 = arith.constant 0 : index
    %71 = tpu.strided_load %arg11[%c16, %c0_51] {strides = array<i32: 26, 1>} : memref<208x128xf32, #tpu.memory_space<vmem>>, vector<8x128xf32>
    %c17 = arith.constant 17 : index
    %c0_52 = arith.constant 0 : index
    %72 = tpu.strided_load %arg11[%c17, %c0_52] {strides = array<i32: 26, 1>} : memref<208x128xf32, #tpu.memory_space<vmem>>, vector<8x128xf32>
    %73 = arith.maximumf %71, %72 : vector<8x128xf32>
    %c64_i32_53 = arith.constant 64 : i32
    %74 = tpu.dynamic_rotate %73 by %c64_i32_53 dim 1 : vector<8x128xf32>, i32 -> vector<8x128xf32>
    %75 = arith.maximumf %73, %74 : vector<8x128xf32>
    %c18 = arith.constant 18 : index
    %c0_54 = arith.constant 0 : index
    %76 = tpu.strided_load %arg11[%c18, %c0_54] {strides = array<i32: 26, 1>} : memref<208x128xf32, #tpu.memory_space<vmem>>, vector<8x128xf32>
    %c19 = arith.constant 19 : index
    %c0_55 = arith.constant 0 : index
    %77 = tpu.strided_load %arg11[%c19, %c0_55] {strides = array<i32: 26, 1>} : memref<208x128xf32, #tpu.memory_space<vmem>>, vector<8x128xf32>
    %78 = arith.maximumf %76, %77 : vector<8x128xf32>
    %c64_i32_56 = arith.constant 64 : i32
    %79 = tpu.dynamic_rotate %78 by %c64_i32_56 dim 1 : vector<8x128xf32>, i32 -> vector<8x128xf32>
    %80 = arith.maximumf %78, %79 : vector<8x128xf32>
    %c20 = arith.constant 20 : index
    %c0_57 = arith.constant 0 : index
    %81 = tpu.strided_load %arg11[%c20, %c0_57] {strides = array<i32: 26, 1>} : memref<208x128xf32, #tpu.memory_space<vmem>>, vector<8x128xf32>
    %c21 = arith.constant 21 : index
    %c0_58 = arith.constant 0 : index
    %82 = tpu.strided_load %arg11[%c21, %c0_58] {strides = array<i32: 26, 1>} : memref<208x128xf32, #tpu.memory_space<vmem>>, vector<8x128xf32>
    %83 = arith.maximumf %81, %82 : vector<8x128xf32>
    %c64_i32_59 = arith.constant 64 : i32
    %84 = tpu.dynamic_rotate %83 by %c64_i32_59 dim 1 : vector<8x128xf32>, i32 -> vector<8x128xf32>
    %85 = arith.maximumf %83, %84 : vector<8x128xf32>
    %86 = arith.select %30, %35, %40 : vector<8x128xi1>, vector<8x128xf32>
    %87 = arith.select %30, %45, %50 : vector<8x128xi1>, vector<8x128xf32>
    %88 = arith.select %30, %55, %60 : vector<8x128xi1>, vector<8x128xf32>
    %89 = arith.select %30, %65, %70 : vector<8x128xi1>, vector<8x128xf32>
    %90 = arith.select %30, %75, %80 : vector<8x128xi1>, vector<8x128xf32>
    %91 = tpu.concatenate %86, %87, %88, %89, %90, %85 in 1 : vector<8x128xf32>, vector<8x128xf32>, vector<8x128xf32>, vector<8x128xf32>, vector<8x128xf32>, vector<8x128xf32> -> vector<8x768xf32>
    %92 = arith.truncf %91 : vector<8x768xf32> to vector<8x768xbf16>
    %c0_60 = arith.constant 0 : index
    %c0_61 = arith.constant 0 : index
    %93 = vector.load %arg5[%c0_60, %c0_61] : memref<768x512xbf16, #tpu.memory_space<vmem>>, vector<768x512xbf16>
    %cst_62 = arith.constant dense<0.000000e+00> : vector<8x512xf32>
    %94 = tpu.matmul %92, %93, %cst_62 {dimension_numbers = #tpu.dot_dimension_numbers<[1], [0], [0], [1], [0, 0, 1, 1], [], []>} : vector<8x768xbf16>, vector<768x512xbf16>, vector<8x512xf32> -> vector<8x512xf32>
    %c0_63 = arith.constant 0 : index
    %c0_64 = arith.constant 0 : index
    %95 = vector.load %arg6[%c0_63, %c0_64] : memref<1x512xf32, #tpu.memory_space<vmem>>, vector<1x512xf32>
    %96 = vector.broadcast %95 : vector<1x512xf32> to vector<8x512xf32>
    %97 = arith.addf %94, %96 : vector<8x512xf32>
    %98 = arith.truncf %97 : vector<8x512xf32> to vector<8x512xbf16>
    %c0_65 = arith.constant 0 : index
    %c0_66 = arith.constant 0 : index
    %99 = vector.load %arg7[%c0_65, %c0_66] : memref<512x128xbf16, #tpu.memory_space<vmem>>, vector<512x128xbf16>
    %cst_67 = arith.constant dense<0.000000e+00> : vector<8x128xf32>
    %100 = tpu.matmul %98, %99, %cst_67 {dimension_numbers = #tpu.dot_dimension_numbers<[1], [0], [0], [1], [0, 0, 1, 1], [], []>} : vector<8x512xbf16>, vector<512x128xbf16>, vector<8x128xf32> -> vector<8x128xf32>
    %c0_68 = arith.constant 0 : index
    %c0_69 = arith.constant 0 : index
    %101 = vector.load %arg8[%c0_68, %c0_69] : memref<1x128xf32, #tpu.memory_space<vmem>>, vector<1x128xf32>
    %102 = vector.broadcast %101 : vector<1x128xf32> to vector<8x128xf32>
    %103 = arith.addf %100, %102 : vector<8x128xf32>
    %c0_70 = arith.constant 0 : index
    %c0_71 = arith.constant 0 : index
    %104 = vector.load %arg9[%c0_70, %c0_71] : memref<8x128xf32, #tpu.memory_space<vmem>>, vector<8x128xf32>
    tpu.vector_store %arg9[%c0_70, %c0_71], %103 {strides = array<i32>} : memref<8x128xf32, #tpu.memory_space<vmem>>, vector<8x128xf32>,
    return
  }
  func.func @transform_0(%arg0: i32) -> (i32, i32) {
    %c0_i32 = arith.constant 0 : i32
    %c0_i32_0 = arith.constant 0 : i32
    return %arg0, %c0_i32 : i32, i32
  }
  func.func @transform_1(%arg0: i32) -> (i32, i32) {
    %c0_i32 = arith.constant 0 : i32
    %c0_i32_0 = arith.constant 0 : i32
    %c0_i32_1 = arith.constant 0 : i32
    return %c0_i32, %c0_i32_0 : i32, i32
  }
  func.func @transform_2(%arg0: i32) -> (i32, i32) {
    %c0_i32 = arith.constant 0 : i32
    %c0_i32_0 = arith.constant 0 : i32
    %c0_i32_1 = arith.constant 0 : i32
    return %c0_i32, %c0_i32_0 : i32, i32
  }
  func.func @transform_3(%arg0: i32) -> (i32, i32) {
    %c0_i32 = arith.constant 0 : i32
    %c0_i32_0 = arith.constant 0 : i32
    %c0_i32_1 = arith.constant 0 : i32
    return %c0_i32, %c0_i32_0 : i32, i32
  }
  func.func @transform_4(%arg0: i32) -> (i32, i32) {
    %c0_i32 = arith.constant 0 : i32
    %c0_i32_0 = arith.constant 0 : i32
    %c0_i32_1 = arith.constant 0 : i32
    return %c0_i32, %c0_i32_0 : i32, i32
  }
  func.func @transform_5(%arg0: i32) -> (i32, i32) {
    %c0_i32 = arith.constant 0 : i32
    %c0_i32_0 = arith.constant 0 : i32
    %c0_i32_1 = arith.constant 0 : i32
    return %c0_i32, %c0_i32_0 : i32, i32
  }
  func.func @transform_6(%arg0: i32) -> (i32, i32) {
    %c0_i32 = arith.constant 0 : i32
    %c0_i32_0 = arith.constant 0 : i32
    %c0_i32_1 = arith.constant 0 : i32
    return %c0_i32, %c0_i32_0 : i32, i32
  }
  func.func @transform_7(%arg0: i32) -> (i32, i32) {
    %c0_i32 = arith.constant 0 : i32
    %c0_i32_0 = arith.constant 0 : i32
    %c0_i32_1 = arith.constant 0 : i32
    return %c0_i32, %c0_i32_0 : i32, i32
  }
  func.func @transform_8(%arg0: i32) -> (i32, i32) {
    %c0_i32 = arith.constant 0 : i32
    %c0_i32_0 = arith.constant 0 : i32
    return %arg0, %c0_i32 : i32, i32
  }
}

</mosaic_0001>

<bundles_post_ra>
// kernel: tile.8
= control target key start
LH: loop header
LB: loop body
LE: loop exit
PB: predicated region body
PF: predicated region fallthrough
CT: control target
= control target key end

     0   :  { %s22_s0 = inlined_call_operand.vmem [shape: f32[32], index: 0, kind: input, shape index: {}]   ;;  %s23_s1 = inlined_call_operand.vmem [shape: f32[4,32], index: 1, kind: output, shape index: {}]  }
   0x1   :  { %v4_v0 = vld [vmem:[%s22_s0] ss:$0 sm:$0xff] }
   0x2   :  { %5 = vst [vmem:[%s23_s1] sm:$0xf] %v4_v0 }

// kernel: tile.9
= control target key start
LH: loop header
LB: loop body
LE: loop exit
PB: predicated region body
PF: predicated region fallthrough
CT: control target
= control target key end

     0   :  { %s37_s8 = smov 32   ;;  %s38_s9 = smov 64   ;;  %vm7_vm0 = vcmask 261120   ;;  %vm13_vm1 = vcmask 1048320   ;;  %vm19_vm2 = vcmask 785920   ;;  %vm25_vm3 = vcmask 523520   ;;  %s55_s0 = inlined_call_operand.vmem [shape: f32[4,32], index: 0, kind: input, shape index: {}]   ;;  %s56_s1 = inlined_call_operand.vmem [shape: f32[1,128], index: 1, kind: output, shape index: {}]  }
   0x1   :  { %v4_v0 = vld [vmem:[%s55_s0] sm:$0xf]  ;;  %s36_s0 = smov 96  }
   0x2   :  { %5 = vst [vmem:[#allocation1] sm:$0xf] %v4_v0 }
   0x9   :  { %v10_v1 = vld [vmem:[#allocation1 + $0x3] sm:$0x1]   ;;  %v22_v2 = vld [vmem:[#allocation1 + $0x1] sm:$0x1]   ;;  %v16_v3 = vld [vmem:[#allocation1 + $0x2] sm:$0x1]  }
   0xa   :  { %11 = vrot.lane.b32.xlu0 %v10_v1, %s36_s0  ;;  %23 = vrot.lane.b32.xlu1 %v22_v2, %s37_s8  ;;  %v6_v4 = vld [vmem:[#allocation1] sm:$0x1]  }
   0xb   :  { %8 = vst.msk [vmem:[#allocation0] sm:$0x1] %vm7_vm0, %v6_v4  }
  0x12   :  { %17 = vrot.lane.b32.xlu0 %v16_v3, %s38_s9 }
  0x7c   :  { %v12_v5 = vpop.permute.xlu0 %11   ;;  %v24_v6 = vpop.permute.xlu1 %23  }
  0x7d   :  { %14 = vst.msk [vmem:[#allocation0] sm:$0x1] %vm13_vm1, %v12_v5  }
  0x84   :  { %v18_v7 = vpop.permute.xlu0 %17  }
  0x85   :  { %20 = vst.msk [vmem:[#allocation0] sm:$0x1] %vm19_vm2, %v18_v7  }
  0x86   :  { %26 = vst.msk [vmem:[#allocation0] sm:$0x1] %vm25_vm3, %v24_v6  }
  0x8d   :  { %v29_v8 = vld [vmem:[#allocation0] sm:$0x1] }
  0x8e   :  { %32 = vst [vmem:[%s56_s1] sm:$0x1] %v29_v8 }

// kernel: cnn_forward.1
= control target key start
LH: loop header
LB: loop body
LE: loop exit
PB: predicated region body
PF: predicated region fallthrough
CT: control target
= control target key end

     0   :  { %13 = vsyncpa [#allocation5], 0  ;;  %s7245_s0 = inlined_call_operand.vmem [shape: f32[416,41], index: 0, kind: input, shape index: {}]   ;;  %s7246_s1 = inlined_call_operand.vmem [shape: bf16[41,128], index: 1, kind: input, shape index: {}]   ;;  %s7247_s2 = inlined_call_operand.vmem [shape: bf16[640,128], index: 2, kind: input, shape index: {}]   ;;  %s7248_s3 = inlined_call_operand.vmem [shape: f32[1,128], index: 3, kind: input, shape index: {}]   ;;  %s7249_s4 = inlined_call_operand.vmem [shape: bf16[768,512], index: 4, kind: input, shape index: {}]   ;;  %s7250_s5 = inlined_call_operand.vmem [shape: f32[1,512], index: 5, kind: input, shape index: {}]   ;;  %s7251_s6 = inlined_call_operand.vmem [shape: bf16[512,128], index: 6, kind: input, shape index: {}]   ;;  %s7252_s7 = inlined_call_operand.vmem [shape: f32[1,128], index: 7, kind: input, shape index: {}]   ;;  %s7253_s8 = inlined_call_operand.hbm [shape: f32[16,128], index: 8, kind: output, shape index: {}]  }
   0x1   :  { %15 = vsyncpa [#allocation5 + $0x1], 0  ;;  %s5446_s27 = smov 0   ;;  %s5448_s28 = smov 0  }
   0x2   :  { %s5450_s29 = smov 0   ;;  %s5452_s30 = smov 0  }
   0x3 LB: > { %s5467_s9 = sadd.s32 4294967295, %s5396_s30   ;;  %s3906_s10 = sadd.s32 4294967294, %s5396_s30   ;;  %s5396_s30 = sphi %s5452_s30, %s7259_s30   ;;  %s5392_s29 = sphi %s5450_s29, %s7258_s29   ;;  %s5388_s28 = sphi %s5448_s28, %s7257_s28   ;;  %s5384_s27 = sphi %s5446_s27, %s7256_s27  }
   0x4   : > { %s5471_s11 = sadd.s32 1, %s5396_s30   ;;  %s201_s12 = sadd.s32 1, %s5392_s29 }
   0x5   : > { %s198_s13 = ssub.s32 %s5396_s30, %s5471_s11  ;;  %p211_p0 = scmp.ne.s32.totalorder %s5392_s29, %s5388_s28 }
   0x6   : > { %p199_p1 = scmp.eq.s32.totalorder %s198_s13, 0  ;;  %p212_p2 = scmp.eq.s32.totalorder %s5467_s9, 1 }
   0x7   : > { %p217_p3 = scmp.ne.s32.totalorder %s5388_s28, %s5384_s27  ;;  %p218_p4 = scmp.eq.s32.totalorder %s3906_s10, 1 }
   0x8   : > { %s5482_s14 = scalar_select %p199_p1, %s5392_s29, %s201_s12  }
   0x9   : > { %p5484_p5 = por %p212_p2, %p211_p0  ;;  %p5488_p6 = por %p218_p4, %p217_p3 }
   0xa   : > { %p3909_p7 = scmp.ge.s32.totalorder %s5396_s30, 1  ;;  %p266_p8 = scmp.lt.s32.totalorder %s5396_s30, 3 }
   0xc   : > { %p267_p9 = pnand %p3909_p7, %p266_p8 }
   0xd   : > { %s300_s21 = smul.u32 (!%p267_p9), 26, %s5467_s9  ;;  %s5400_s13 = smov (!%p267_p9), 64  }
   0xe   : > { %270 = sbr.rel (%p267_p9) target bundleno = 1338 (0x53a), region = 52  ;;  %s297_s12 = sand.u32 (!%p267_p9), 1, %s5388_s28  }
   0xf   : > { %p301_p10 = scmp.lt.s32.totalorder (!%p267_p9), %s300_s21, 51  ;;  %s4994_s17 = sshll.u32 (!%p267_p9), %s5467_s9, 3 }
  0x10   : > { %s3910_s18 = sshll.u32 (!%p267_p9), %s297_s12, 3  ;;  %s3832_s23 = scalar_lea.sflag (!%p267_p9), [#allocation5], %s297_s12 }
  0x13   : > { %v3922_v0 = vld [vmem:[%s7246_s1 + $0x10] sm:$0xf]  ;;  %v4999_v1 = vld [vmem:[%s7246_s1 + $0x10] sm:$0x10]  ;;  %vm409_vm0 = vcmask 1043456   ;;  %vm410_vm1 = vcmask 1044480  }
  0x14   : > { %v3923_v2 = vor.u32 %v4999_v1, %v3922_v0  ;;  %v5398_v3 = vmov 65535   ;;  %s7261_s21 = smov (!%p301_p10, %s300_s21), 51  ;;  %v4998_v7 = vld [vmem:[%s7246_s1 + $0x8] sm:$0xff]  ;;  %v4997_v8 = vld [vmem:[%s7246_s1] sm:$0xff]  ;;  %vm369_vm2 = vcmask 334848   ;;  %v5007_v27 = vld [vmem:[%s7247_s2 + $0x38] sm:$0xff] }
  0x15   : > { %v411_v4 = vsel %vm409_vm0, 4294967295, %v5398_v3  ;;  %s3911_s24 = sshll.u32 %s7261_s21, 3  ;;  %1517 = vmatpush.bf16.msra.mxu1 %v5007_v27  ;;  %v5006_v28 = vld [vmem:[%s7247_s2 + $0x30] sm:$0xff]  ;;  %v5005_v29 = vld [vmem:[%s7247_s2 + $0x28] sm:$0xff]  ;;  %v5004_v32 = vld [vmem:[%s7247_s2 + $0x20] sm:$0xff]  ;;  %s3842_s21 = scalar_lea.hbm %s7253_s8, %s4994_s17 }
  0x16   : > { %v412_v5 = vsel %vm410_vm1, %v411_v4, 0  ;;  %s5507_s10 = scalar_lea.vmem %s7245_s0, %s3911_s24  ;;  %v5015_v34 = vld [vmem:[%s7247_s2 + $0x78] sm:$0xff]  ;;  %v5014_v37 = vld [vmem:[%s7247_s2 + $0x70] sm:$0xff]  ;;  %v5013_v40 = vld [vmem:[%s7247_s2 + $0x68] sm:$0xff]  ;;  %s5354_s17 = scalar_lea.hbm %s7253_s8, 16 }
  0x17   : > { %v414_v6 = vand.u32 %v3923_v2, %v412_v5  ;;  %v307_v9 = vld [vmem:[%s5507_s10] sm:$0xff]  ;;  %v308_v10 = vld [vmem:[%s5507_s10 + $0x8] sm:$0xff]  ;;  %v309_v12 = vld [vmem:[%s5507_s10 + $0x10] sm:$0xff]  ;;  %1591 = vmatpush.bf16.msra.mxu2 %v5015_v34 }
  0x18   : > { %v333_v11 = vpack.c.bf16 %v308_v10, %v307_v9  ;;  %v310_v13 = vld [vmem:[%s5507_s10 + $0x18] sm:$0xff]  ;;  %v311_v15 = vld [vmem:[%s5507_s10 + $0x20] sm:$0xff]  ;;  %v312_v16 = vld [vmem:[%s5507_s10 + $0x28] sm:$0xff] }
  0x19   : > { %421 = vmatpush.bf16.msra.mxu0 %v414_v6  ;;  %v334_v14 = vpack.c.bf16 %v310_v13, %v309_v12  ;;  %v335_v17 = vpack.c.bf16 %v312_v16, %v311_v15  ;;  %v313_v18 = vld [vmem:[%s5507_s10 + $0x30] sm:$0xff]  ;;  %v314_v19 = vld [vmem:[%s5507_s10 + $0x38] sm:$0xff]  ;;  %v315_v21 = vld [vmem:[%s5507_s10 + $0x40] sm:$0xff]  ;;  %1518 = vmatpush.bf16.msra.mxu1 %v5006_v28 }
  0x1a   : > { %v336_v20 = vpack.c.bf16 %v314_v19, %v313_v18  ;;  %v316_v22 = vld [vmem:[%s5507_s10 + $0x48] sm:$0xff]  ;;  %v317_v24 = vld [vmem:[%s5507_s10 + $0x50] sm:$0xff]  ;;  %v318_v25 = vld [vmem:[%s5507_s10 + $0x58] sm:$0xff] }
  0x1b   : > { %v337_v23 = vpack.c.bf16 %v316_v22, %v315_v21  ;;  %v338_v26 = vpack.c.bf16 %v318_v25, %v317_v24  ;;  %v319_v30 = vld [vmem:[%s5507_s10 + $0x60] sm:$0xff]  ;;  %v320_v31 = vld [vmem:[%s5507_s10 + $0x68] sm:$0xff]  ;;  %v5023_v35 = vld [vmem:[%s7247_s2 + $0xb8] sm:$0xff]  ;;  %1592 = vmatpush.bf16.msra.mxu2 %v5014_v37 }
  0x1c   : > { %v339_v33 = vpack.c.bf16 %v320_v31, %v319_v30  ;;  %v5003_v36 = vld [vmem:[%s7247_s2 + $0x18] sm:$0xff]  ;;  %1665 = vmatpush.bf16.msra.mxu3 %v5023_v35  ;;  %v5022_v38 = vld [vmem:[%s7247_s2 + $0xb0] sm:$0xff]  ;;  %v5021_v41 = vld [vmem:[%s7247_s2 + $0xa8] sm:$0xff] }
  0x1d   : > { %422 = vmatpush.bf16.msra.mxu0 %v4998_v7  ;;  %1519 = vmatpush.bf16.msra.mxu1 %v5005_v29  ;;  %v5002_v39 = vld [vmem:[%s7247_s2 + $0x10] sm:$0xff]  ;;  %v5001_v42 = vld [vmem:[%s7247_s2 + $0x8] sm:$0xff]  ;;  %v5012_v43 = vld [vmem:[%s7247_s2 + $0x60] sm:$0xff] }
  0x1e   : > { %v5020_v44 = vld [vmem:[%s7247_s2 + $0xa0] sm:$0xff]  ;;  %v321_v45 = vld [vmem:[%s5507_s10 + $0x70] sm:$0xff]  ;;  %v322_v46 = vld [vmem:[%s5507_s10 + $0x78] sm:$0xff] }
  0x1f   : > { %1593 = vmatpush.bf16.msra.mxu2 %v5013_v40  ;;  %v5000_v47 = vld [vmem:[%s7247_s2] sm:$0xff]  ;;  %v340_v48 = vpack.c.bf16 %v322_v46, %v321_v45  ;;  %v5011_v49 = vld [vmem:[%s7247_s2 + $0x58] sm:$0xff]  ;;  %v5010_v51 = vld [vmem:[%s7247_s2 + $0x50] sm:$0xff] }
  0x20   : > { %1666 = vmatpush.bf16.msra.mxu3 %v5022_v38  ;;  %v5019_v50 = vld [vmem:[%s7247_s2 + $0x98] sm:$0xff]  ;;  %v5018_v52 = vld [vmem:[%s7247_s2 + $0x90] sm:$0xff]  ;;  %v5009_v53 = vld [vmem:[%s7247_s2 + $0x48] sm:$0xff] }
  0x21   : > { %423 = vmatpush.bf16.msra.mxu0 %v4997_v8  ;;  %1520 = vmatpush.bf16.msra.mxu1 %v5004_v32  ;;  %v5017_v54 = vld [vmem:[%s7247_s2 + $0x88] sm:$0xff]  ;;  %v5008_v55 = vld [vmem:[%s7247_s2 + $0x40] sm:$0xff]  ;;  %v325_v2 = vld [vmem:[%s5507_s10 + $0x90] sm:$0xff] }
  0x22   : > { %v5016_v56 = vld [vmem:[%s7247_s2 + $0x80] sm:$0xff]  ;;  %v324_v58 = vld [vmem:[%s5507_s10 + $0x88] sm:$0xff]  ;;  %v326_v3 = vld [vmem:[%s5507_s10 + $0x98] sm:$0xff] }
  0x23   : > { %1594 = vmatpush.bf16.msra.mxu2 %v5012_v43  ;;  %v323_v57 = vld [vmem:[%s5507_s10 + $0x80] sm:$0xff]  ;;  %v342_v6 = vpack.c.bf16 %v326_v3, %v325_v2  ;;  %v5031_v10 = vld [vmem:[%s7247_s2 + $0xf8] sm:$0xff]  ;;  %v5030_v13 = vld [vmem:[%s7247_s2 + $0xf0] sm:$0xff] }
  0x24   : > { %3924 = vmatmul.msk.bf16.vlgmr.msra.gmra.mxu0 %vm369_vm2, %v333_v11  ;;  %1667 = vmatpush.bf16.msra.mxu3 %v5021_v41  ;;  %v341_v59 = vpack.c.bf16 %v324_v58, %v323_v57  ;;  %v5029_v24 = vld [vmem:[%s7247_s2 + $0xe8] sm:$0xff]  ;;  %v327_v27 = vld [vmem:[%s5507_s10 + $0xa0] sm:$0xff]  ;;  %v5027_v40 = vld [vmem:[%s7247_s2 + $0xd8] sm:$0xff] }
  0x25   : > { %1521 = vmatpush.bf16.msra.mxu1 %v5003_v36  ;;  %1739 = vmatpush.bf16.msrb.mxu0 %v5031_v10  ;;  %v328_v28 = vld [vmem:[%s5507_s10 + $0xa8] sm:$0xff]  ;;  %v5028_v37 = vld [vmem:[%s7247_s2 + $0xe0] sm:$0xff]  ;;  %v5026_v43 = vld [vmem:[%s7247_s2 + $0xd0] sm:$0xff] }
  0x26   : > { %v343_v35 = vpack.c.bf16 %v328_v28, %v327_v27  ;;  %v329_v57 = vld [vmem:[%s5507_s10 + $0xb0] sm:$0xff]  ;;  %v330_v58 = vld [vmem:[%s5507_s10 + $0xb8] sm:$0xff]  ;;  %v5024_v3 = vld [vmem:[%s7247_s2 + $0xc0] sm:$0xff] }
  0x27   : > { %1595 = vmatpush.bf16.msra.mxu2 %v5011_v49 }
  0x28   : > { %1668 = vmatpush.bf16.msra.mxu3 %v5020_v44 }
  0x29   : > { %1522 = vmatpush.bf16.msra.mxu1 %v5002_v39  ;;  %1740 = vmatpush.bf16.msrb.mxu0 %v5030_v13 }
  0x2b   : > { %1596 = vmatpush.bf16.msra.mxu2 %v5010_v51 }
  0x2c   : > { %1669 = vmatpush.bf16.msra.mxu3 %v5019_v50 }
  0x2d   : > { %1523 = vmatpush.bf16.msra.mxu1 %v5001_v42  ;;  %1741 = vmatpush.bf16.msrb.mxu0 %v5029_v24 }
  0x2f   : > { %1597 = vmatpush.bf16.msra.mxu2 %v5009_v53 }
  0x30   : > { %1670 = vmatpush.bf16.msra.mxu3 %v5018_v52 }
  0x31   : > { %1524 = vmatpush.bf16.msra.mxu1 %v5000_v47  ;;  %1742 = vmatpush.bf16.msrb.mxu0 %v5028_v37 }
  0x33   : > { %1598 = vmatpush.bf16.msra.mxu2 %v5008_v55 }
  0x34   : > { %3925 = vmatmul.msk.bf16.gmra.mxu0 %vm369_vm2, %v334_v14  ;;  %1671 = vmatpush.bf16.msra.mxu3 %v5017_v54  ;;  %v5025_v54 = vld [vmem:[%s7247_s2 + $0xc8] sm:$0xff] }
  0x35   : > { %1743 = vmatpush.bf16.msrb.mxu0 %v5027_v40 }
  0x38   : > { %1672 = vmatpush.bf16.msra.mxu3 %v5016_v56 }
  0x39   : > { %1744 = vmatpush.bf16.msrb.mxu0 %v5026_v43 }
  0x3d   : > { %1745 = vmatpush.bf16.msrb.mxu0 %v5025_v54 }
  0x41   : > { %1746 = vmatpush.bf16.msrb.mxu0 %v5024_v3 }
  0x44   : > { %3926 = vmatmul.msk.bf16.gmra.mxu0 %vm369_vm2, %v335_v17 }
  0x54   : > { %3927 = vmatmul.msk.bf16.gmra.mxu0 %vm369_vm2, %v336_v20 }
  0x64   : > { %3928 = vmatmul.msk.bf16.gmra.mxu0 %vm369_vm2, %v337_v23 }
  0x74   : > { %3929 = vmatmul.msk.bf16.gmra.mxu0 %vm369_vm2, %v338_v26 }
  0x84   : > { %3930 = vmatmul.msk.bf16.gmra.mxu0 %vm369_vm2, %v339_v33 }
  0x94   : > { %3931 = vmatmul.msk.bf16.gmra.mxu0 %vm369_vm2, %v340_v48 }
  0xa1   : > { %v425_v60 = vpop.f32.mrf.mxu0 }
  0xa2   : > { %v490_v61 = vmax.f32 %v425_v60, 0.0 }
  0xa4   : > { %516 = vst [vmem:[#allocation2] sm:$0xff] %v490_v61  ;;  %3932 = vmatmul.msk.bf16.gmra.mxu0 %vm369_vm2, %v341_v59  ;;  %v569_v0 = vpack.c.bf16 %v490_v61, %v490_v61 }
  0xa6   : > { %v829_v4 = vunpack.c.l.b16 %v569_v0 }
  0xa9   : > { %v427_v62 = vpop.f32.mrf.mxu0 }
  0xaa   : > { %v491_v63 = vmax.f32 %v427_v62, 0.0 }
  0xac   : > { %517 = vst [vmem:[#allocation2 + $0x8] sm:$0xff] %v491_v63  ;;  %v570_v1 = vpack.c.bf16 %v491_v63, %v491_v63 }
  0xae   : > { %v830_v5 = vunpack.c.l.b16 %v570_v1  ;;  %v344_v1 = vpack.c.bf16 %v330_v58, %v329_v57 }
  0xb0   : > { %v855_v7 = vpack.c.b16 %v830_v5, %v829_v4 }
  0xb1   : > { %v430_v8 = vpop.f32.mrf.mxu0 }
  0xb2   : > { %v492_v9 = vmax.f32 %v430_v8, 0.0  ;;  %1525 = vmatmul.bf16.vlgmr.msra.gmra.mxu1 %v855_v7 }
  0xb3   : > { %v595_v11 = vld [vmem:[#allocation2 + $0x1] sm:$0xff] }
  0xb4   : > { %518 = vst [vmem:[#allocation2 + $0x10] sm:$0xff] %v492_v9  ;;  %3933 = vmatmul.msk.bf16.gmra.mxu0 %vm369_vm2, %v342_v6  ;;  %v647_v12 = vld [vmem:[#allocation2 + $0x2] sm:$0xff]  ;;  %v621_v15 = vpack.c.bf16 %v595_v11, %v595_v11  ;;  %v571_v18 = vpack.c.bf16 %v492_v9, %v492_v9 }
  0xb5   : > { %v673_v16 = vpack.c.bf16 %v647_v12, %v647_v12 }
  0xb6   : > { %v907_v25 = vunpack.c.l.b16 %v621_v15  ;;  %v831_v31 = vunpack.c.l.b16 %v571_v18 }
  0xb7   : > { %v985_v26 = vunpack.c.l.b16 %v673_v16 }
  0xb9   : > { %v432_v14 = vpop.f32.mrf.mxu0 }
  0xba   : > { %v493_v17 = vmax.f32 %v432_v14, 0.0 }
  0xbb   : > { %v596_v19 = vld [vmem:[#allocation2 + $0x9] sm:$0xff] }
  0xbc   : > { %v648_v20 = vld [vmem:[#allocation2 + $0xa] sm:$0xff]  ;;  %519 = vst [vmem:[#allocation2 + $0x18] sm:$0xff] %v493_v17  ;;  %v622_v21 = vpack.c.bf16 %v596_v19, %v596_v19  ;;  %v572_v23 = vpack.c.bf16 %v493_v17, %v493_v17 }
  0xbd   : > { %v674_v22 = vpack.c.bf16 %v648_v20, %v648_v20  ;;  %v331_v20 = vld [vmem:[%s5507_s10 + $0xc0] sm:$0xff] }
  0xbe   : > { %v908_v29 = vunpack.c.l.b16 %v622_v21  ;;  %v832_v32 = vunpack.c.l.b16 %v572_v23  ;;  %v332_v21 = vld [vmem:[%s5507_s10 + $0xc8] sm:$0xff]  ;;  %s3846_s10 = sshll.u32 %s3842_s21, 4  ;;  %s3847_s10 = int_to_ptr.hbm [resolvable:$true] %s3846_s10 }
  0xbf   : > { %v986_v30 = vunpack.c.l.b16 %v674_v22  ;;  %v345_v28 = vpack.c.bf16 %v332_v21, %v331_v20  ;;  %s5348_s24 = sshra.s32 %s3847_s10, 4  ;;  %s5349_s24 = int_to_ptr.hbm [resolvable:$true] %s5348_s24 }
  0xc0   : > { %v933_v33 = vpack.c.b16 %v908_v29, %v907_v25  ;;  %v856_v36 = vpack.c.b16 %v832_v32, %v831_v31  ;;  %v5039_v32 = vld [vmem:[%s7247_s2 + $0x138] sm:$0xff]  ;;  %s5350_s25 = scalar_lea.hbm %s5349_s24, 8  ;;  %p5355_p0 = scmp.lt.s32.totalorder %s5349_s24, %s7253_s8 }
  0xc1   : > { %v1011_v34 = vpack.c.b16 %v986_v30, %v985_v26  ;;  %v435_v38 = vpop.f32.mrf.mxu0  ;;  %1813 = vmatpush.bf16.msrb.mxu1 %v5039_v32  ;;  %p5351_p11 = scmp.ne.s32.totalorder %s5349_s24, %s5350_s25  ;;  %p5356_p1 = scmp.lt.s32.totalorder %s5354_s17, %s5350_s25 }
  0xc2   : > { %v494_v39 = vmax.f32 %v435_v38, 0.0  ;;  %1599 = vmatmul.bf16.vlgmr.msra.gmra.mxu2 %v933_v33  ;;  %1530 = vmatmul.bf16.gmra.mxu1 %v856_v36 }
  0xc3   : > { %1673 = vmatmul.bf16.vlgmr.msra.gmra.mxu3 %v1011_v34  ;;  %v597_v41 = vld [vmem:[#allocation2 + $0x11] sm:$0xff]  ;;  %p5352_p12 = pnand %p5351_p11, %p5484_p5  ;;  %p5357_p2 = por %p5356_p1, %p5355_p0 }
  0xc4   : > { %520 = vst [vmem:[#allocation2 + $0x20] sm:$0xff] %v494_v39  ;;  %3934 = vmatmul.msk.bf16.gmra.mxu0 %vm369_vm2, %v343_v35  ;;  %v649_v42 = vld [vmem:[#allocation2 + $0x12] sm:$0xff]  ;;  %v623_v45 = vpack.c.bf16 %v597_v41, %v597_v41  ;;  %v573_v48 = vpack.c.bf16 %v494_v39, %v494_v39  ;;  %v699_v39 = vld [vmem:[#allocation2 + $0x3] sm:$0xff] }
  0xc5   : > { %v675_v46 = vpack.c.bf16 %v649_v42, %v649_v42  ;;  %v700_v35 = vld [vmem:[#allocation2 + $0xb] sm:$0xff]  ;;  %p5353_p13 = pneg %p5352_p12 }
  0xc6   : > { %v909_v55 = vunpack.c.l.b16 %v623_v45  ;;  %v833_v61 = vunpack.c.l.b16 %v573_v48  ;;  %v726_v40 = vpack.c.bf16 %v700_v35, %v700_v35 }
  0xc7   : > { %v987_v56 = vunpack.c.l.b16 %v675_v46  ;;  %p5358_p3 = pnand %p5357_p2, %p5353_p13 }
  0xc9   : > { %v437_v44 = vpop.f32.mrf.mxu0 }
  0xca   : > { %v495_v47 = vmax.f32 %v437_v44, 0.0 }
  0xcb   : > { %v598_v49 = vld [vmem:[#allocation2 + $0x19] sm:$0xff] }
  0xcc   : > { %v650_v50 = vld [vmem:[#allocation2 + $0x1a] sm:$0xff]  ;;  %521 = vst [vmem:[#allocation2 + $0x28] sm:$0xff] %v495_v47  ;;  %v624_v51 = vpack.c.bf16 %v598_v49, %v598_v49  ;;  %v574_v53 = vpack.c.bf16 %v495_v47, %v495_v47  ;;  %v725_v47 = vpack.c.bf16 %v699_v39, %v699_v39 }
  0xcd   : > { %v676_v52 = vpack.c.bf16 %v650_v50, %v650_v50 }
  0xce   : > { %v910_v59 = vunpack.c.l.b16 %v624_v51  ;;  %v834_v62 = vunpack.c.l.b16 %v574_v53  ;;  %v1064_v51 = vunpack.c.l.b16 %v726_v40  ;;  %v1063_v58 = vunpack.c.l.b16 %v725_v47 }
  0xcf   : > { %v988_v60 = vunpack.c.l.b16 %v676_v52 }
  0xd0   : > { %v934_v63 = vpack.c.b16 %v910_v59, %v909_v55  ;;  %v857_v2 = vpack.c.b16 %v834_v62, %v833_v61  ;;  %v1089_v62 = vpack.c.b16 %v1064_v51, %v1063_v58 }
  0xd1   : > { %v1012_v0 = vpack.c.b16 %v988_v60, %v987_v56  ;;  %v440_v4 = vpop.f32.mrf.mxu0 }
  0xd2   : > { %v496_v5 = vmax.f32 %v440_v4, 0.0  ;;  %1604 = vmatmul.bf16.gmra.mxu2 %v934_v63  ;;  %1535 = vmatmul.bf16.gmra.mxu1 %v857_v2 }
  0xd3   : > { %1678 = vmatmul.bf16.gmra.mxu3 %v1012_v0  ;;  %v599_v6 = vld [vmem:[#allocation2 + $0x21] sm:$0xff] }
  0xd4   : > { %522 = vst [vmem:[#allocation2 + $0x30] sm:$0xff] %v496_v5  ;;  %3935 = vmatmul.msk.bf16.gmra.mxu0 %vm369_vm2, %v344_v1  ;;  %v651_v7 = vld [vmem:[#allocation2 + $0x22] sm:$0xff]  ;;  %v625_v9 = vpack.c.bf16 %v599_v6, %v599_v6  ;;  %v575_v12 = vpack.c.bf16 %v496_v5, %v496_v5  ;;  %v701_v5 = vld [vmem:[#allocation2 + $0x13] sm:$0xff] }
  0xd5   : > { %v677_v10 = vpack.c.bf16 %v651_v7, %v651_v7  ;;  %v702_v1 = vld [vmem:[#allocation2 + $0x1b] sm:$0xff] }
  0xd6   : > { %v911_v18 = vunpack.c.l.b16 %v625_v9  ;;  %v835_v24 = vunpack.c.l.b16 %v575_v12  ;;  %v728_v6 = vpack.c.bf16 %v702_v1, %v702_v1 }
  0xd7   : > { %v989_v19 = vunpack.c.l.b16 %v677_v10 }
  0xd9   : > { %v442_v8 = vpop.f32.mrf.mxu0 }
  0xda   : > { %v497_v11 = vmax.f32 %v442_v8, 0.0 }
  0xdb   : > { %v600_v13 = vld [vmem:[#allocation2 + $0x29] sm:$0xff] }
  0xdc   : > { %v652_v14 = vld [vmem:[#allocation2 + $0x2a] sm:$0xff]  ;;  %523 = vst [vmem:[#allocation2 + $0x38] sm:$0xff] %v497_v11  ;;  %v626_v15 = vpack.c.bf16 %v600_v13, %v600_v13  ;;  %v576_v17 = vpack.c.bf16 %v497_v11, %v497_v11  ;;  %v727_v13 = vpack.c.bf16 %v701_v5, %v701_v5 }
  0xdd   : > { %v678_v16 = vpack.c.bf16 %v652_v14, %v652_v14  ;;  %v704_v32 = vld [vmem:[#allocation2 + $0x2b] sm:$0xff] }
  0xde   : > { %v912_v22 = vunpack.c.l.b16 %v626_v15  ;;  %v836_v25 = vunpack.c.l.b16 %v576_v17  ;;  %v1066_v17 = vunpack.c.l.b16 %v728_v6 }
  0xdf   : > { %v990_v23 = vunpack.c.l.b16 %v678_v16 }
  0xe0   : > { %v935_v26 = vpack.c.b16 %v912_v22, %v911_v18  ;;  %v858_v29 = vpack.c.b16 %v836_v25, %v835_v24  ;;  %v1065_v24 = vunpack.c.l.b16 %v727_v13 }
  0xe1   : > { %v1013_v27 = vpack.c.b16 %v990_v23, %v989_v19  ;;  %v445_v30 = vpop.f32.mrf.mxu0 }
  0xe2   : > { %v498_v31 = vmax.f32 %v445_v30, 0.0  ;;  %1609 = vmatmul.bf16.gmra.mxu2 %v935_v26  ;;  %1540 = vmatmul.bf16.gmra.mxu1 %v858_v29  ;;  %v5038_v29 = vld [vmem:[%s7247_s2 + $0x130] sm:$0xff] }
  0xe3   : > { %1683 = vmatmul.bf16.gmra.mxu3 %v1013_v27  ;;  %v601_v33 = vld [vmem:[#allocation2 + $0x31] sm:$0xff]  ;;  %1814 = vmatpush.bf16.msrb.mxu1 %v5038_v29 }
  0xe4   : > { %524 = vst [vmem:[#allocation2 + $0x40] sm:$0xff] %v498_v31  ;;  %3936 = vmatmul.msk.bf16.gmra.mxu0 %vm369_vm2, %v345_v28  ;;  %v653_v34 = vld [vmem:[#allocation2 + $0x32] sm:$0xff]  ;;  %v627_v37 = vpack.c.bf16 %v601_v33, %v601_v33  ;;  %v577_v42 = vpack.c.bf16 %v498_v31, %v498_v31  ;;  %v1090_v28 = vpack.c.b16 %v1066_v17, %v1065_v24 }
  0xe5   : > { %v679_v38 = vpack.c.bf16 %v653_v34, %v653_v34 }
  0xe6   : > { %v913_v49 = vunpack.c.l.b16 %v627_v37  ;;  %v837_v54 = vunpack.c.l.b16 %v577_v42  ;;  %v730_v37 = vpack.c.bf16 %v704_v32, %v704_v32 }
  0xe7   : > { %v991_v50 = vunpack.c.l.b16 %v679_v38 }
  0xe9   : > { %v447_v36 = vpop.f32.mrf.mxu0 }
  0xea   : > { %v499_v41 = vmax.f32 %v447_v36, 0.0  ;;  %v703_v36 = vld [vmem:[#allocation2 + $0x23] sm:$0xff] }
  0xeb   : > { %v602_v43 = vld [vmem:[#allocation2 + $0x39] sm:$0xff] }
  0xec   : > { %v654_v44 = vld [vmem:[#allocation2 + $0x3a] sm:$0xff]  ;;  %525 = vst [vmem:[#allocation2 + $0x48] sm:$0xff] %v499_v41  ;;  %v628_v45 = vpack.c.bf16 %v602_v43, %v602_v43  ;;  %v578_v48 = vpack.c.bf16 %v499_v41, %v499_v41 }
  0xed   : > { %v680_v46 = vpack.c.bf16 %v654_v44, %v654_v44  ;;  %v729_v44 = vpack.c.bf16 %v703_v36, %v703_v36 }
  0xee   : > { %v914_v52 = vunpack.c.l.b16 %v628_v45  ;;  %v838_v55 = vunpack.c.l.b16 %v578_v48  ;;  %v1068_v48 = vunpack.c.l.b16 %v730_v37 }
  0xef   : > { %v992_v53 = vunpack.c.l.b16 %v680_v46 }
  0xf0   : > { %v936_v56 = vpack.c.b16 %v914_v52, %v913_v49  ;;  %v859_v59 = vpack.c.b16 %v838_v55, %v837_v54  ;;  %v1067_v55 = vunpack.c.l.b16 %v729_v44 }
  0xf1   : > { %v1014_v57 = vpack.c.b16 %v992_v53, %v991_v50  ;;  %v450_v60 = vpop.f32.mrf.mxu0 }
  0xf2   : > { %v500_v61 = vmax.f32 %v450_v60, 0.0  ;;  %1614 = vmatmul.bf16.gmra.mxu2 %v936_v56  ;;  %1545 = vmatmul.bf16.gmra.mxu1 %v859_v59  ;;  %v1091_v59 = vpack.c.b16 %v1068_v48, %v1067_v55 }
  0xf3   : > { %1688 = vmatmul.bf16.gmra.mxu3 %v1014_v57  ;;  %v603_v63 = vld [vmem:[#allocation2 + $0x41] sm:$0xff] }
  0xf4   : > { %526 = vst [vmem:[#allocation2 + $0x50] sm:$0xff] %v500_v61  ;;  %1747 = vmatmul.bf16.vlgmr.msrb.gmra.mxu0 %v1089_v62  ;;  %v655_v0 = vld [vmem:[#allocation2 + $0x42] sm:$0xff]  ;;  %v629_v3 = vpack.c.bf16 %v603_v63, %v603_v63  ;;  %v579_v8 = vpack.c.bf16 %v500_v61, %v500_v61 }
  0xf5   : > { %v681_v4 = vpack.c.bf16 %v655_v0, %v655_v0  ;;  %v706_v62 = vld [vmem:[#allocation2 + $0x3b] sm:$0xff] }
  0xf6   : > { %v915_v15 = vunpack.c.l.b16 %v629_v3  ;;  %v839_v20 = vunpack.c.l.b16 %v579_v8  ;;  %v732_v3 = vpack.c.bf16 %v706_v62, %v706_v62  ;;  %v5036_v62 = vld [vmem:[%s7247_s2 + $0x120] sm:$0xff] }
  0xf7   : > { %v993_v16 = vunpack.c.l.b16 %v681_v4 }
  0xf9   : > { %v452_v2 = vpop.f32.mrf.mxu0 }
  0xfa   : > { %v501_v7 = vmax.f32 %v452_v2, 0.0  ;;  %v705_v2 = vld [vmem:[#allocation2 + $0x33] sm:$0xff] }
  0xfb   : > { %v604_v9 = vld [vmem:[#allocation2 + $0x49] sm:$0xff] }
  0xfc   : > { %v656_v10 = vld [vmem:[#allocation2 + $0x4a] sm:$0xff]  ;;  %527 = vst [vmem:[#allocation2 + $0x58] sm:$0xff] %v501_v7  ;;  %v630_v11 = vpack.c.bf16 %v604_v9, %v604_v9  ;;  %v580_v14 = vpack.c.bf16 %v501_v7, %v501_v7 }
  0xfd   : > { %v682_v12 = vpack.c.bf16 %v656_v10, %v656_v10  ;;  %v731_v10 = vpack.c.bf16 %v705_v2, %v705_v2  ;;  %v708_v29 = vld [vmem:[#allocation2 + $0x4b] sm:$0xff] }
  0xfe   : > { %v916_v18 = vunpack.c.l.b16 %v630_v11  ;;  %v840_v21 = vunpack.c.l.b16 %v580_v14 }
  0xff   : > { %v994_v19 = vunpack.c.l.b16 %v682_v12  ;;  %v5037_v12 = vld [vmem:[%s7247_s2 + $0x128] sm:$0xff] }
 0x100   : > { %v937_v22 = vpack.c.b16 %v916_v18, %v915_v15  ;;  %v860_v25 = vpack.c.b16 %v840_v21, %v839_v20  ;;  %v1070_v15 = vunpack.c.l.b16 %v732_v3  ;;  %1815 = vmatpush.bf16.msrb.mxu1 %v5037_v12 }
 0x101   : > { %v1015_v23 = vpack.c.b16 %v994_v19, %v993_v16  ;;  %v455_v26 = vpop.f32.mrf.mxu0 }
 0x102   : > { %v502_v27 = vmax.f32 %v455_v26, 0.0  ;;  %1619 = vmatmul.bf16.gmra.mxu2 %v937_v22  ;;  %1550 = vmatmul.bf16.gmra.mxu1 %v860_v25  ;;  %v1069_v22 = vunpack.c.l.b16 %v731_v10 }
 0x103   : > { %1693 = vmatmul.bf16.gmra.mxu3 %v1015_v23  ;;  %v605_v30 = vld [vmem:[#allocation2 + $0x51] sm:$0xff] }
 0x104   : > { %528 = vst [vmem:[#allocation2 + $0x60] sm:$0xff] %v502_v27  ;;  %1752 = vmatmul.bf16.gmra.mxu0 %v1090_v28  ;;  %v657_v31 = vld [vmem:[#allocation2 + $0x52] sm:$0xff]  ;;  %v631_v34 = vpack.c.bf16 %v605_v30, %v605_v30  ;;  %v581_v39 = vpack.c.bf16 %v502_v27, %v502_v27  ;;  %v1092_v26 = vpack.c.b16 %v1070_v15, %v1069_v22 }
 0x105   : > { %v683_v35 = vpack.c.bf16 %v657_v31, %v657_v31  ;;  %v709_v2 = vld [vmem:[#allocation2 + $0x53] sm:$0xff]  ;;  %1816 = vmatpush.bf16.msrb.mxu1 %v5036_v62 }
 0x106   : > { %v917_v46 = vunpack.c.l.b16 %v631_v34  ;;  %v841_v51 = vunpack.c.l.b16 %v581_v39  ;;  %v734_v34 = vpack.c.bf16 %v708_v29, %v708_v29  ;;  %v735_v10 = vpack.c.bf16 %v709_v2, %v709_v2 }
 0x107   : > { %v995_v47 = vunpack.c.l.b16 %v683_v35 }
 0x108   : > { %v1073_v22 = vunpack.c.l.b16 %v735_v10 }
 0x109   : > { %v457_v33 = vpop.f32.mrf.mxu0 }
 0x10a   : > { %v503_v38 = vmax.f32 %v457_v33, 0.0  ;;  %v707_v33 = vld [vmem:[#allocation2 + $0x43] sm:$0xff] }
 0x10b   : > { %v606_v40 = vld [vmem:[#allocation2 + $0x59] sm:$0xff] }
 0x10c   : > { %v658_v41 = vld [vmem:[#allocation2 + $0x5a] sm:$0xff]  ;;  %529 = vst [vmem:[#allocation2 + $0x68] sm:$0xff] %v503_v38  ;;  %v632_v42 = vpack.c.bf16 %v606_v40, %v606_v40  ;;  %v582_v45 = vpack.c.bf16 %v503_v38, %v503_v38 }
 0x10d   : > { %v684_v43 = vpack.c.bf16 %v658_v41, %v658_v41  ;;  %v733_v41 = vpack.c.bf16 %v707_v33, %v707_v33 }
 0x10e   : > { %v918_v49 = vunpack.c.l.b16 %v632_v42  ;;  %v842_v52 = vunpack.c.l.b16 %v582_v45  ;;  %v1072_v45 = vunpack.c.l.b16 %v734_v34 }
 0x10f   : > { %v996_v50 = vunpack.c.l.b16 %v684_v43 }
 0x110   : > { %v938_v53 = vpack.c.b16 %v918_v49, %v917_v46  ;;  %v861_v56 = vpack.c.b16 %v842_v52, %v841_v51 }
 0x111   : > { %v1016_v54 = vpack.c.b16 %v996_v50, %v995_v47  ;;  %v460_v57 = vpop.f32.mrf.mxu0 }
 0x112   : > { %v504_v58 = vmax.f32 %v460_v57, 0.0  ;;  %1624 = vmatmul.bf16.gmra.mxu2 %v938_v53  ;;  %1555 = vmatmul.bf16.gmra.mxu1 %v861_v56  ;;  %v1071_v53 = vunpack.c.l.b16 %v733_v41 }
 0x113   : > { %1698 = vmatmul.bf16.gmra.mxu3 %v1016_v54  ;;  %v607_v60 = vld [vmem:[#allocation2 + $0x61] sm:$0xff] }
 0x114   : > { %530 = vst [vmem:[#allocation2 + $0x70] sm:$0xff] %v504_v58  ;;  %1757 = vmatmul.bf16.gmra.mxu0 %v1091_v59  ;;  %v659_v61 = vld [vmem:[#allocation2 + $0x62] sm:$0xff]  ;;  %v633_v0 = vpack.c.bf16 %v607_v60, %v607_v60  ;;  %v583_v5 = vpack.c.bf16 %v504_v58, %v504_v58  ;;  %v1093_v57 = vpack.c.b16 %v1072_v45, %v1071_v53 }
 0x115   : > { %v685_v1 = vpack.c.bf16 %v659_v61, %v659_v61  ;;  %v710_v60 = vld [vmem:[#allocation2 + $0x5b] sm:$0xff] }
 0x116   : > { %v919_v13 = vunpack.c.l.b16 %v633_v0  ;;  %v843_v18 = vunpack.c.l.b16 %v583_v5  ;;  %v736_v3 = vpack.c.bf16 %v710_v60, %v710_v60 }
 0x117   : > { %v997_v14 = vunpack.c.l.b16 %v685_v1 }
 0x119   : > { %v462_v63 = vpop.f32.mrf.mxu0 }
 0x11a   : > { %v505_v4 = vmax.f32 %v462_v63, 0.0 }
 0x11b   : > { %v608_v6 = vld [vmem:[#allocation2 + $0x69] sm:$0xff] }
 0x11c   : > { %v660_v7 = vld [vmem:[#allocation2 + $0x6a] sm:$0xff]  ;;  %531 = vst [vmem:[#allocation2 + $0x78] sm:$0xff] %v505_v4  ;;  %v634_v8 = vpack.c.bf16 %v608_v6, %v608_v6  ;;  %v584_v11 = vpack.c.bf16 %v505_v4, %v505_v4 }
 0x11d   : > { %v686_v9 = vpack.c.bf16 %v660_v7, %v660_v7  ;;  %v712_v34 = vld [vmem:[#allocation2 + $0x6b] sm:$0xff] }
 0x11e   : > { %v920_v16 = vunpack.c.l.b16 %v634_v8  ;;  %v844_v19 = vunpack.c.l.b16 %v584_v11  ;;  %v738_v41 = vpack.c.bf16 %v712_v34, %v712_v34 }
 0x11f   : > { %v998_v17 = vunpack.c.l.b16 %v686_v9 }
 0x120   : > { %v939_v20 = vpack.c.b16 %v920_v16, %v919_v13  ;;  %v862_v23 = vpack.c.b16 %v844_v19, %v843_v18  ;;  %v5662_v19 = vld [vmem:[%s7248_s3] ss:$0 sm:$0xff] }
 0x121   : > { %v1017_v21 = vpack.c.b16 %v998_v17, %v997_v14  ;;  %v465_v24 = vpop.f32.mrf.mxu0  ;;  %v1074_v14 = vunpack.c.l.b16 %v736_v3 }
 0x122   : > { %v506_v25 = vmax.f32 %v465_v24, 0.0  ;;  %1629 = vmatmul.bf16.gmra.mxu2 %v939_v20  ;;  %1560 = vmatmul.bf16.gmra.mxu1 %v862_v23 }
 0x123   : > { %1703 = vmatmul.bf16.gmra.mxu3 %v1017_v21  ;;  %v609_v27 = vld [vmem:[#allocation2 + $0x71] sm:$0xff] }
 0x124   : > { %532 = vst [vmem:[#allocation2 + $0x80] sm:$0xff] %v506_v25  ;;  %1762 = vmatmul.bf16.gmra.mxu0 %v1092_v26  ;;  %v661_v28 = vld [vmem:[#allocation2 + $0x72] sm:$0xff]  ;;  %v635_v31 = vpack.c.bf16 %v609_v27, %v609_v27  ;;  %v585_v36 = vpack.c.bf16 %v506_v25, %v506_v25  ;;  %v1094_v27 = vpack.c.b16 %v1074_v14, %v1073_v22 }
 0x125   : > { %v687_v32 = vpack.c.bf16 %v661_v28, %v661_v28 }
 0x126   : > { %v921_v43 = vunpack.c.l.b16 %v635_v31  ;;  %v845_v48 = vunpack.c.l.b16 %v585_v36 }
 0x127   : > { %v999_v44 = vunpack.c.l.b16 %v687_v32 }
 0x129   : > { %v467_v30 = vpop.f32.mrf.mxu0 }
 0x12a   : > { %v507_v35 = vmax.f32 %v467_v30, 0.0 }
 0x12b   : > { %v610_v37 = vld [vmem:[#allocation2 + $0x79] sm:$0xff] }
 0x12c   : > { %v662_v38 = vld [vmem:[#allocation2 + $0x7a] sm:$0xff]  ;;  %533 = vst [vmem:[#allocation2 + $0x88] sm:$0xff] %v507_v35  ;;  %v636_v39 = vpack.c.bf16 %v610_v37, %v610_v37  ;;  %v586_v42 = vpack.c.bf16 %v507_v35, %v507_v35  ;;  %v711_v37 = vld [vmem:[#allocation2 + $0x63] sm:$0xff] }
 0x12d   : > { %v688_v40 = vpack.c.bf16 %v662_v38, %v662_v38 }
 0x12e   : > { %v922_v46 = vunpack.c.l.b16 %v636_v39  ;;  %v846_v49 = vunpack.c.l.b16 %v586_v42 }
 0x12f   : > { %v1000_v47 = vunpack.c.l.b16 %v688_v40  ;;  %v1526_v50 = vpop.f32.mrf.mxu1 }
 0x130   : > { %v940_v51 = vpack.c.b16 %v922_v46, %v921_v43  ;;  %v863_v54 = vpack.c.b16 %v846_v49, %v845_v48  ;;  %v1527_v28 = vadd.f32 %v5662_v19, %v1526_v50 }
 0x131   : > { %v1018_v52 = vpack.c.b16 %v1000_v47, %v999_v44  ;;  %v470_v55 = vpop.f32.mrf.mxu0  ;;  %v737_v47 = vpack.c.bf16 %v711_v37, %v711_v37 }
 0x132   : > { %v508_v56 = vmax.f32 %v470_v55, 0.0  ;;  %1634 = vmatmul.bf16.gmra.mxu2 %v940_v51  ;;  %1565 = vmatmul.bf16.gmra.mxu1 %v863_v54  ;;  %v1076_v54 = vunpack.c.l.b16 %v738_v41 }
 0x133   : > { %1708 = vmatmul.bf16.gmra.mxu3 %v1018_v52  ;;  %v611_v58 = vld [vmem:[#allocation2 + $0x81] sm:$0xff] }
 0x134   : > { %534 = vst [vmem:[#allocation2 + $0x90] sm:$0xff] %v508_v56  ;;  %1767 = vmatmul.bf16.gmra.mxu0 %v1093_v57  ;;  %v663_v59 = vld [vmem:[#allocation2 + $0x82] sm:$0xff]  ;;  %v637_v0 = vpack.c.bf16 %v611_v58, %v611_v58  ;;  %v587_v5 = vpack.c.bf16 %v508_v56, %v508_v56  ;;  %v5399_v56 = vmov 0.0  }
 0x135   : > { %v689_v1 = vpack.c.bf16 %v663_v59, %v663_v59  ;;  %542 = vst [vmem:[#allocation2 + $0xd0] sm:$0xff] %v5399_v56 }
 0x136   : > { %v923_v12 = vunpack.c.l.b16 %v637_v0  ;;  %v847_v17 = vunpack.c.l.b16 %v587_v5 }
 0x137   : > { %v1528_v61 = vpop.f32.mrf.mxu1  ;;  %v1001_v13 = vunpack.c.l.b16 %v689_v1 }
 0x138   : > { %v1529_v44 = vadd.f32 %v5662_v19, %v1528_v61  ;;  %v1075_v61 = vunpack.c.l.b16 %v737_v47 }
 0x139   : > { %v472_v63 = vpop.f32.mrf.mxu0 }
 0x13a   : > { %v509_v4 = vmax.f32 %v472_v63, 0.0 }
 0x13b   : > { %v612_v6 = vld [vmem:[#allocation2 + $0x89] sm:$0xff] }
 0x13c   : > { %v664_v7 = vld [vmem:[#allocation2 + $0x8a] sm:$0xff]  ;;  %535 = vst [vmem:[#allocation2 + $0x98] sm:$0xff] %v509_v4  ;;  %v638_v8 = vpack.c.bf16 %v612_v6, %v612_v6  ;;  %v588_v11 = vpack.c.bf16 %v509_v4, %v509_v4  ;;  %v5035_v4 = vld [vmem:[%s7247_s2 + $0x118] sm:$0xff] }
 0x13d   : > { %v690_v9 = vpack.c.bf16 %v664_v7, %v664_v7  ;;  %v1095_v7 = vpack.c.b16 %v1076_v54, %v1075_v61  ;;  %1817 = vmatpush.bf16.msrb.mxu1 %v5035_v4  ;;  %v715_v54 = vld [vmem:[#allocation2 + $0x83] sm:$0xff] }
 0x13e   : > { %v924_v15 = vunpack.c.l.b16 %v638_v8  ;;  %v848_v18 = vunpack.c.l.b16 %v588_v11  ;;  %v714_v8 = vld [vmem:[#allocation2 + $0x7b] sm:$0xff]  ;;  %v5034_v11 = vld [vmem:[%s7247_s2 + $0x110] sm:$0xff]  ;;  %v741_v61 = vpack.c.bf16 %v715_v54, %v715_v54 }
 0x13f   : > { %v1002_v16 = vunpack.c.l.b16 %v690_v9  ;;  %v5664_v23 = vpop.f32.mrf.mxu1  ;;  %v754_v54 = vld [vmem:[#allocation2 + $0x1c] sm:$0xff] }
 0x140   : > { %v941_v20 = vpack.c.b16 %v924_v15, %v923_v12  ;;  %v864_v24 = vpack.c.b16 %v848_v18, %v847_v17  ;;  %v740_v17 = vpack.c.bf16 %v714_v8, %v714_v8 }
 0x141   : > { %v1019_v21 = vpack.c.b16 %v1002_v16, %v1001_v13  ;;  %v475_v25 = vpop.f32.mrf.mxu0  ;;  %v713_v13 = vld [vmem:[#allocation2 + $0x73] sm:$0xff]  ;;  %1818 = vmatpush.bf16.msrb.mxu1 %v5034_v11  ;;  %v1079_v11 = vunpack.c.l.b16 %v741_v61 }
 0x142   : > { %v510_v26 = vmax.f32 %v475_v25, 0.0  ;;  %1639 = vmatmul.bf16.gmra.mxu2 %v941_v20  ;;  %1570 = vmatmul.bf16.gmra.mxu1 %v864_v24  ;;  %v739_v25 = vpack.c.bf16 %v713_v13, %v713_v13 }
 0x143   : > { %1713 = vmatmul.bf16.gmra.mxu3 %v1019_v21  ;;  %v613_v32 = vld [vmem:[#allocation2 + $0x91] sm:$0xff]  ;;  %v5033_v21 = vld [vmem:[%s7247_s2 + $0x108] sm:$0xff] }
 0x144   : > { %536 = vst [vmem:[#allocation2 + $0xa0] sm:$0xff] %v510_v26  ;;  %1772 = vmatmul.bf16.gmra.mxu0 %v1094_v27  ;;  %v665_v33 = vld [vmem:[#allocation2 + $0x92] sm:$0xff]  ;;  %v639_v39 = vpack.c.bf16 %v613_v32, %v613_v32  ;;  %v589_v42 = vpack.c.bf16 %v510_v26, %v510_v26  ;;  %v1077_v41 = vunpack.c.l.b16 %v739_v25 }
 0x145   : > { %v1600_v29 = vpop.f32.mrf.mxu2  ;;  %v691_v40 = vpack.c.bf16 %v665_v33, %v665_v33  ;;  %1819 = vmatpush.bf16.msrb.mxu1 %v5033_v21 }
 0x146   : > { %v1674_v30 = vpop.f32.mrf.mxu3  ;;  %v1601_v31 = vadd.f32 %v1600_v29, %v1527_v28  ;;  %v925_v52 = vunpack.c.l.b16 %v639_v39  ;;  %v849_v55 = vunpack.c.l.b16 %v589_v42 }
 0x147   : > { %v5669_v36 = vpop.f32.mrf.mxu1  ;;  %v1003_v53 = vunpack.c.l.b16 %v691_v40 }
 0x148   : > { %v5667_v35 = vadd.f32 %v1674_v30, %v1601_v31  ;;  %v1078_v31 = vunpack.c.l.b16 %v740_v17 }
 0x149   : > { %v477_v38 = vpop.f32.mrf.mxu0 }
 0x14a   : > { %v511_v43 = vmax.f32 %v477_v38, 0.0  ;;  %v5032_v38 = vld [vmem:[%s7247_s2 + $0x100] sm:$0xff] }
 0x14b   : > { %v614_v45 = vld [vmem:[#allocation2 + $0x99] sm:$0xff]  ;;  %1820 = vmatpush.bf16.msrb.mxu1 %v5032_v38 }
 0x14c   : > { %v666_v46 = vld [vmem:[#allocation2 + $0x9a] sm:$0xff]  ;;  %537 = vst [vmem:[#allocation2 + $0xa8] sm:$0xff] %v511_v43  ;;  %v640_v48 = vpack.c.bf16 %v614_v45, %v614_v45  ;;  %v590_v50 = vpack.c.bf16 %v511_v43, %v511_v43 }
 0x14d   : > { %v692_v49 = vpack.c.bf16 %v666_v46, %v666_v46  ;;  %v1602_v51 = vpop.f32.mrf.mxu2  ;;  %v1096_v46 = vpack.c.b16 %v1078_v31, %v1077_v41  ;;  %v718_v25 = vld [vmem:[#allocation2 + $0x9b] sm:$0xff]  ;;  %v717_v31 = vld [vmem:[#allocation2 + $0x93] sm:$0xff] }
 0x14e   : > { %v1603_v57 = vadd.f32 %v1602_v51, %v1529_v44  ;;  %v926_v58 = vunpack.c.l.b16 %v640_v48  ;;  %v850_v60 = vunpack.c.l.b16 %v590_v50  ;;  %v1676_v62 = vpop.f32.mrf.mxu3  ;;  %v743_v38 = vpack.c.bf16 %v717_v31, %v717_v31 }
 0x14f   : > { %v1004_v59 = vunpack.c.l.b16 %v692_v49  ;;  %v5674_v2 = vpop.f32.mrf.mxu1  ;;  %v716_v49 = vld [vmem:[#allocation2 + $0x8b] sm:$0xff] }
 0x150   : > { %v5672_v63 = vadd.f32 %v1676_v62, %v1603_v57  ;;  %v942_v0 = vpack.c.b16 %v926_v58, %v925_v52  ;;  %v865_v3 = vpack.c.b16 %v850_v60, %v849_v55  ;;  %v742_v55 = vpack.c.bf16 %v716_v49, %v716_v49 }
 0x151   : > { %v1020_v1 = vpack.c.b16 %v1004_v59, %v1003_v53  ;;  %v480_v5 = vpop.f32.mrf.mxu0 }
 0x152   : > { %v512_v6 = vmax.f32 %v480_v5, 0.0  ;;  %1644 = vmatmul.bf16.gmra.mxu2 %v942_v0  ;;  %1575 = vmatmul.bf16.gmra.mxu1 %v865_v3  ;;  %v1080_v4 = vunpack.c.l.b16 %v742_v55 }
 0x153   : > { %1718 = vmatmul.bf16.gmra.mxu3 %v1020_v1  ;;  %v615_v9 = vld [vmem:[#allocation2 + $0xa1] sm:$0xff] }
 0x154   : > { %538 = vst [vmem:[#allocation2 + $0xb0] sm:$0xff] %v512_v6  ;;  %1777 = vmatmul.bf16.gmra.mxu0 %v1095_v7  ;;  %v667_v10 = vld [vmem:[#allocation2 + $0xa2] sm:$0xff]  ;;  %v641_v15 = vpack.c.bf16 %v615_v9, %v615_v9  ;;  %v591_v20 = vpack.c.bf16 %v512_v6, %v512_v6  ;;  %v1097_v17 = vpack.c.b16 %v1080_v4, %v1079_v11 }
 0x155   : > { %v693_v16 = vpack.c.bf16 %v667_v10, %v667_v10  ;;  %v755_v11 = vld [vmem:[#allocation2 + $0x24] sm:$0xff] }
 0x156   : > { %v927_v29 = vunpack.c.l.b16 %v641_v15  ;;  %v851_v34 = vunpack.c.l.b16 %v591_v20 }
 0x157   : > { %v5682_v12 = vpop.f32.mrf.mxu1  ;;  %v1005_v30 = vunpack.c.l.b16 %v693_v16 }
 0x159   : > { %v482_v14 = vpop.f32.mrf.mxu0 }
 0x15a   : > { %v513_v18 = vmax.f32 %v482_v14, 0.0 }
 0x15b   : > { %v616_v22 = vld [vmem:[#allocation2 + $0xa9] sm:$0xff] }
 0x15c   : > { %v668_v24 = vld [vmem:[#allocation2 + $0xaa] sm:$0xff]  ;;  %539 = vst [vmem:[#allocation2 + $0xb8] sm:$0xff] %v513_v18  ;;  %v642_v26 = vpack.c.bf16 %v616_v22, %v616_v22  ;;  %v592_v28 = vpack.c.bf16 %v513_v18, %v513_v18 }
 0x15d   : > { %v694_v27 = vpack.c.bf16 %v668_v24, %v668_v24  ;;  %v752_v24 = vld [vmem:[#allocation2 + $0xc] sm:$0xff] }
 0x15e   : > { %v928_v32 = vunpack.c.l.b16 %v642_v26  ;;  %v852_v37 = vunpack.c.l.b16 %v592_v28  ;;  %v720_v55 = vld [vmem:[#allocation2 + $0xab] sm:$0xff] }
 0x15f   : > { %v1006_v33 = vunpack.c.l.b16 %v694_v27  ;;  %v5690_v42 = vpop.f32.mrf.mxu1 }
 0x160   : > { %v943_v39 = vpack.c.b16 %v928_v32, %v927_v29  ;;  %v866_v43 = vpack.c.b16 %v852_v37, %v851_v34  ;;  %v744_v37 = vpack.c.bf16 %v718_v25, %v718_v25 }
 0x161   : > { %v1021_v40 = vpack.c.b16 %v1006_v33, %v1005_v30  ;;  %v485_v44 = vpop.f32.mrf.mxu0  ;;  %v778_v33 = vpack.c.bf16 %v752_v24, %v752_v24 }
 0x162   : > { %v514_v45 = vmax.f32 %v485_v44, 0.0  ;;  %1649 = vmatmul.bf16.gmra.mxu2 %v943_v39  ;;  %1580 = vmatmul.bf16.gmra.mxu1 %v866_v43 }
 0x163   : > { %1723 = vmatmul.bf16.gmra.mxu3 %v1021_v40  ;;  %v617_v47 = vld [vmem:[#allocation2 + $0xb1] sm:$0xff] }
 0x164   : > { %540 = vst [vmem:[#allocation2 + $0xc0] sm:$0xff] %v514_v45  ;;  %1782 = vmatmul.bf16.gmra.mxu0 %v1096_v46  ;;  %v669_v48 = vld [vmem:[#allocation2 + $0xb2] sm:$0xff]  ;;  %v643_v52 = vpack.c.bf16 %v617_v47, %v617_v47  ;;  %v593_v57 = vpack.c.bf16 %v514_v45, %v514_v45  ;;  %v1142_v45 = vunpack.c.l.b16 %v778_v33  ;;  %v1082_v46 = vunpack.c.l.b16 %v744_v37 }
 0x165   : > { %v695_v53 = vpack.c.bf16 %v669_v48, %v669_v48  ;;  %v757_v33 = vld [vmem:[#allocation2 + $0x34] sm:$0xff] }
 0x166   : > { %v929_v1 = vunpack.c.l.b16 %v643_v52  ;;  %v853_v7 = vunpack.c.l.b16 %v593_v57  ;;  %v753_v57 = vld [vmem:[#allocation2 + $0x14] sm:$0xff] }
 0x167   : > { %v5692_v50 = vpop.f32.mrf.mxu1  ;;  %v1007_v3 = vunpack.c.l.b16 %v695_v53 }
 0x169   : > { %v487_v51 = vpop.f32.mrf.mxu0 }
 0x16a   : > { %v515_v56 = vmax.f32 %v487_v51, 0.0  ;;  %v1081_v51 = vunpack.c.l.b16 %v743_v38 }
 0x16b   : > { %v618_v58 = vld [vmem:[#allocation2 + $0xb9] sm:$0xff] }
 0x16c   : > { %v670_v59 = vld [vmem:[#allocation2 + $0xba] sm:$0xff]  ;;  %541 = vst [vmem:[#allocation2 + $0xc8] sm:$0xff] %v515_v56  ;;  %v644_v60 = vpack.c.bf16 %v618_v58, %v618_v58  ;;  %v594_v0 = vpack.c.bf16 %v515_v56, %v515_v56  ;;  %v719_v58 = vld [vmem:[#allocation2 + $0xa3] sm:$0xff] }
 0x16d   : > { %v696_v62 = vpack.c.bf16 %v670_v59, %v670_v59  ;;  %v780_v59 = vpack.c.bf16 %v754_v54, %v754_v54  ;;  %v745_v61 = vpack.c.bf16 %v719_v58, %v719_v58 }
 0x16e   : > { %v930_v5 = vunpack.c.l.b16 %v644_v60  ;;  %v854_v8 = vunpack.c.l.b16 %v594_v0  ;;  %v746_v60 = vpack.c.bf16 %v720_v55, %v720_v55 }
 0x16f   : > { %v1008_v6 = vunpack.c.l.b16 %v696_v62  ;;  %v5694_v13 = vpop.f32.mrf.mxu1  ;;  %v779_v62 = vpack.c.bf16 %v753_v57, %v753_v57  ;;  %v1144_v0 = vunpack.c.l.b16 %v780_v59  ;;  %v1083_v4 = vunpack.c.l.b16 %v745_v61  ;;  %v761_v61 = vld [vmem:[#allocation2 + $0x54] sm:$0xff] }
 0x170   : > { %v944_v9 = vpack.c.b16 %v930_v5, %v929_v1  ;;  %v867_v14 = vpack.c.b16 %v854_v8, %v853_v7  ;;  %v1084_v1 = vunpack.c.l.b16 %v746_v60  ;;  %v756_v8 = vld [vmem:[#allocation2 + $0x2c] sm:$0xff]  ;;  %v762_v60 = vld [vmem:[#allocation2 + $0x5c] sm:$0xff] }
 0x171   : > { %v1022_v10 = vpack.c.b16 %v1008_v6, %v1007_v3  ;;  %v1748_v15 = vpop.f32.mrf.mxu0  ;;  %v1143_v3 = vunpack.c.l.b16 %v779_v62 }
 0x172   : > { %v5697_v16 = vadd.f32 %v1748_v15, %v5667_v35  ;;  %1654 = vmatmul.bf16.gmra.mxu2 %v944_v9  ;;  %1585 = vmatmul.bf16.gmra.mxu1 %v867_v14  ;;  %v751_v35 = vld [vmem:[#allocation2 + $0x4] sm:$0xff]  ;;  %v1099_v7 = vpack.c.b16 %v1084_v1, %v1083_v4  ;;  %v722_v9 = vld [vmem:[#allocation2 + $0xbb] sm:$0xff]  ;;  %v721_v14 = vld [vmem:[#allocation2 + $0xb3] sm:$0xff]  ;;  %v782_v15 = vpack.c.bf16 %v756_v8, %v756_v8 }
 0x173   : > { %1728 = vmatmul.bf16.gmra.mxu3 %v1022_v10  ;;  %v619_v18 = vld [vmem:[#allocation2 + $0xc1] sm:$0xff]  ;;  %v620_v20 = vld [vmem:[#allocation2 + $0xc9] sm:$0xff]  ;;  %v777_v39 = vpack.c.bf16 %v751_v35, %v751_v35  ;;  %v1168_v6 = vpack.c.b16 %v1144_v0, %v1143_v3  ;;  %v788_v0 = vpack.c.bf16 %v762_v60, %v762_v60  ;;  %v787_v1 = vpack.c.bf16 %v761_v61, %v761_v61 }
 0x174   : > { %1787 = vmatmul.bf16.gmra.mxu0 %v1097_v17  ;;  %v671_v21 = vld [vmem:[#allocation2 + $0xc2] sm:$0xff]  ;;  %v672_v22 = vld [vmem:[#allocation2 + $0xca] sm:$0xff]  ;;  %v645_v27 = vpack.c.bf16 %v619_v18, %v619_v18  ;;  %v646_v28 = vpack.c.bf16 %v620_v20, %v620_v20  ;;  %v748_v17 = vpack.c.bf16 %v722_v9, %v722_v9  ;;  %v781_v18 = vpack.c.bf16 %v755_v11, %v755_v11  ;;  %v1605_v9 = vpop.f32.mrf.mxu2 }
 0x175   : > { %v697_v29 = vpack.c.bf16 %v671_v21, %v671_v21  ;;  %v698_v30 = vpack.c.bf16 %v672_v22, %v672_v22  ;;  %v1141_v47 = vunpack.c.l.b16 %v777_v39  ;;  %v747_v20 = vpack.c.bf16 %v721_v14, %v721_v14  ;;  %v723_v31 = vld [vmem:[#allocation2 + $0xc3] sm:$0xff]  ;;  %v724_v35 = vld [vmem:[#allocation2 + $0xcb] sm:$0xff] }
 0x176   : > { %v931_v40 = vunpack.c.l.b16 %v645_v27  ;;  %v932_v41 = vunpack.c.l.b16 %v646_v28  ;;  %v1146_v21 = vunpack.c.l.b16 %v782_v15  ;;  %v1086_v22 = vunpack.c.l.b16 %v748_v17  ;;  %v764_v8 = vld [vmem:[#allocation2 + $0x6c] sm:$0xff]  ;;  %v763_v14 = vld [vmem:[#allocation2 + $0x64] sm:$0xff] }
 0x177   : > { %v5699_v26 = vpop.f32.mrf.mxu1  ;;  %v1009_v43 = vunpack.c.l.b16 %v697_v29  ;;  %v1010_v44 = vunpack.c.l.b16 %v698_v30  ;;  %v1167_v53 = vpack.c.b16 %v1142_v45, %v1141_v47  ;;  %v1145_v24 = vunpack.c.l.b16 %v781_v18  ;;  %v758_v30 = vld [vmem:[#allocation2 + $0x3c] sm:$0xff]  ;;  %v1679_v18 = vpop.f32.mrf.mxu3 }
 0x178   : > { %v945_v48 = vpack.c.b16 %v932_v41, %v931_v40  ;;  %v1085_v25 = vunpack.c.l.b16 %v747_v20  ;;  %v784_v37 = vpack.c.bf16 %v758_v30, %v758_v30  ;;  %v749_v38 = vpack.c.bf16 %v723_v31, %v723_v31 }
 0x179   : > { %v1750_v32 = vpop.f32.mrf.mxu0  ;;  %v1023_v49 = vpack.c.b16 %v1010_v44, %v1009_v43  ;;  %v1169_v28 = vpack.c.b16 %v1146_v21, %v1145_v24  ;;  %v750_v39 = vpack.c.bf16 %v724_v35, %v724_v35  ;;  %v783_v40 = vpack.c.bf16 %v757_v33, %v757_v33  ;;  %v765_v33 = vld [vmem:[#allocation2 + $0x74] sm:$0xff] }
 0x17a   : > { %v5702_v34 = vadd.f32 %v1750_v32, %v5672_v63  ;;  %v1098_v63 = vpack.c.b16 %v1082_v46, %v1081_v51  ;;  %v1100_v29 = vpack.c.b16 %v1086_v22, %v1085_v25  ;;  %v1148_v41 = vunpack.c.l.b16 %v784_v37 }
 0x17b   : > { %v1087_v43 = vunpack.c.l.b16 %v749_v38  ;;  %v1088_v44 = vunpack.c.l.b16 %v750_v39  ;;  %v1147_v45 = vunpack.c.l.b16 %v783_v40  ;;  %v1152_v3 = vunpack.c.l.b16 %v788_v0 }
 0x17c   : > { %v1151_v4 = vunpack.c.l.b16 %v787_v1  ;;  %v790_v15 = vpack.c.bf16 %v764_v8, %v764_v8  ;;  %v789_v17 = vpack.c.bf16 %v763_v14, %v763_v14  ;;  %v791_v38 = vpack.c.bf16 %v765_v33, %v765_v33 }
 0x17d   : > { %v1170_v47 = vpack.c.b16 %v1148_v41, %v1147_v45 }
 0x17e   : > { %v1154_v20 = vunpack.c.l.b16 %v790_v15  ;;  %v1153_v22 = vunpack.c.l.b16 %v789_v17  ;;  %v1155_v41 = vunpack.c.l.b16 %v791_v38  ;;  %v770_v15 = vld [vmem:[#allocation2 + $0x9c] sm:$0xff]  ;;  %v1532_v17 = vadd.f32 %v5662_v19, %v5664_v23 }
 0x17f   : > { %v5704_v52 = vpop.f32.mrf.mxu1  ;;  %v1681_v30 = vpop.f32.mrf.mxu3  ;;  %v796_v33 = vpack.c.bf16 %v770_v15, %v770_v15 }
 0x180   : > { %v1173_v25 = vpack.c.b16 %v1154_v20, %v1153_v22  ;;  %v769_v22 = vld [vmem:[#allocation2 + $0x94] sm:$0xff] }
 0x181   : > { %v1753_v21 = vpop.f32.mrf.mxu0  ;;  %v795_v38 = vpack.c.bf16 %v769_v22, %v769_v22 }
 0x182   : > { %1659 = vmatmul.bf16.gmra.mxu2 %v945_v48  ;;  %1821 = vmatmul.bf16.vlgmr.msrb.gmra.mxu1 %v1167_v53  ;;  %v1101_v48 = vpack.c.b16 %v1088_v44, %v1087_v43  ;;  %v759_v53 = vld [vmem:[#allocation2 + $0x44] sm:$0xff] }
 0x183   : > { %1733 = vmatmul.bf16.gmra.mxu3 %v1023_v49  ;;  %v760_v49 = vld [vmem:[#allocation2 + $0x4c] sm:$0xff]  ;;  %v785_v54 = vpack.c.bf16 %v759_v53, %v759_v53  ;;  %v1159_v23 = vunpack.c.l.b16 %v795_v38  ;;  %v1539_v38 = vadd.f32 %v5662_v19, %v5682_v12 }
 0x184   : > { %1792 = vmatmul.bf16.gmra.mxu0 %v1098_v63  ;;  %v786_v63 = vpack.c.bf16 %v760_v49, %v760_v49  ;;  %v768_v49 = vld [vmem:[#allocation2 + $0x8c] sm:$0xff] }
 0x185   : > { %v1149_v57 = vunpack.c.l.b16 %v785_v54  ;;  %v794_v54 = vpack.c.bf16 %v768_v49, %v768_v49 }
 0x186   : > { %v1150_v55 = vunpack.c.l.b16 %v786_v63  ;;  %v767_v63 = vld [vmem:[#allocation2 + $0x84] sm:$0xff] }
 0x187   : > { %v5706_v56 = vpop.f32.mrf.mxu1  ;;  %v1684_v44 = vpop.f32.mrf.mxu3  ;;  %v1158_v60 = vunpack.c.l.b16 %v794_v54 }
 0x188   : > { %v1171_v59 = vpack.c.b16 %v1150_v55, %v1149_v57  ;;  %v793_v57 = vpack.c.bf16 %v767_v63, %v767_v63 }
 0x189   : > { %v1755_v31 = vpop.f32.mrf.mxu0 }
 0x18a   : > { %v1157_v61 = vunpack.c.l.b16 %v793_v57 }
 0x18f   : > { %v5708_v5 = vpop.f32.mrf.mxu1  ;;  %v5740_v55 = vpop.f32.mrf.mxu3 }
 0x192   : > { %1826 = vmatmul.bf16.gmra.mxu1 %v1168_v6 }
 0x194   : > { %1797 = vmatmul.bf16.gmra.mxu0 %v1099_v7  ;;  %v1172_v7 = vpack.c.b16 %v1152_v3, %v1151_v4  ;;  %v1175_v4 = vpack.c.b16 %v1158_v60, %v1157_v61 }
 0x197   : > { %v5710_v10 = vpop.f32.mrf.mxu1  ;;  %v5747_v8 = vpop.f32.mrf.mxu3 }
 0x19f   : > { %v5712_v27 = vpop.f32.mrf.mxu1  ;;  %v5758_v49 = vpop.f32.mrf.mxu3 }
 0x1a2   : > { %1831 = vmatmul.bf16.gmra.mxu1 %v1169_v28  ;;  %v1607_v28 = vpop.f32.mrf.mxu2 }
 0x1a4   : > { %1802 = vmatmul.bf16.gmra.mxu0 %v1100_v29  ;;  %v766_v29 = vld [vmem:[#allocation2 + $0x7c] sm:$0xff] }
 0x1a5   : > { %v792_v37 = vpack.c.bf16 %v766_v29, %v766_v29 }
 0x1a7   : > { %v5714_v32 = vpop.f32.mrf.mxu1  ;;  %v1156_v40 = vunpack.c.l.b16 %v792_v37 }
 0x1a9   : > { %v1174_v45 = vpack.c.b16 %v1156_v40, %v1155_v41  ;;  %v1160_v41 = vunpack.c.l.b16 %v796_v33 }
 0x1aa   : > { %v1610_v39 = vpop.f32.mrf.mxu2 }
 0x1ab   : > { %v1176_v60 = vpack.c.b16 %v1160_v41, %v1159_v23 }
 0x1af   : > { %v5716_v46 = vpop.f32.mrf.mxu1 }
 0x1b2   : > { %1836 = vmatmul.bf16.gmra.mxu1 %v1170_v47  ;;  %v5734_v47 = vpop.f32.mrf.mxu0 }
 0x1b4   : > { %1807 = vmatmul.bf16.gmra.mxu0 %v1101_v48  ;;  %v5736_v48 = vpop.f32.mrf.mxu2 }
 0x1b7   : > { %v5718_v51 = vpop.f32.mrf.mxu1 }
 0x1bc   : > { %v5744_v0 = vpop.f32.mrf.mxu2 }
 0x1bf   : > { %v5720_v58 = vpop.f32.mrf.mxu1 }
 0x1c2   : > { %1841 = vmatmul.bf16.gmra.mxu1 %v1171_v59  ;;  %v5742_v59 = vpop.f32.mrf.mxu0 }
 0x1c4   : > { %v5754_v37 = vpop.f32.mrf.mxu2 }
 0x1c7   : > { %v5722_v62 = vpop.f32.mrf.mxu1 }
 0x1ca   : > { %v5749_v14 = vpop.f32.mrf.mxu0 }
 0x1cf   : > { %v5724_v6 = vpop.f32.mrf.mxu1 }
 0x1d2   : > { %1846 = vmatmul.bf16.gmra.mxu1 %v1172_v7  ;;  %v5760_v54 = vpop.f32.mrf.mxu0 }
 0x1d7   : > { %v5726_v11 = vpop.f32.mrf.mxu1 }
 0x1da   : > { %v5768_v22 = vpop.f32.mrf.mxu0 }
 0x1df   : > { %v5728_v24 = vpop.f32.mrf.mxu1 }
 0x1e2   : > { %1851 = vmatmul.bf16.gmra.mxu1 %v1173_v25  ;;  %v1606_v25 = vadd.f32 %v1605_v9, %v1532_v17  ;;  %v5766_v17 = vpop.f32.mrf.mxu3 }
 0x1e4   : > { %v1680_v40 = vadd.f32 %v1679_v18, %v1606_v25 }
 0x1e6   : > { %v1754_v63 = vadd.f32 %v1753_v21, %v1680_v40  ;;  %v771_v21 = vld [vmem:[#allocation2 + $0xa4] sm:$0xff] }
 0x1e7   : > { %v5730_v35 = vpop.f32.mrf.mxu1 }
 0x1ef   : > { %v5732_v43 = vpop.f32.mrf.mxu1 }
 0x1f2   : > { %1856 = vmatmul.bf16.gmra.mxu1 %v1174_v45  ;;  %v1534_v45 = vadd.f32 %v5662_v19, %v5669_v36  ;;  %v1537_v36 = vadd.f32 %v5662_v19, %v5674_v2 }
 0x1f4   : > { %v1608_v57 = vadd.f32 %v1607_v28, %v1534_v45  ;;  %v1611_v15 = vadd.f32 %v1610_v39, %v1537_v36  ;;  %v1613_v39 = vadd.f32 %v5736_v48, %v1539_v38  ;;  %v775_v38 = vld [vmem:[#allocation2 + $0xc4] sm:$0xff] }
 0x1f6   : > { %v1682_v18 = vadd.f32 %v1681_v30, %v1608_v57  ;;  %v1685_v33 = vadd.f32 %v1684_v44, %v1611_v15  ;;  %v1687_v44 = vadd.f32 %v5740_v55, %v1613_v39  ;;  %v774_v57 = vld [vmem:[#allocation2 + $0xbc] sm:$0xff] }
 0x1f7   : > { %v5738_v53 = vpop.f32.mrf.mxu1 }
 0x1f8   : > { %v1759_v2 = vadd.f32 %v5734_v47, %v1685_v33  ;;  %v1761_v12 = vadd.f32 %v5742_v59, %v1687_v44 }
 0x1ff   : > { %v1822_v1 = vpop.f32.mrf.mxu1 }
 0x200   : > { %v1823_v3 = vadd.f32 %v1822_v1, %v5697_v16  ;;  %v5762_v1 = vpop.f32.mrf.mxu2 }
 0x202   : > { %v1887_v7 = vmax.f32 %v1823_v3, 0.0  ;;  %1861 = vmatmul.bf16.gmra.mxu1 %v1175_v4  ;;  %v772_v3 = vld [vmem:[#allocation2 + $0xac] sm:$0xff]  ;;  %v1756_v4 = vadd.f32 %v1755_v31, %v1682_v18 }
 0x203   : > { %v798_v28 = vpack.c.bf16 %v772_v3, %v772_v3  ;;  %v800_v3 = vpack.c.bf16 %v774_v57, %v774_v57 }
 0x204   : > { %1913 = vst [vmem:[#allocation3] sm:$0xff] %v1887_v7 }
 0x205   : > { %v1162_v30 = vunpack.c.l.b16 %v798_v28  ;;  %v1164_v55 = vunpack.c.l.b16 %v800_v3 }
 0x207   : > { %v1824_v20 = vpop.f32.mrf.mxu1 }
 0x208   : > { %v1825_v29 = vadd.f32 %v1824_v20, %v5702_v34 }
 0x20a   : > { %v1888_v16 = vmax.f32 %v1825_v29, 0.0  ;;  %v797_v29 = vpack.c.bf16 %v771_v21, %v771_v21 }
 0x20c   : > { %1914 = vst [vmem:[#allocation3 + $0x8] sm:$0xff] %v1888_v16  ;;  %v1622_v16 = vpop.f32.mrf.mxu2  ;;  %v1161_v31 = vunpack.c.l.b16 %v797_v29 }
 0x20e   : > { %v1177_v45 = vpack.c.b16 %v1162_v30, %v1161_v31  ;;  %v1547_v31 = vadd.f32 %v5662_v19, %v5694_v13  ;;  %v1549_v13 = vadd.f32 %v5662_v19, %v5699_v26 }
 0x20f   : > { %v1827_v9 = vpop.f32.mrf.mxu1 }
 0x210   : > { %v1828_v34 = vadd.f32 %v1827_v9, %v1754_v63  ;;  %v1696_v63 = vpop.f32.mrf.mxu3  ;;  %v1770_v9 = vpop.f32.mrf.mxu0 }
 0x212   : > { %v1889_v61 = vmax.f32 %v1828_v34, 0.0  ;;  %1866 = vmatmul.bf16.gmra.mxu1 %v1176_v60  ;;  %v1542_v34 = vadd.f32 %v5662_v19, %v5690_v42  ;;  %v1544_v42 = vadd.f32 %v5662_v19, %v5692_v50 }
 0x214   : > { %1915 = vst [vmem:[#allocation3 + $0x10] sm:$0xff] %v1889_v61  ;;  %v1625_v47 = vpop.f32.mrf.mxu2  ;;  %v773_v61 = vld [vmem:[#allocation2 + $0xb4] sm:$0xff]  ;;  %v1616_v48 = vadd.f32 %v5744_v0, %v1542_v34 }
 0x217   : > { %v1829_v7 = vpop.f32.mrf.mxu1 }
 0x218   : > { %v1830_v20 = vadd.f32 %v1829_v7, %v1756_v4  ;;  %v799_v4 = vpack.c.bf16 %v773_v61, %v773_v61  ;;  %v1690_v7 = vadd.f32 %v5747_v8, %v1616_v48  ;;  %v1699_v21 = vpop.f32.mrf.mxu3  ;;  %v1773_v15 = vpop.f32.mrf.mxu0  ;;  %v1623_v61 = vadd.f32 %v1622_v16, %v1549_v13 }
 0x21a   : > { %v1890_v25 = vmax.f32 %v1830_v20, 0.0  ;;  %v1764_v59 = vadd.f32 %v5749_v14, %v1690_v7  ;;  %v1163_v20 = vunpack.c.l.b16 %v799_v4  ;;  %v1697_v4 = vadd.f32 %v1696_v63, %v1623_v61 }
 0x21c   : > { %1916 = vst [vmem:[#allocation3 + $0x18] sm:$0xff] %v1890_v25  ;;  %v1618_v25 = vadd.f32 %v5754_v37, %v1544_v42  ;;  %v1178_v29 = vpack.c.b16 %v1164_v55, %v1163_v20  ;;  %v1627_v33 = vpop.f32.mrf.mxu2  ;;  %v1621_v37 = vadd.f32 %v5762_v1, %v1547_v31  ;;  %v1771_v55 = vadd.f32 %v1770_v9, %v1697_v4 }
 0x21e   : > { %v1692_v8 = vadd.f32 %v5758_v49, %v1618_v25  ;;  %v1695_v49 = vadd.f32 %v5766_v17, %v1621_v37  ;;  %v1552_v17 = vadd.f32 %v5662_v19, %v5704_v52  ;;  %v1554_v25 = vadd.f32 %v5662_v19, %v5706_v56 }
 0x21f   : > { %v1832_v40 = vpop.f32.mrf.mxu1 }
 0x220   : > { %v1833_v41 = vadd.f32 %v1832_v40, %v1759_v2  ;;  %v776_v2 = vld [vmem:[#allocation2 + $0xcc] sm:$0xff]  ;;  %v1701_v50 = vpop.f32.mrf.mxu3  ;;  %v1766_v14 = vadd.f32 %v5760_v54, %v1692_v8  ;;  %v1775_v40 = vpop.f32.mrf.mxu0 }
 0x222   : > { %v1891_v23 = vmax.f32 %v1833_v41, 0.0  ;;  %1871 = vmatmul.bf16.gmra.mxu1 %v1177_v45  ;;  %v801_v45 = vpack.c.bf16 %v775_v38, %v775_v38 }
 0x224   : > { %1917 = vst [vmem:[#allocation3 + $0x20] sm:$0xff] %v1891_v23  ;;  %v802_v23 = vpack.c.bf16 %v776_v2, %v776_v2  ;;  %v1630_v57 = vpop.f32.mrf.mxu2  ;;  %v1165_v34 = vunpack.c.l.b16 %v801_v45 }
 0x227   : > { %v1834_v60 = vpop.f32.mrf.mxu1 }
 0x228   : > { %v1835_v18 = vadd.f32 %v1834_v60, %v1761_v12  ;;  %v1166_v12 = vunpack.c.l.b16 %v802_v23  ;;  %v1769_v60 = vadd.f32 %v5768_v22, %v1695_v49  ;;  %v1704_v48 = vpop.f32.mrf.mxu3  ;;  %v1778_v3 = vpop.f32.mrf.mxu0 }
 0x22a   : > { %v1892_v36 = vmax.f32 %v1835_v18, 0.0  ;;  %v1179_v1 = vpack.c.b16 %v1166_v12, %v1165_v34 }
 0x22c   : > { %1918 = vst [vmem:[#allocation3 + $0x28] sm:$0xff] %v1892_v36  ;;  %v1632_v7 = vpop.f32.mrf.mxu2 }
 0x22f   : > { %v1837_v28 = vpop.f32.mrf.mxu1 }
 0x230   : > { %v1838_v0 = vadd.f32 %v1837_v28, %v1764_v59  ;;  %v1626_v59 = vadd.f32 %v1625_v47, %v1552_v17  ;;  %v1706_v20 = vpop.f32.mrf.mxu3  ;;  %v1780_v28 = vpop.f32.mrf.mxu0  ;;  %v1557_v47 = vadd.f32 %v5662_v19, %v5708_v5 }
 0x232   : > { %v1893_v30 = vmax.f32 %v1838_v0, 0.0  ;;  %1876 = vmatmul.bf16.gmra.mxu1 %v1178_v29  ;;  %v1700_v16 = vadd.f32 %v1699_v21, %v1626_v59  ;;  %v1631_v21 = vadd.f32 %v1630_v57, %v1557_v47 }
 0x234   : > { %1919 = vst [vmem:[#allocation3 + $0x30] sm:$0xff] %v1893_v30  ;;  %v1774_v0 = vadd.f32 %v1773_v15, %v1700_v16  ;;  %v1635_v29 = vpop.f32.mrf.mxu2  ;;  %v1628_v30 = vadd.f32 %v1627_v33, %v1554_v25  ;;  %v1705_v56 = vadd.f32 %v1704_v48, %v1631_v21  ;;  %v1559_v15 = vadd.f32 %v5662_v19, %v5710_v10 }
 0x236   : > { %v1702_v2 = vadd.f32 %v1701_v50, %v1628_v30  ;;  %v1779_v45 = vadd.f32 %v1778_v3, %v1705_v56  ;;  %v1564_v3 = vadd.f32 %v5662_v19, %v5714_v32  ;;  %v1569_v30 = vadd.f32 %v5662_v19, %v5718_v51 }
 0x237   : > { %v1839_v39 = vpop.f32.mrf.mxu1 }
 0x238   : > { %v1840_v41 = vadd.f32 %v1839_v39, %v1766_v14  ;;  %v1709_v52 = vpop.f32.mrf.mxu3  ;;  %v1783_v9 = vpop.f32.mrf.mxu0  ;;  %v1776_v31 = vadd.f32 %v1775_v40, %v1702_v2  ;;  %v1562_v40 = vadd.f32 %v5662_v19, %v5712_v27 }
 0x23a   : > { %v1894_v44 = vmax.f32 %v1840_v41, 0.0 }
 0x23c   : > { %1920 = vst [vmem:[#allocation3 + $0x38] sm:$0xff] %v1894_v44  ;;  %v1637_v37 = vpop.f32.mrf.mxu2  ;;  %v1633_v44 = vadd.f32 %v1632_v7, %v1559_v15 }
 0x23d   : > { %v1638_v7 = vadd.f32 %v1637_v37, %v1564_v3 }
 0x23e   : > { %v1707_v5 = vadd.f32 %v1706_v20, %v1633_v44 }
 0x23f   : > { %v1842_v54 = vpop.f32.mrf.mxu1 }
 0x240   : > { %v1843_v18 = vadd.f32 %v1842_v54, %v1769_v60  ;;  %v1711_v33 = vpop.f32.mrf.mxu3  ;;  %v1785_v50 = vpop.f32.mrf.mxu0  ;;  %v1781_v57 = vadd.f32 %v1780_v28, %v1707_v5  ;;  %v1636_v60 = vadd.f32 %v1635_v29, %v1562_v40 }
 0x241   : > { %v1712_v59 = vadd.f32 %v1711_v33, %v1638_v7 }
 0x242   : > { %v1895_v36 = vmax.f32 %v1843_v18, 0.0  ;;  %1881 = vmatmul.bf16.gmra.mxu1 %v1179_v1  ;;  %v1710_v18 = vadd.f32 %v1709_v52, %v1636_v60 }
 0x243   : > { %v1786_v20 = vadd.f32 %v1785_v50, %v1712_v59  ;;  %v5070_v59 = vld [vmem:[%s7249_s4 + $0xec] sm:$0xf0] }
 0x244   : > { %1921 = vst [vmem:[#allocation3 + $0x40] sm:$0xff] %v1895_v36  ;;  %v1640_v12 = vpop.f32.mrf.mxu2  ;;  %v1784_v36 = vadd.f32 %v1783_v9, %v1710_v18 }
 0x247   : > { %v1844_v42 = vpop.f32.mrf.mxu1 }
 0x248   : > { %v1845_v26 = vadd.f32 %v1844_v42, %v1771_v55  ;;  %v1714_v54 = vpop.f32.mrf.mxu3  ;;  %v1788_v48 = vpop.f32.mrf.mxu0 }
 0x24a   : > { %v1896_v22 = vmax.f32 %v1845_v26, 0.0  ;;  %v1567_v26 = vadd.f32 %v5662_v19, %v5716_v46 }
 0x24c   : > { %1922 = vst [vmem:[#allocation3 + $0x48] sm:$0xff] %v1896_v22  ;;  %v1642_v1 = vpop.f32.mrf.mxu2  ;;  %v1641_v16 = vadd.f32 %v1640_v12, %v1567_v26 }
 0x24d   : > { %v1643_v2 = vadd.f32 %v1642_v1, %v1569_v30  ;;  %v5102_v30 = vld [vmem:[%s7249_s4 + $0x1ec] sm:$0xf0] }
 0x24e   : > { %v1715_v29 = vadd.f32 %v1714_v54, %v1641_v16 }
 0x24f   : > { %v1847_v63 = vpop.f32.mrf.mxu1 }
 0x250   : > { %v1848_v8 = vadd.f32 %v1847_v63, %v1774_v0  ;;  %v1716_v55 = vpop.f32.mrf.mxu3  ;;  %v1790_v27 = vpop.f32.mrf.mxu0 }
 0x251   : > { %v1717_v46 = vadd.f32 %v1716_v55, %v1643_v2 }
 0x252   : > { %v1897_v38 = vmax.f32 %v1848_v8, 0.0  ;;  %v1789_v8 = vadd.f32 %v1788_v48, %v1715_v29 }
 0x253   : > { %v1791_v21 = vadd.f32 %v1790_v27, %v1717_v46  ;;  %v4211_v27 = vld [vmem:[%s7249_s4 + $0xe0] sm:$0xf] }
 0x254   : > { %1923 = vst [vmem:[#allocation3 + $0x50] sm:$0xff] %v1897_v38  ;;  %v1645_v22 = vpop.f32.mrf.mxu2 }
 0x257   : > { %v1849_v14 = vpop.f32.mrf.mxu1 }
 0x258   : > { %v1850_v39 = vadd.f32 %v1849_v14, %v1776_v31  ;;  %v1719_v32 = vpop.f32.mrf.mxu3  ;;  %v1793_v63 = vpop.f32.mrf.mxu0  ;;  %v1572_v31 = vadd.f32 %v5662_v19, %v5720_v58 }
 0x25a   : > { %v1898_v41 = vmax.f32 %v1850_v39, 0.0 }
 0x25c   : > { %1924 = vst [vmem:[#allocation3 + $0x58] sm:$0xff] %v1898_v41  ;;  %v1647_v9 = vpop.f32.mrf.mxu2  ;;  %v1646_v41 = vadd.f32 %v1645_v22, %v1572_v31 }
 0x25e   : > { %v1720_v51 = vadd.f32 %v1719_v32, %v1646_v41 }
 0x25f   : > { %v1852_v23 = vpop.f32.mrf.mxu1 }
 0x260   : > { %v1853_v49 = vadd.f32 %v1852_v23, %v1779_v45  ;;  %v1721_v14 = vpop.f32.mrf.mxu3  ;;  %v1795_v39 = vpop.f32.mrf.mxu0  ;;  %v5814_v45 = vld [vmem:[%s7248_s3] ss:$0 sm:$0xff]  ;;  %v1794_v23 = vadd.f32 %v1793_v63, %v1720_v51 }
 0x261   : > { %v1574_v50 = vadd.f32 %v5814_v45, %v5722_v62  ;;  %v1579_v1 = vadd.f32 %v5814_v45, %v5726_v11  ;;  %v1582_v11 = vadd.f32 %v5814_v45, %v5728_v24  ;;  %v4339_v63 = vld [vmem:[%s7249_s4 + $0x1e0] sm:$0xf]  ;;  %v1584_v24 = vadd.f32 %v5814_v45, %v5730_v35 }
 0x262   : > { %v1899_v34 = vmax.f32 %v1853_v49, 0.0  ;;  %v4195_v35 = vld [vmem:[%s7249_s4 + $0xc0] sm:$0xf] }
 0x263   : > { %v1648_v58 = vadd.f32 %v1647_v9, %v1574_v50 }
 0x264   : > { %1925 = vst [vmem:[#allocation3 + $0x60] sm:$0xff] %v1899_v34  ;;  %v1650_v33 = vpop.f32.mrf.mxu2 }
 0x265   : > { %v1722_v5 = vadd.f32 %v1721_v14, %v1648_v58 }
 0x267   : > { %v1854_v13 = vpop.f32.mrf.mxu1 }
 0x268   : > { %v1855_v61 = vadd.f32 %v1854_v13, %v1781_v57  ;;  %v1724_v44 = vpop.f32.mrf.mxu3  ;;  %v1798_v34 = vpop.f32.mrf.mxu0  ;;  %v1577_v57 = vadd.f32 %v5814_v45, %v5724_v6  ;;  %v1796_v13 = vadd.f32 %v1795_v39, %v1722_v5  ;;  %v1587_v39 = vadd.f32 %v5814_v45, %v5732_v43 }
 0x26a   : > { %v1900_v10 = vmax.f32 %v1855_v61, 0.0  ;;  %v1651_v54 = vadd.f32 %v1650_v33, %v1577_v57  ;;  %v5066_v33 = vld [vmem:[%s7249_s4 + $0xcc] sm:$0xf0] }
 0x26c   : > { %1926 = vst [vmem:[#allocation3 + $0x68] sm:$0xff] %v1900_v10  ;;  %v1652_v40 = vpop.f32.mrf.mxu2  ;;  %v1725_v18 = vadd.f32 %v1724_v44, %v1651_v54  ;;  %v1589_v44 = vadd.f32 %v5814_v45, %v5738_v53  ;;  %v4179_v54 = vld [vmem:[%s7249_s4 + $0xa0] sm:$0xf]  ;;  %v5062_v53 = vld [vmem:[%s7249_s4 + $0xac] sm:$0xf0] }
 0x26d   : > { %v1653_v7 = vadd.f32 %v1652_v40, %v1579_v1  ;;  %v4307_v45 = vld [vmem:[%s7249_s4 + $0x1a0] sm:$0xf]  ;;  %v5071_v1 = vld [vmem:[%s7249_s4 + $0xf4] sm:$0xf0] }
 0x26e   : > { %v1799_v3 = vadd.f32 %v1798_v34, %v1725_v18  ;;  %v4219_v18 = vld [vmem:[%s7249_s4 + $0xe8] sm:$0xf] }
 0x26f   : > { %v1857_v4 = vpop.f32.mrf.mxu1 }
 0x270   : > { %v1858_v17 = vadd.f32 %v1857_v4, %v1784_v36  ;;  %v1726_v48 = vpop.f32.mrf.mxu3  ;;  %v1800_v62 = vpop.f32.mrf.mxu0 }
 0x272   : > { %v1901_v42 = vmax.f32 %v1858_v17, 0.0 }
 0x274   : > { %1927 = vst [vmem:[#allocation3 + $0x70] sm:$0xff] %v1901_v42  ;;  %v1655_v36 = vpop.f32.mrf.mxu2  ;;  %v1727_v42 = vadd.f32 %v1726_v48, %v1653_v7  ;;  %v5094_v48 = vld [vmem:[%s7249_s4 + $0x1ac] sm:$0xf0] }
 0x275   : > { %v1656_v16 = vadd.f32 %v1655_v36, %v1582_v11 }
 0x276   : > { %v1801_v22 = vadd.f32 %v1800_v62, %v1727_v42  ;;  %v4180_v62 = vor.u32 %v5062_v53, %v4179_v54  ;;  %v5050_v53 = vld [vmem:[%s7249_s4 + $0x4c] sm:$0xf0] }
 0x277   : > { %v1859_v28 = vpop.f32.mrf.mxu1 }
 0x278   : > { %v1860_v25 = vadd.f32 %v1859_v28, %v1786_v20  ;;  %v1729_v6 = vpop.f32.mrf.mxu3  ;;  %v1803_v26 = vpop.f32.mrf.mxu0  ;;  %v4212_v20 = vor.u32 %v5070_v59, %v4211_v27 }
 0x279   : > { %v1730_v32 = vadd.f32 %v1729_v6, %v1656_v16  ;;  %v4203_v16 = vld [vmem:[%s7249_s4 + $0xc8] sm:$0xf] }
 0x27a   : > { %v1902_v0 = vmax.f32 %v1860_v25, 0.0  ;;  %3202 = vmatpush.bf16.msrb.mxu2 %v4212_v20 }
 0x27b   : > { %v1804_v2 = vadd.f32 %v1803_v26, %v1730_v32 }
 0x27c   : > { %1928 = vst [vmem:[#allocation3 + $0x78] sm:$0xff] %v1902_v0  ;;  %v1657_v0 = vpop.f32.mrf.mxu2 }
 0x27f   : > { %v1862_v38 = vpop.f32.mrf.mxu1 }
 0x280   : > { %v1863_v52 = vadd.f32 %v1862_v38, %v1789_v8  ;;  %v4340_v8 = vor.u32 %v5102_v30, %v4339_v63  ;;  %v1731_v38 = vpop.f32.mrf.mxu3  ;;  %v5063_v63 = vld [vmem:[%s7249_s4 + $0xb4] sm:$0xf0]  ;;  %v4163_v30 = vld [vmem:[%s7249_s4 + $0x80] sm:$0xf] }
 0x282   : > { %v1903_v47 = vmax.f32 %v1863_v52, 0.0  ;;  %v1805_v52 = vpop.f32.mrf.mxu0  ;;  %3215 = vmatpush.bf16.msrb.mxu3 %v4340_v8  ;;  %v5058_v8 = vld [vmem:[%s7249_s4 + $0x8c] sm:$0xf0] }
 0x284   : > { %1929 = vst [vmem:[#allocation3 + $0x80] sm:$0xff] %v1903_v47  ;;  %v1658_v47 = vadd.f32 %v1657_v0, %v1584_v24  ;;  %v1660_v14 = vpop.f32.mrf.mxu2  ;;  %v4187_v0 = vld [vmem:[%s7249_s4 + $0xa8] sm:$0xf] }
 0x287   : > { %v1864_v37 = vpop.f32.mrf.mxu1 }
 0x288   : > { %v1865_v56 = vadd.f32 %v1864_v37, %v1791_v21  ;;  %v1732_v21 = vadd.f32 %v1731_v38, %v1658_v47  ;;  %v1734_v51 = vpop.f32.mrf.mxu3 }
 0x28a   : > { %v1904_v15 = vmax.f32 %v1865_v56, 0.0  ;;  %v1806_v37 = vadd.f32 %v1805_v52, %v1732_v21  ;;  %v1661_v56 = vadd.f32 %v1660_v14, %v1587_v39  ;;  %v1808_v50 = vpop.f32.mrf.mxu0  ;;  %v4291_v52 = vld [vmem:[%s7249_s4 + $0x180] sm:$0xf]  ;;  %v5054_v21 = vld [vmem:[%s7249_s4 + $0x6c] sm:$0xf0] }
 0x28b   : > { %v4147_v14 = vld [vmem:[%s7249_s4 + $0x60] sm:$0xf] }
 0x28c   : > { %1930 = vst [vmem:[#allocation3 + $0x88] sm:$0xff] %v1904_v15  ;;  %v1735_v58 = vadd.f32 %v1734_v51, %v1661_v56  ;;  %v1662_v43 = vpop.f32.mrf.mxu2  ;;  %v4171_v56 = vld [vmem:[%s7249_s4 + $0x88] sm:$0xf] }
 0x28d   : > { %v1663_v40 = vadd.f32 %v1662_v43, %v1589_v44 }
 0x28f   : > { %v1867_v19 = vpop.f32.mrf.mxu1 }
 0x290   : > { %v1868_v49 = vadd.f32 %v1867_v19, %v1794_v23  ;;  %v4196_v23 = vor.u32 %v5066_v33, %v4195_v35  ;;  %v4148_v35 = vor.u32 %v5054_v21, %v4147_v14 }
 0x292   : > { %v1905_v12 = vmax.f32 %v1868_v49, 0.0  ;;  %3203 = vmatpush.bf16.msrb.mxu2 %v4196_v23  ;;  %v1809_v49 = vadd.f32 %v1808_v50, %v1735_v58  ;;  %v1810_v36 = vpop.f32.mrf.mxu0 }
 0x294   : > { %1931 = vst [vmem:[#allocation3 + $0x90] sm:$0xff] %v1905_v12 }
 0x296   : > { %3204 = vmatpush.bf16.msrb.mxu2 %v4180_v62  ;;  %v5163_v62 = vld [vmem:[%s7249_s4 + $0x3d4] sm:$0xf0] }
 0x297   : > { %v1869_v60 = vpop.f32.mrf.mxu1 }
 0x298   : > { %v1870_v61 = vadd.f32 %v1869_v60, %v1796_v13  ;;  %v4323_v13 = vld [vmem:[%s7249_s4 + $0x1c0] sm:$0xf]  ;;  %v5098_v60 = vld [vmem:[%s7249_s4 + $0x1cc] sm:$0xf0] }
 0x29a   : > { %v1906_v10 = vmax.f32 %v1870_v61, 0.0  ;;  %v4324_v61 = vor.u32 %v5098_v60, %v4323_v13 }
 0x29c   : > { %1932 = vst [vmem:[#allocation3 + $0x98] sm:$0xff] %v1906_v10  ;;  %3216 = vmatpush.bf16.msrb.mxu3 %v4324_v61 }
 0x29f   : > { %v1872_v4 = vpop.f32.mrf.mxu1 }
 0x2a0   : > { %v1873_v17 = vadd.f32 %v1872_v4, %v1799_v3  ;;  %v1736_v3 = vpop.f32.mrf.mxu3 }
 0x2a1   : > { %v1737_v42 = vadd.f32 %v1736_v3, %v1663_v40  ;;  %v5167_v40 = vld [vmem:[%s7249_s4 + $0x3f4] sm:$0xf0]  ;;  %v4115_v3 = vld [vmem:[%s7249_s4 + $0x20] sm:$0xf] }
 0x2a2   : > { %v1907_v55 = vmax.f32 %v1873_v17, 0.0  ;;  %v4308_v17 = vor.u32 %v5094_v48, %v4307_v45 }
 0x2a4   : > { %1933 = vst [vmem:[#allocation3 + $0xa0] sm:$0xff] %v1907_v55  ;;  %v4220_v55 = vor.u32 %v5071_v1, %v4219_v18  ;;  %3217 = vmatpush.bf16.msrb.mxu3 %v4308_v17 }
 0x2a6   : > { %3358 = vmatpush.bf16.msra.mxu0 %v4220_v55  ;;  %v4139_v55 = vld [vmem:[%s7249_s4 + $0x48] sm:$0xf] }
 0x2a7   : > { %v1874_v28 = vpop.f32.mrf.mxu1 }
 0x2a8   : > { %v1875_v25 = vadd.f32 %v1874_v28, %v1801_v22  ;;  %v1811_v22 = vadd.f32 %v1810_v36, %v1737_v42  ;;  %v5046_v36 = vld [vmem:[%s7249_s4 + $0x2c] sm:$0xf0]  ;;  %v5051_v42 = vld [vmem:[%s7249_s4 + $0x54] sm:$0xf0] }
 0x2aa   : > { %v1908_v29 = vmax.f32 %v1875_v25, 0.0  ;;  %v5067_v25 = vld [vmem:[%s7249_s4 + $0xd4] sm:$0xf0] }
 0x2ab   : > { %v4204_v32 = vor.u32 %v5067_v25, %v4203_v16  ;;  %v4123_v25 = vld [vmem:[%s7249_s4 + $0x28] sm:$0xf] }
 0x2ac   : > { %1934 = vst [vmem:[#allocation3 + $0xa8] sm:$0xff] %v1908_v29 }
 0x2ad   : > { %3359 = vmatpush.bf16.msra.mxu0 %v4204_v32  ;;  %v5159_v32 = vld [vmem:[%s7249_s4 + $0x3b4] sm:$0xf0] }
 0x2af   : > { %v1877_v9 = vpop.f32.mrf.mxu1 }
 0x2b0   : > { %v1878_v46 = vadd.f32 %v1877_v9, %v1804_v2  ;;  %v4164_v2 = vor.u32 %v5058_v8, %v4163_v30  ;;  %v5090_v9 = vld [vmem:[%s7249_s4 + $0x18c] sm:$0xf0]  ;;  %v4099_v8 = vld [vmem:[%s7249_s4] sm:$0xf] }
 0x2b2   : > { %v1909_v31 = vmax.f32 %v1878_v46, 0.0  ;;  %v4188_v46 = vor.u32 %v5063_v63, %v4187_v0  ;;  %3205 = vmatpush.bf16.msrb.mxu2 %v4164_v2  ;;  %v5047_v0 = vld [vmem:[%s7249_s4 + $0x34] sm:$0xf0]  ;;  %v4140_v63 = vor.u32 %v5051_v42, %v4139_v55  ;;  %v4715_v42 = vld [vmem:[%s7249_s4 + $0x4c8] sm:$0xf] }
 0x2b3   : > { %v5147_v55 = vld [vmem:[%s7249_s4 + $0x354] sm:$0xf0] }
 0x2b4   : > { %1935 = vst [vmem:[#allocation3 + $0xb0] sm:$0xff] %v1909_v31  ;;  %v4292_v31 = vor.u32 %v5090_v9, %v4291_v52  ;;  %3360 = vmatpush.bf16.msra.mxu0 %v4188_v46  ;;  %v4467_v46 = vld [vmem:[%s7249_s4 + $0x2e0] sm:$0xf] }
 0x2b6   : > { %3218 = vmatpush.bf16.msrb.mxu3 %v4292_v31  ;;  %3206 = vmatpush.bf16.msrb.mxu2 %v4148_v35  ;;  %v5134_v31 = vld [vmem:[%s7249_s4 + $0x2ec] sm:$0xf0] }
 0x2b7   : > { %v1879_v41 = vpop.f32.mrf.mxu1  ;;  %v4468_v21 = vor.u32 %v5134_v31, %v4467_v46  ;;  %v5187_v46 = vld [vmem:[%s7249_s4 + $0x494] sm:$0xf0] }
 0x2b8   : > { %v1880_v15 = vadd.f32 %v1879_v41, %v1806_v37 }
 0x2ba   : > { %v1910_v19 = vmax.f32 %v1880_v15, 0.0  ;;  %v5059_v15 = vld [vmem:[%s7249_s4 + $0x94] sm:$0xf0] }
 0x2bb   : > { %v1942_v12 = vld [vmem:[#allocation3] ss:$26 sm:$0xff]  ;;  %v1944_v5 = vld [vmem:[#allocation3 + $0x1] ss:$26 sm:$0xff]  ;;  %v4172_v44 = vor.u32 %v5059_v15, %v4171_v56  ;;  %v4107_v56 = vld [vmem:[%s7249_s4 + $0x8] sm:$0xf] }
 0x2bc   : > { %1936 = vst [vmem:[#allocation3 + $0xb8] sm:$0xff] %v1910_v19  ;;  %v5872_v6 = vmax.f32 %v1942_v12, %v1944_v5  ;;  %v4155_v19 = vld [vmem:[%s7249_s4 + $0x68] sm:$0xf]  ;;  %v5155_v15 = vld [vmem:[%s7249_s4 + $0x394] sm:$0xf0] }
 0x2bd   : > { %v4603_v5 = vld [vmem:[%s7249_s4 + $0x3e8] sm:$0xf]  ;;  %3361 = vmatpush.bf16.msra.mxu0 %v4172_v44  ;;  %v5078_v44 = vld [vmem:[%s7249_s4 + $0x12c] sm:$0xf0] }
 0x2be   : > { %v4604_v61 = vor.u32 %v5167_v40, %v4603_v5  ;;  %v4539_v5 = vld [vmem:[%s7249_s4 + $0x368] sm:$0xf] }
 0x2bf   : > { %v1882_v34 = vpop.f32.mrf.mxu1  ;;  %v4731_v40 = vld [vmem:[%s7249_s4 + $0x4e8] sm:$0xf] }
 0x2c0   : > { %v1883_v57 = vadd.f32 %v1882_v34, %v1809_v49  ;;  %v5055_v49 = vld [vmem:[%s7249_s4 + $0x74] sm:$0xf0]  ;;  %3397 = vmatpush.bf16.msra.mxu1 %v4604_v61  ;;  %v5074_v61 = vld [vmem:[%s7249_s4 + $0x10c] sm:$0xf0] }
 0x2c1   : > { %v4156_v18 = vor.u32 %v5055_v49, %v4155_v19  ;;  %v5043_v19 = vld [vmem:[%s7249_s4 + $0x14] sm:$0xf0] }
 0x2c2   : > { %v1911_v10 = vmax.f32 %v1883_v57, 0.0  ;;  %v4131_v57 = vld [vmem:[%s7249_s4 + $0x40] sm:$0xf] }
 0x2c3   : > { %v1950_v4 = vld [vmem:[#allocation3 + $0x2] ss:$26 sm:$0xff]  ;;  %v1952_v7 = vld [vmem:[#allocation3 + $0x3] ss:$26 sm:$0xff]  ;;  %v4132_v48 = vor.u32 %v5050_v53, %v4131_v57  ;;  %3362 = vmatpush.bf16.msra.mxu0 %v4156_v18 }
 0x2c4   : > { %1937 = vst [vmem:[#allocation3 + $0xc0] sm:$0xff] %v1911_v10  ;;  %v5874_v27 = vmax.f32 %v1950_v4, %v1952_v7  ;;  %v1958_v59 = vld [vmem:[#allocation3 + $0x4] ss:$26 sm:$0xff]  ;;  %v1960_v26 = vld [vmem:[#allocation3 + $0x5] ss:$26 sm:$0xff] }
 0x2c5   : > { %v1966_v20 = vld [vmem:[#allocation3 + $0x6] ss:$26 sm:$0xff]  ;;  %v1968_v11 = vld [vmem:[#allocation3 + $0x7] ss:$26 sm:$0xff]  ;;  %v5909_v37 = vmax.f32 %v1958_v59, %v1960_v26  ;;  %v4587_v10 = vld [vmem:[%s7249_s4 + $0x3c8] sm:$0xf]  ;;  %3207 = vmatpush.bf16.msrb.mxu2 %v4132_v48  ;;  %v4116_v59 = vor.u32 %v5046_v36, %v4115_v3 }
 0x2c6   : > { %v5306_v28 = vpack.i.bf16 %v5874_v27, %v5872_v6  ;;  %v1974_v38 = vld [vmem:[#allocation3 + $0x8] ss:$26 sm:$0xff]  ;;  %v1976_v47 = vld [vmem:[#allocation3 + $0x9] ss:$26 sm:$0xff]  ;;  %v5911_v41 = vmax.f32 %v1966_v20, %v1968_v11  ;;  %v4588_v1 = vor.u32 %v5163_v62, %v4587_v10  ;;  %v5086_v26 = vld [vmem:[%s7249_s4 + $0x16c] sm:$0xf0] }
 0x2c7   : > { %v1884_v29 = vpop.f32.mrf.mxu1  ;;  %v5919_v50 = vmax.f32 %v1974_v38, %v1976_v47  ;;  %v4275_v4 = vld [vmem:[%s7249_s4 + $0x160] sm:$0xf]  ;;  %v5082_v47 = vld [vmem:[%s7249_s4 + $0x14c] sm:$0xf0]  ;;  %3363 = vmatpush.bf16.msra.mxu0 %v4140_v63  ;;  %v5199_v57 = vld [vmem:[%s7249_s4 + $0x4f4] sm:$0xf0] }
 0x2c8   : > { %v1885_v24 = vadd.f32 %v1884_v29, %v1811_v22  ;;  %5307 = vrot.lane.b32.xlu0 %v5306_v28, %s5400_s13  ;;  %v5311_v34 = vpack.i.bf16 %v5911_v41, %v5909_v37  ;;  %v4276_v22 = vor.u32 %v5086_v26, %v4275_v4  ;;  %v4571_v29 = vld [vmem:[%s7249_s4 + $0x3a8] sm:$0xf]  ;;  %3398 = vmatpush.bf16.msra.mxu1 %v4588_v1  ;;  %v4259_v38 = vld [vmem:[%s7249_s4 + $0x140] sm:$0xf]  ;;  %v5126_v10 = vld [vmem:[%s7249_s4 + $0x2ac] sm:$0xf0] }
 0x2c9   : > { %v4572_v30 = vor.u32 %v5159_v32, %v4571_v29  ;;  %3208 = vmatpush.bf16.msrb.mxu2 %v4116_v59  ;;  %v4260_v14 = vor.u32 %v5082_v47, %v4259_v38  ;;  %v4435_v53 = vld [vmem:[%s7249_s4 + $0x2a0] sm:$0xf]  ;;  %v5166_v18 = vld [vmem:[%s7249_s4 + $0x3ec] sm:$0xf0]  ;;  %v4732_v3 = vor.u32 %v5199_v57, %v4731_v40  ;;  %v4523_v4 = vld [vmem:[%s7249_s4 + $0x348] sm:$0xf] }
 0x2ca   : > { %v1912_v39 = vmax.f32 %v1885_v24, 0.0  ;;  %v5042_v24 = vld [vmem:[%s7249_s4 + $0xc] sm:$0xf0]  ;;  %3219 = vmatpush.bf16.msrb.mxu3 %v4276_v22  ;;  %v4595_v62 = vld [vmem:[%s7249_s4 + $0x3e0] sm:$0xf]  ;;  %v4436_v26 = vor.u32 %v5126_v10, %v4435_v53  ;;  %v4524_v29 = vor.u32 %v5147_v55, %v4523_v4 }
 0x2cb   : > { %v1982_v33 = vld [vmem:[#allocation3 + $0xa] ss:$26 sm:$0xff]  ;;  %v1984_v51 = vld [vmem:[#allocation3 + $0xb] ss:$26 sm:$0xff]  ;;  %v4100_v9 = vor.u32 %v5042_v24, %v4099_v8 }
 0x2cc   : > { %1938 = vst [vmem:[#allocation3 + $0xc8] sm:$0xff] %v1912_v39  ;;  %v5921_v23 = vmax.f32 %v1982_v33, %v1984_v51  ;;  %v1990_v58 = vld [vmem:[#allocation3 + $0xc] ss:$26 sm:$0xff]  ;;  %v1992_v43 = vld [vmem:[#allocation3 + $0xd] ss:$26 sm:$0xff]  ;;  %v4124_v51 = vor.u32 %v5047_v0, %v4123_v25  ;;  %3399 = vmatpush.bf16.msra.mxu1 %v4572_v30 }
 0x2cd   : > { %v2006_v13 = vld [vmem:[#allocation3 + $0x10] ss:$26 sm:$0xff]  ;;  %v2000_v54 = vld [vmem:[#allocation3 + $0xf] ss:$26 sm:$0xff]  ;;  %v5962_v7 = vmax.f32 %v1990_v58, %v1992_v43  ;;  %3209 = vmatpush.bf16.msrb.mxu2 %v4100_v9 }
 0x2ce   : > { %v5316_v12 = vpack.i.bf16 %v5921_v23, %v5919_v50  ;;  %v1998_v60 = vld [vmem:[#allocation3 + $0xe] ss:$26 sm:$0xff]  ;;  %v2008_v45 = vld [vmem:[#allocation3 + $0x11] ss:$26 sm:$0xff]  ;;  %3220 = vmatpush.bf16.msrb.mxu3 %v4260_v14  ;;  %3364 = vmatpush.bf16.msra.mxu0 %v4124_v51 }
 0x2cf   : > { %v5964_v17 = vmax.f32 %v1998_v60, %v2000_v54  ;;  %v5975_v28 = vmax.f32 %v2006_v13, %v2008_v45  ;;  %v4555_v39 = vld [vmem:[%s7249_s4 + $0x388] sm:$0xf]  ;;  %v4243_v43 = vld [vmem:[%s7249_s4 + $0x120] sm:$0xf]  ;;  %v5151_v60 = vld [vmem:[%s7249_s4 + $0x374] sm:$0xf0]  ;;  %v4108_v45 = vor.u32 %v5043_v19, %v4107_v56 }
 0x2d0   : > { %5312 = vrot.lane.b32.xlu0 %v5311_v34, %s5400_s13  ;;  %5317 = vrot.lane.b32.xlu1 %v5316_v12, %s5400_s13  ;;  %v4556_v58 = vor.u32 %v5155_v15, %v4555_v39  ;;  %v4244_v49 = vor.u32 %v5078_v44, %v4243_v43  ;;  %v4451_v34 = vld [vmem:[%s7249_s4 + $0x2c0] sm:$0xf]  ;;  %v5130_v12 = vld [vmem:[%s7249_s4 + $0x2cc] sm:$0xf0]  ;;  %v4540_v48 = vor.u32 %v5151_v60, %v4539_v5 }
 0x2d1   : > { %v5321_v52 = vpack.i.bf16 %v5964_v17, %v5962_v7  ;;  %3228 = vmatpush.bf16.msra.mxu2 %v4468_v21  ;;  %v4452_v13 = vor.u32 %v5130_v12, %v4451_v34  ;;  %v4227_v54 = vld [vmem:[%s7249_s4 + $0x100] sm:$0xf]  ;;  %v5195_v59 = vld [vmem:[%s7249_s4 + $0x4d4] sm:$0xf0]  ;;  %v5122_v22 = vld [vmem:[%s7249_s4 + $0x28c] sm:$0xf0] }
 0x2d2   : > { %3400 = vmatpush.bf16.msra.mxu1 %v4556_v58  ;;  %3221 = vmatpush.bf16.msrb.mxu3 %v4244_v49  ;;  %v4228_v36 = vor.u32 %v5074_v61, %v4227_v54  ;;  %v4579_v25 = vld [vmem:[%s7249_s4 + $0x3c0] sm:$0xf]  ;;  %v5162_v0 = vld [vmem:[%s7249_s4 + $0x3cc] sm:$0xf0]  ;;  %v4716_v32 = vor.u32 %v5195_v59, %v4715_v42  ;;  %v4507_v63 = vld [vmem:[%s7249_s4 + $0x328] sm:$0xf] }
 0x2d3   : > { %v2014_v20 = vld [vmem:[#allocation3 + $0x12] ss:$26 sm:$0xff]  ;;  %v2016_v11 = vld [vmem:[#allocation3 + $0x13] ss:$26 sm:$0xff]  ;;  %3365 = vmatpush.bf16.msra.mxu0 %v4108_v45 }
 0x2d4   : > { %v5977_v16 = vmax.f32 %v2014_v20, %v2016_v11  ;;  %v2022_v35 = vld [vmem:[#allocation3 + $0x14] ss:$26 sm:$0xff]  ;;  %v2024_v33 = vld [vmem:[#allocation3 + $0x15] ss:$26 sm:$0xff]  ;;  %v4596_v20 = vor.u32 %v5166_v18, %v4595_v62  ;;  %v5118_v21 = vld [vmem:[%s7249_s4 + $0x26c] sm:$0xf0] }
 0x2d5   : > { %v6069_v1 = vmax.f32 %v2022_v35, %v2024_v33  ;;  %3229 = vmatpush.bf16.msra.mxu2 %v4452_v13  ;;  %v4419_v11 = vld [vmem:[%s7249_s4 + $0x280] sm:$0xf]  ;;  %v5143_v30 = vld [vmem:[%s7249_s4 + $0x334] sm:$0xf0]  ;;  %v4699_v8 = vld [vmem:[%s7249_s4 + $0x4a8] sm:$0xf] }
 0x2d6   : > { %v5326_v2 = vpack.i.bf16 %v5977_v16, %v5975_v28  ;;  %3401 = vmatpush.bf16.msra.mxu1 %v4540_v48  ;;  %3222 = vmatpush.bf16.msrb.mxu3 %v4228_v36  ;;  %v5191_v24 = vld [vmem:[%s7249_s4 + $0x4b4] sm:$0xf0]  ;;  %v4420_v38 = vor.u32 %v5122_v22, %v4419_v11  ;;  %v4683_v47 = vld [vmem:[%s7249_s4 + $0x488] sm:$0xf]  ;;  %v4403_v14 = vld [vmem:[%s7249_s4 + $0x260] sm:$0xf] }
 0x2d7   : > { %3410 = vmatpush.bf16.msrb.mxu0 %v4732_v3  ;;  %v4700_v9 = vor.u32 %v5191_v24, %v4699_v8  ;;  %v4684_v31 = vor.u32 %v5187_v46, %v4683_v47  ;;  %v4563_v39 = vld [vmem:[%s7249_s4 + $0x3a0] sm:$0xf]  ;;  %v4404_v56 = vor.u32 %v5118_v21, %v4403_v14  ;;  %v5158_v15 = vld [vmem:[%s7249_s4 + $0x3ac] sm:$0xf0]  ;;  %v4491_v35 = vld [vmem:[%s7249_s4 + $0x308] sm:$0xf] }
 0x2d8   : > { %5327 = vrot.lane.b32.xlu2 %v5326_v2, %s5400_s13  ;;  %5322 = vrot.lane.b32.xlu1 %v5321_v52, %s5400_s13  ;;  %v4580_v2 = vor.u32 %v5162_v0, %v4579_v25  ;;  %v4508_v52 = vor.u32 %v5143_v30, %v4507_v63  ;;  %v5139_v33 = vld [vmem:[%s7249_s4 + $0x314] sm:$0xf0]  ;;  %v4564_v51 = vor.u32 %v5158_v15, %v4563_v39  ;;  %v4667_v58 = vld [vmem:[%s7249_s4 + $0x468] sm:$0xf] }
 0x2d9   : > { %3230 = vmatpush.bf16.msra.mxu2 %v4436_v26  ;;  %v4492_v19 = vor.u32 %v5139_v33, %v4491_v35  ;;  %v5183_v43 = vld [vmem:[%s7249_s4 + $0x474] sm:$0xf0]  ;;  %v5101_v44 = vld [vmem:[%s7249_s4 + $0x1ec] sm:$0xf]  ;;  %v4349_v34 = vld [vmem:[%s7249_s4 + $0x1f8] sm:$0xf0] }
 0x2da   : > { %3241 = vmatpush.bf16.msra.mxu3 %v4596_v20  ;;  %3402 = vmatpush.bf16.msra.mxu1 %v4524_v29  ;;  %v4668_v49 = vor.u32 %v5183_v43, %v4667_v58  ;;  %v4387_v12 = vld [vmem:[%s7249_s4 + $0x240] sm:$0xf]  ;;  %v5114_v5 = vld [vmem:[%s7249_s4 + $0x24c] sm:$0xf0]  ;;  %v4352_v40 = vor.u32 %v5101_v44, %v4349_v34  ;;  %v4651_v54 = vld [vmem:[%s7249_s4 + $0x448] sm:$0xf] }
 0x2db   : > { %3411 = vmatpush.bf16.msrb.mxu0 %v4716_v32  ;;  %v4388_v57 = vor.u32 %v5114_v5, %v4387_v12  ;;  %v4547_v13 = vld [vmem:[%s7249_s4 + $0x380] sm:$0xf]  ;;  %v5154_v60 = vld [vmem:[%s7249_s4 + $0x38c] sm:$0xf0]  ;;  %v5179_v53 = vld [vmem:[%s7249_s4 + $0x454] sm:$0xf0] }
 0x2dc   : > { %v4548_v61 = vor.u32 %v5154_v60, %v4547_v13  ;;  %v5097_v45 = vld [vmem:[%s7249_s4 + $0x1cc] sm:$0xf]  ;;  %v4333_v48 = vld [vmem:[%s7249_s4 + $0x1d8] sm:$0xf0]  ;;  %v4652_v10 = vor.u32 %v5179_v53, %v4651_v54  ;;  %v4371_v18 = vld [vmem:[%s7249_s4 + $0x220] sm:$0xf] }
 0x2dd   : > { %3231 = vmatpush.bf16.msra.mxu2 %v4420_v38  ;;  %v4336_v62 = vor.u32 %v5097_v45, %v4333_v48  ;;  %v5110_v3 = vld [vmem:[%s7249_s4 + $0x22c] sm:$0xf0]  ;;  %v4531_v36 = vld [vmem:[%s7249_s4 + $0x360] sm:$0xf]  ;;  %v4635_v42 = vld [vmem:[%s7249_s4 + $0x428] sm:$0xf] }
 0x2de   : > { %3242 = vmatpush.bf16.msra.mxu3 %v4580_v2  ;;  %3403 = vmatpush.bf16.msra.mxu1 %v4508_v52  ;;  %v4372_v4 = vor.u32 %v5110_v3, %v4371_v18  ;;  %v5150_v55 = vld [vmem:[%s7249_s4 + $0x36c] sm:$0xf0]  ;;  %v5175_v59 = vld [vmem:[%s7249_s4 + $0x434] sm:$0xf0]  ;;  %v5093_v11 = vld [vmem:[%s7249_s4 + $0x1ac] sm:$0xf] }
 0x2df   : > { %3412 = vmatpush.bf16.msrb.mxu0 %v4700_v9  ;;  %v4532_v26 = vor.u32 %v5150_v55, %v4531_v36  ;;  %v4636_v20 = vor.u32 %v5175_v59, %v4635_v42  ;;  %v4317_v22 = vld [vmem:[%s7249_s4 + $0x1b8] sm:$0xf0]  ;;  %v4355_v25 = vld [vmem:[%s7249_s4 + $0x200] sm:$0xf]  ;;  %v5106_v29 = vld [vmem:[%s7249_s4 + $0x20c] sm:$0xf0] }
 0x2e0   : > { %2026 = vrot.lane.b32.xlu2 %v6069_v1, %s5400_s13  ;;  %v4320_v0 = vor.u32 %v5093_v11, %v4317_v22  ;;  %v4515_v32 = vld [vmem:[%s7249_s4 + $0x340] sm:$0xf]  ;;  %v5146_v63 = vld [vmem:[%s7249_s4 + $0x34c] sm:$0xf0]  ;;  %v4356_v30 = vor.u32 %v5106_v29, %v4355_v25  ;;  %v4619_v24 = vld [vmem:[%s7249_s4 + $0x408] sm:$0xf] }
 0x2e1   : > { %3232 = vmatpush.bf16.msra.mxu2 %v4404_v56  ;;  %v4516_v8 = vor.u32 %v5146_v63, %v4515_v32  ;;  %v5171_v38 = vld [vmem:[%s7249_s4 + $0x414] sm:$0xf0]  ;;  %v5089_v2 = vld [vmem:[%s7249_s4 + $0x18c] sm:$0xf]  ;;  %v4301_v9 = vld [vmem:[%s7249_s4 + $0x198] sm:$0xf0] }
 0x2e2   : > { %3243 = vmatpush.bf16.msra.mxu3 %v4564_v51  ;;  %3404 = vmatpush.bf16.msra.mxu1 %v4492_v19  ;;  %v4620_v52 = vor.u32 %v5171_v38, %v4619_v24  ;;  %v4304_v47 = vor.u32 %v5089_v2, %v4301_v9  ;;  %v4499_v46 = vld [vmem:[%s7249_s4 + $0x320] sm:$0xf]  ;;  %v5085_v21 = vld [vmem:[%s7249_s4 + $0x16c] sm:$0xf]  ;;  %v4285_v39 = vld [vmem:[%s7249_s4 + $0x178] sm:$0xf0] }
 0x2e3   : > { %3413 = vmatpush.bf16.msrb.mxu0 %v4684_v31  ;;  %v5142_v31 = vld [vmem:[%s7249_s4 + $0x32c] sm:$0xf0]  ;;  %v4288_v56 = vor.u32 %v5085_v21, %v4285_v39  ;;  %v4483_v15 = vld [vmem:[%s7249_s4 + $0x300] sm:$0xf]  ;;  %v5081_v51 = vld [vmem:[%s7249_s4 + $0x14c] sm:$0xf] }
 0x2e4   : > { %v4500_v14 = vor.u32 %v5142_v31, %v4499_v46  ;;  %v5138_v35 = vld [vmem:[%s7249_s4 + $0x30c] sm:$0xf0]  ;;  %v4269_v19 = vld [vmem:[%s7249_s4 + $0x158] sm:$0xf0]  ;;  %v5077_v43 = vld [vmem:[%s7249_s4 + $0x12c] sm:$0xf] }
 0x2e5   : > { %3233 = vmatpush.bf16.msra.mxu2 %v4388_v57  ;;  %v4484_v33 = vor.u32 %v5138_v35, %v4483_v15  ;;  %v4272_v58 = vor.u32 %v5081_v51, %v4269_v19  ;;  %v4253_v44 = vld [vmem:[%s7249_s4 + $0x138] sm:$0xf0]  ;;  %v5073_v34 = vld [vmem:[%s7249_s4 + $0x10c] sm:$0xf]  ;;  %v5198_v53 = vld [vmem:[%s7249_s4 + $0x4ec] sm:$0xf0] }
 0x2e6   : > { %3449 = vmatpush.bf16.msrb.mxu1 %v4352_v40  ;;  %3244 = vmatpush.bf16.msra.mxu3 %v4548_v61  ;;  %v4237_v12 = vld [vmem:[%s7249_s4 + $0x118] sm:$0xf0]  ;;  %v1939_v40 = vlaneseq  ;;  %v4723_v61 = vld [vmem:[%s7249_s4 + $0x4e0] sm:$0xf]  ;;  %v5133_v45 = vld [vmem:[%s7249_s4 + $0x2ec] sm:$0xf] }
 0x2e7   : > { %3414 = vmatpush.bf16.msrb.mxu0 %v4668_v49  ;;  %v4256_v49 = vor.u32 %v5077_v43, %v4253_v44  ;;  %v4240_v5 = vor.u32 %v5073_v34, %v4237_v12  ;;  %v4477_v48 = vld [vmem:[%s7249_s4 + $0x2f8] sm:$0xf0]  ;;  %v4724_v3 = vor.u32 %v5198_v53, %v4723_v61  ;;  %v5194_v42 = vld [vmem:[%s7249_s4 + $0x4cc] sm:$0xf0]  ;;  %v4851_v63 = vld [vmem:[%s7249_s4 + $0x5e0] sm:$0xf] }
 0x2e8   : > { %v6253_v57 = vand.u32 127, %v1939_v40  ;;  %v4480_v36 = vor.u32 %v5133_v45, %v4477_v48  ;;  %v5190_v29 = vld [vmem:[%s7249_s4 + $0x4ac] sm:$0xf0]  ;;  %v4445_v9 = vld [vmem:[%s7249_s4 + $0x2b8] sm:$0xf0]  ;;  %s299_s13 = scalar_lea.vmem [#allocation4], %s3910_s18 }
 0x2e9   : > { %3234 = vmatpush.bf16.msra.mxu2 %v4372_v4  ;;  %v4707_v4 = vld [vmem:[%s7249_s4 + $0x4c0] sm:$0xf]  ;;  %v5186_v21 = vld [vmem:[%s7249_s4 + $0x48c] sm:$0xf0]  ;;  %v5121_v19 = vld [vmem:[%s7249_s4 + $0x28c] sm:$0xf] }
 0x2ea   : > { %3450 = vmatpush.bf16.msrb.mxu1 %v4336_v62  ;;  %3245 = vmatpush.bf16.msra.mxu3 %v4532_v26  ;;  %vm1941_vm3 = vcmp.lt.s32.totalorder %v6253_v57, 64  ;;  %v4708_v22 = vor.u32 %v5194_v42, %v4707_v4  ;;  %v4675_v46 = vld [vmem:[%s7249_s4 + $0x480] sm:$0xf]  ;;  %v5182_v40 = vld [vmem:[%s7249_s4 + $0x46c] sm:$0xf0]  ;;  %s3844_s22 = sshll.u32 %s299_s13, 4  ;;  %s3845_s22 = int_to_ptr.vmem [resolvable:$true] %s3844_s22 }
 0x2eb   : > { %3415 = vmatpush.bf16.msrb.mxu0 %v4652_v10  ;;  %v4835_v39 = vld [vmem:[%s7249_s4 + $0x5c0] sm:$0xf]  ;;  %v4676_v44 = vor.u32 %v5186_v21, %v4675_v46  ;;  %v5229_v53 = vld [vmem:[%s7249_s4 + $0x5ec] sm:$0xf]  ;;  %v4861_v45 = vld [vmem:[%s7249_s4 + $0x5f8] sm:$0xf0] }
 0x2ec   : > { %v4864_v42 = vor.u32 %v5229_v53, %v4861_v45  ;;  %v4803_v57 = vld [vmem:[%s7249_s4 + $0x580] sm:$0xf]  ;;  %v5202_v53 = vld [vmem:[%s7249_s4 + $0x50c] sm:$0xf0]  ;;  %v5060_v45 = vld [vmem:[%s7249_s4 + $0xa4] sm:$0xf] }
 0x2ed   : > { %3235 = vmatpush.bf16.msra.mxu2 %v4356_v30  ;;  %v5230_v30 = vld [vmem:[%s7249_s4 + $0x5ec] sm:$0xf0]  ;;  %v4771_v21 = vld [vmem:[%s7249_s4 + $0x540] sm:$0xf] }
 0x2ee   : > { %3451 = vmatpush.bf16.msrb.mxu1 %v4320_v0  ;;  %3246 = vmatpush.bf16.msra.mxu3 %v4516_v8  ;;  %v4691_v0 = vld [vmem:[%s7249_s4 + $0x4a0] sm:$0xf] }
 0x2ef   : > { %3416 = vmatpush.bf16.msrb.mxu0 %v4636_v20 }
 0x2f2   : > { %3452 = vmatpush.bf16.msrb.mxu1 %v4304_v47  ;;  %3247 = vmatpush.bf16.msra.mxu3 %v4500_v14  ;;  %v4692_v47 = vor.u32 %v5190_v29, %v4691_v0 }
 0x2f3   : > { %3417 = vmatpush.bf16.msrb.mxu0 %v4620_v52  ;;  %v5125_v52 = vld [vmem:[%s7249_s4 + $0x2ac] sm:$0xf] }
 0x2f4   : > { %v4448_v35 = vor.u32 %v5125_v52, %v4445_v9  ;;  %v4829_v52 = vld [vmem:[%s7249_s4 + $0x5b8] sm:$0xf0]  ;;  %v5109_v9 = vld [vmem:[%s7249_s4 + $0x22c] sm:$0xf] }
 0x2f6   : > { %3453 = vmatpush.bf16.msrb.mxu1 %v4288_v56  ;;  %3248 = vmatpush.bf16.msra.mxu3 %v4484_v33  ;;  %v5226_v56 = vld [vmem:[%s7249_s4 + $0x5cc] sm:$0xf0] }
 0x2fa   : > { %3454 = vmatpush.bf16.msrb.mxu1 %v4272_v58  ;;  %v4429_v58 = vld [vmem:[%s7249_s4 + $0x298] sm:$0xf0] }
 0x2fe   : > { %3455 = vmatpush.bf16.msrb.mxu1 %v4256_v49  ;;  %v4836_v49 = vor.u32 %v5226_v56, %v4835_v39  ;;  %v5210_v39 = vld [vmem:[%s7249_s4 + $0x54c] sm:$0xf0]  ;;  %v5068_v56 = vld [vmem:[%s7249_s4 + $0xe4] sm:$0xf] }
 0x302   : > { %3456 = vmatpush.bf16.msrb.mxu1 %v4240_v5  ;;  %v4659_v5 = vld [vmem:[%s7249_s4 + $0x460] sm:$0xf] }
 0x303   : > { %v4660_v48 = vor.u32 %v5182_v40, %v4659_v5  ;;  %v5064_v40 = vld [vmem:[%s7249_s4 + $0xc4] sm:$0xf] }
 0x332   : > { %v5328_v32 = vpop.permute.xlu2 %5327 }
 0x333   : > { %v5330_v31 = vunpack.i.h.bf16 %v5328_v32  ;;  %v5329_v14 = vunpack.i.l.bf16 %v5328_v32  ;;  %v4627_v32 = vld [vmem:[%s7249_s4 + $0x420] sm:$0xf] }
 0x335   : > { %v2020_v34 = vmax.f32 %v5977_v16, %v5330_v31  ;;  %v2012_v12 = vmax.f32 %v5975_v28, %v5329_v14  ;;  %v4819_v16 = vld [vmem:[%s7249_s4 + $0x5a0] sm:$0xf]  ;;  %v5222_v28 = vld [vmem:[%s7249_s4 + $0x5ac] sm:$0xf0] }
 0x336   : > { %v4611_v14 = vld [vmem:[%s7249_s4 + $0x400] sm:$0xf] }
 0x33a   : > { %v5308_v13 = vpop.permute.xlu0 %5307 }
 0x33b   : > { %v5310_v60 = vunpack.i.h.bf16 %v5308_v13  ;;  %v5309_v54 = vunpack.i.l.bf16 %v5308_v13  ;;  %v4432_v13 = vor.u32 %v5121_v19, %v4429_v58  ;;  %v4813_v19 = vld [vmem:[%s7249_s4 + $0x598] sm:$0xf0]  ;;  %v5105_v58 = vld [vmem:[%s7249_s4 + $0x20c] sm:$0xf] }
 0x33d   : > { %v1956_v10 = vmax.f32 %v5874_v27, %v5310_v60  ;;  %v1948_v62 = vmax.f32 %v5872_v6, %v5309_v54  ;;  %v5129_v6 = vld [vmem:[%s7249_s4 + $0x2cc] sm:$0xf]  ;;  %v4461_v27 = vld [vmem:[%s7249_s4 + $0x2d8] sm:$0xf0] }
 0x33e   : > { %v4464_v25 = vor.u32 %v5129_v6, %v4461_v27  ;;  %v5178_v6 = vld [vmem:[%s7249_s4 + $0x44c] sm:$0xf0] }
 0x33f   : > { %v2029_v18 = vsel %vm1941_vm3, %v1948_v62, %v1956_v10  ;;  %v5117_v10 = vld [vmem:[%s7249_s4 + $0x26c] sm:$0xf]  ;;  %v4413_v62 = vld [vmem:[%s7249_s4 + $0x278] sm:$0xf0]  ;;  %v5218_v27 = vld [vmem:[%s7249_s4 + $0x58c] sm:$0xf0] }
 0x340   : > { %v6275_v55 = vpack.c.bf16 %v2029_v18, %v2029_v18  ;;  %v4820_v18 = vor.u32 %v5222_v28, %v4819_v16  ;;  %v4804_v29 = vor.u32 %v5218_v27, %v4803_v57  ;;  %v5213_v16 = vld [vmem:[%s7249_s4 + $0x56c] sm:$0xf]  ;;  %v4797_v28 = vld [vmem:[%s7249_s4 + $0x578] sm:$0xf0] }
 0x342   : > { %v5313_v59 = vpop.permute.xlu0 %5312  ;;  %3210 = vmatmul.bf16.vlgmr.msrb.gmra.mxu2 %v6275_v55  ;;  %3366 = vmatmul.bf16.vlgmr.msra.gmra.mxu0 %v6275_v55  ;;  %v5318_v26 = vpop.permute.xlu1 %5317 }
 0x343   : > { %v5315_v20 = vunpack.i.h.bf16 %v5313_v59  ;;  %v5314_v11 = vunpack.i.l.bf16 %v5313_v59  ;;  %3254 = vmatpush.bf16.msrb.mxu2 %v4724_v3  ;;  %3462 = vmatpush.bf16.msra.mxu0 %v4480_v36  ;;  %v5320_v38 = vunpack.i.h.bf16 %v5318_v26  ;;  %v5319_v2 = vunpack.i.l.bf16 %v5318_v26  ;;  %v4643_v3 = vld [vmem:[%s7249_s4 + $0x440] sm:$0xf]  ;;  %v5225_v26 = vld [vmem:[%s7249_s4 + $0x5cc] sm:$0xf] }
 0x344   : > { %v4416_v59 = vor.u32 %v5117_v10, %v4413_v62  ;;  %v4644_v0 = vor.u32 %v5178_v6, %v4643_v3  ;;  %v4800_v10 = vor.u32 %v5213_v16, %v4797_v28  ;;  %v4181_v62 = vld [vmem:[%s7249_s4 + $0xb0] sm:$0xf0]  ;;  %v4781_v3 = vld [vmem:[%s7249_s4 + $0x558] sm:$0xf0]  ;;  %v5076_v16 = vld [vmem:[%s7249_s4 + $0x124] sm:$0xf] }
 0x345   : > { %v1972_v8 = vmax.f32 %v5911_v41, %v5315_v20  ;;  %v1964_v24 = vmax.f32 %v5909_v37, %v5314_v11  ;;  %v4852_v41 = vor.u32 %v5230_v30, %v4851_v63  ;;  %v1988_v33 = vmax.f32 %v5921_v23, %v5320_v38  ;;  %v4845_v20 = vld [vmem:[%s7249_s4 + $0x5d8] sm:$0xf0]  ;;  %v5174_v30 = vld [vmem:[%s7249_s4 + $0x42c] sm:$0xf0]  ;;  %v4245_v28 = vld [vmem:[%s7249_s4 + $0x130] sm:$0xf0] }
 0x346   : > { %v1980_v51 = vmax.f32 %v5919_v50, %v5319_v2  ;;  %v4848_v63 = vor.u32 %v5225_v26, %v4845_v20  ;;  %v5221_v2 = vld [vmem:[%s7249_s4 + $0x5ac] sm:$0xf]  ;;  %v4628_v46 = vor.u32 %v5174_v30, %v4627_v32  ;;  %v4184_v57 = vor.u32 %v5060_v45, %v4181_v62  ;;  %v4165_v20 = vld [vmem:[%s7249_s4 + $0x90] sm:$0xf0]  ;;  %v5052_v30 = vld [vmem:[%s7249_s4 + $0x64] sm:$0xf] }
 0x347   : > { %v2030_v37 = vsel %vm1941_vm3, %v1964_v24, %v1972_v8  ;;  %3255 = vmatpush.bf16.msrb.mxu2 %v4708_v22  ;;  %3463 = vmatpush.bf16.msra.mxu0 %v4464_v25  ;;  %v5113_v22 = vld [vmem:[%s7249_s4 + $0x24c] sm:$0xf]  ;;  %v4397_v25 = vld [vmem:[%s7249_s4 + $0x258] sm:$0xf0]  ;;  %v4787_v8 = vld [vmem:[%s7249_s4 + $0x560] sm:$0xf] }
 0x348   : > { %v6322_v15 = vpack.c.bf16 %v2030_v37, %v2030_v37  ;;  %v2031_v60 = vsel %vm1941_vm3, %v1980_v51, %v1988_v33  ;;  %v5214_v24 = vld [vmem:[%s7249_s4 + $0x56c] sm:$0xf0]  ;;  %v4400_v38 = vor.u32 %v5113_v22, %v4397_v25  ;;  %v4213_v33 = vld [vmem:[%s7249_s4 + $0xf0] sm:$0xf0]  ;;  %v5217_v51 = vld [vmem:[%s7249_s4 + $0x58c] sm:$0xf] }
 0x349   : > { %v6370_v36 = vpack.c.bf16 %v2031_v60, %v2031_v60  ;;  %v4788_v31 = vor.u32 %v5214_v24, %v4787_v8  ;;  %v5170_v37 = vld [vmem:[%s7249_s4 + $0x40c] sm:$0xf0]  ;;  %v5096_v22 = vld [vmem:[%s7249_s4 + $0x1c4] sm:$0xf]  ;;  %v5205_v25 = vld [vmem:[%s7249_s4 + $0x52c] sm:$0xf] }
 0x34a   : > { %3223 = vmatmul.bf16.vlgmr.msrb.gmra.mxu3 %v6322_v15  ;;  %v5323_v43 = vpop.permute.xlu1 %5322  ;;  %v4149_v24 = vld [vmem:[%s7249_s4 + $0x70] sm:$0xf0]  ;;  %v5072_v45 = vld [vmem:[%s7249_s4 + $0x104] sm:$0xf] }
 0x34b   : > { %3256 = vmatpush.bf16.msrb.mxu2 %v4692_v47  ;;  %3267 = vmatpush.bf16.msrb.mxu3 %v4852_v41  ;;  %v5325_v50 = vunpack.i.h.bf16 %v5323_v43  ;;  %v5324_v23 = vunpack.i.l.bf16 %v5323_v43  ;;  %v4381_v47 = vld [vmem:[%s7249_s4 + $0x238] sm:$0xf0]  ;;  %v4832_v41 = vor.u32 %v5221_v2, %v4829_v52  ;;  %v4309_v2 = vld [vmem:[%s7249_s4 + $0x1b0] sm:$0xf0]  ;;  %v5201_v52 = vld [vmem:[%s7249_s4 + $0x50c] sm:$0xf] }
 0x34c   : > { %3464 = vmatpush.bf16.msra.mxu0 %v4448_v35  ;;  %v4384_v35 = vor.u32 %v5109_v9, %v4381_v47  ;;  %v4365_v43 = vld [vmem:[%s7249_s4 + $0x218] sm:$0xf0]  ;;  %v4152_v47 = vor.u32 %v5052_v30, %v4149_v24  ;;  %v4437_v62 = vld [vmem:[%s7249_s4 + $0x2b0] sm:$0xf0]  ;;  %v5112_v30 = vld [vmem:[%s7249_s4 + $0x244] sm:$0xf] }
 0x34d   : > { %v2004_v54 = vmax.f32 %v5964_v17, %v5325_v50  ;;  %v1996_v61 = vmax.f32 %v5962_v7, %v5324_v23  ;;  %v2033_v7 = vsel %vm1941_vm3, %v2012_v12, %v2020_v34  ;;  %v4216_v34 = vor.u32 %v5068_v56, %v4213_v33  ;;  %v4755_v50 = vld [vmem:[%s7249_s4 + $0x520] sm:$0xf]  ;;  %v5206_v23 = vld [vmem:[%s7249_s4 + $0x52c] sm:$0xf0]  ;;  %v4749_v9 = vld [vmem:[%s7249_s4 + $0x518] sm:$0xf0] }
 0x34e   : > { %v6389_v11 = vpack.c.bf16 %v2033_v7, %v2033_v7  ;;  %v4816_v12 = vor.u32 %v5217_v51, %v4813_v19  ;;  %v4368_v5 = vor.u32 %v5105_v58, %v4365_v43  ;;  %v4756_v60 = vor.u32 %v5206_v23, %v4755_v50  ;;  %v5100_v7 = vld [vmem:[%s7249_s4 + $0x1e4] sm:$0xf]  ;;  %v4117_v33 = vld [vmem:[%s7249_s4 + $0x30] sm:$0xf0] }
 0x34f   : > { %v2032_v17 = vsel %vm1941_vm3, %v1996_v61, %v2004_v54  ;;  %3257 = vmatpush.bf16.msrb.mxu2 %v4676_v44  ;;  %3268 = vmatpush.bf16.msrb.mxu3 %v4836_v49  ;;  %v4612_v44 = vor.u32 %v5170_v37, %v4611_v14  ;;  %v4772_v49 = vor.u32 %v5210_v39, %v4771_v21  ;;  %v4739_v61 = vld [vmem:[%s7249_s4 + $0x500] sm:$0xf]  ;;  %v5048_v14 = vld [vmem:[%s7249_s4 + $0x44] sm:$0xf]  ;;  %v4133_v37 = vld [vmem:[%s7249_s4 + $0x50] sm:$0xf0] }
 0x350   : > { %v6372_v4 = vpack.c.bf16 %v2032_v17, %v2032_v17  ;;  %3465 = vmatpush.bf16.msra.mxu0 %v4432_v13  ;;  %v4197_v13 = vld [vmem:[%s7249_s4 + $0xd0] sm:$0xf0]  ;;  %v4136_v39 = vor.u32 %v5048_v14, %v4133_v37  ;;  %v5084_v51 = vld [vmem:[%s7249_s4 + $0x164] sm:$0xf] }
 0x351   : > { %v4200_v54 = vor.u32 %v5064_v40, %v4197_v13  ;;  %v4341_v17 = vld [vmem:[%s7249_s4 + $0x1f0] sm:$0xf0]  ;;  %v5132_v50 = vld [vmem:[%s7249_s4 + $0x2e4] sm:$0xf] }
 0x352   : > { %3236 = vmatmul.bf16.vlgmr.msra.gmra.mxu2 %v6370_v36  ;;  %3405 = vmatmul.bf16.vlgmr.msra.gmra.mxu1 %v6372_v4  ;;  %v4344_v27 = vor.u32 %v5100_v7, %v4341_v17  ;;  %v4293_v21 = vld [vmem:[%s7249_s4 + $0x190] sm:$0xf0]  ;;  %v5164_v7 = vld [vmem:[%s7249_s4 + $0x3e4] sm:$0xf] }
 0x353   : > { %3258 = vmatpush.bf16.msrb.mxu2 %v4660_v48  ;;  %3269 = vmatpush.bf16.msrb.mxu3 %v4820_v18  ;;  %v2027_v48 = vpop.permute.xlu2 %2026  ;;  %v5209_v18 = vld [vmem:[%s7249_s4 + $0x54c] sm:$0xf]  ;;  %v4277_v19 = vld [vmem:[%s7249_s4 + $0x170] sm:$0xf0]  ;;  %v5152_v24 = vld [vmem:[%s7249_s4 + $0x384] sm:$0xf] }
 0x354   : > { %3418 = vmatmul.bf16.vlgmr.msrb.gmra.mxu0 %v6389_v11  ;;  %3501 = vmatpush.bf16.msra.mxu1 %v4864_v42  ;;  %v4740_v42 = vor.u32 %v5202_v53, %v4739_v61  ;;  %v2028_v6 = vmax.f32 %v6069_v1, %v2027_v48  ;;  %v4784_v26 = vor.u32 %v5209_v18, %v4781_v3  ;;  %v4325_v1 = vld [vmem:[%s7249_s4 + $0x1d0] sm:$0xf0] }
 0x355   : > { %3466 = vmatpush.bf16.msra.mxu0 %v4416_v59  ;;  %v5056_v59 = vld [vmem:[%s7249_s4 + $0x84] sm:$0xf]  ;;  %v4280_v43 = vor.u32 %v5084_v51, %v4277_v19  ;;  %v4469_v23 = vld [vmem:[%s7249_s4 + $0x2f0] sm:$0xf0]  ;;  %v4248_v61 = vor.u32 %v5076_v16, %v4245_v28 }
 0x356   : > { %v4168_v32 = vor.u32 %v5056_v59, %v4165_v20  ;;  %v4472_v13 = vor.u32 %v5132_v50, %v4469_v23  ;;  %v4229_v48 = vld [vmem:[%s7249_s4 + $0x110] sm:$0xf0]  ;;  %v5136_v23 = vld [vmem:[%s7249_s4 + $0x304] sm:$0xf] }
 0x357   : > { %3259 = vmatpush.bf16.msrb.mxu2 %v4644_v0  ;;  %3270 = vmatpush.bf16.msrb.mxu3 %v4804_v29  ;;  %v4765_v0 = vld [vmem:[%s7249_s4 + $0x538] sm:$0xf0]  ;;  %v6519_v29 = vpack.c.bf16 %v2028_v6, %v2028_v6  ;;  %v4597_v17 = vld [vmem:[%s7249_s4 + $0x3f0] sm:$0xf0]  ;;  %v4232_v18 = vor.u32 %v5072_v45, %v4229_v48  ;;  %v5120_v6 = vld [vmem:[%s7249_s4 + $0x284] sm:$0xf] }
 0x358   : > { %3502 = vmatpush.bf16.msra.mxu1 %v4848_v63  ;;  %v4328_v63 = vor.u32 %v5096_v22, %v4325_v1  ;;  %v4768_v8 = vor.u32 %v5205_v25, %v4765_v0  ;;  %v4581_v59 = vld [vmem:[%s7249_s4 + $0x3d0] sm:$0xf0]  ;;  %v5116_v22 = vld [vmem:[%s7249_s4 + $0x264] sm:$0xf] }
 0x359   : > { %3467 = vmatpush.bf16.msra.mxu0 %v4400_v38  ;;  %v5092_v38 = vld [vmem:[%s7249_s4 + $0x1a4] sm:$0xf]  ;;  %v4405_v1 = vld [vmem:[%s7249_s4 + $0x270] sm:$0xf0] }
 0x35a   : > { %3249 = vmatmul.bf16.vlgmr.msra.gmra.mxu3 %v6372_v4  ;;  %v5156_v25 = vld [vmem:[%s7249_s4 + $0x3a4] sm:$0xf]  ;;  %v4565_v0 = vld [vmem:[%s7249_s4 + $0x3b0] sm:$0xf0] }
 0x35b   : > { %3260 = vmatpush.bf16.msrb.mxu2 %v4628_v46  ;;  %3271 = vmatpush.bf16.msrb.mxu3 %v4788_v31  ;;  %v4312_v46 = vor.u32 %v5092_v38, %v4309_v2  ;;  %v4752_v31 = vor.u32 %v5201_v52, %v4749_v9  ;;  %v4549_v38 = vld [vmem:[%s7249_s4 + $0x390] sm:$0xf0]  ;;  %v5108_v9 = vld [vmem:[%s7249_s4 + $0x224] sm:$0xf] }
 0x35c   : > { %3503 = vmatpush.bf16.msra.mxu1 %v4832_v41  ;;  %v5088_v41 = vld [vmem:[%s7249_s4 + $0x184] sm:$0xf]  ;;  %v4552_v52 = vor.u32 %v5152_v24, %v4549_v38  ;;  %v4853_v28 = vld [vmem:[%s7249_s4 + $0x5f0] sm:$0xf0] }
 0x35d   : > { %3468 = vmatpush.bf16.msra.mxu0 %v4384_v35  ;;  %v4296_v56 = vor.u32 %v5088_v41, %v4293_v21  ;;  %v5044_v35 = vld [vmem:[%s7249_s4 + $0x24] sm:$0xf]  ;;  %v4357_v21 = vld [vmem:[%s7249_s4 + $0x210] sm:$0xf0] }
 0x35e   : > { %v4120_v58 = vor.u32 %v5044_v35, %v4117_v33  ;;  %v5104_v41 = vld [vmem:[%s7249_s4 + $0x204] sm:$0xf]  ;;  %v4725_v33 = vld [vmem:[%s7249_s4 + $0x4f0] sm:$0xf0] }
 0x35f   : > { %3261 = vmatpush.bf16.msrb.mxu2 %v4612_v44  ;;  %3272 = vmatpush.bf16.msrb.mxu3 %v4772_v49  ;;  %v5040_v44 = vld [vmem:[%s7249_s4 + $0x4] sm:$0xf]  ;;  %v4101_v49 = vld [vmem:[%s7249_s4 + $0x10] sm:$0xf0]  ;;  %v4360_v51 = vor.u32 %v5104_v41, %v4357_v21  ;;  %v4331_v21 = vld [vmem:[%s7249_s4 + $0x1c8] sm:$0xf] }
 0x360   : > { %3504 = vmatpush.bf16.msra.mxu1 %v4816_v12  ;;  %v4261_v12 = vld [vmem:[%s7249_s4 + $0x150] sm:$0xf0]  ;;  %v5196_v35 = vld [vmem:[%s7249_s4 + $0x4e4] sm:$0xf] }
 0x361   : > { %3469 = vmatpush.bf16.msra.mxu0 %v4368_v5  ;;  %v4104_v5 = vor.u32 %v5040_v44, %v4101_v49  ;;  %v4501_v44 = vld [vmem:[%s7249_s4 + $0x330] sm:$0xf0]  ;;  %v5192_v49 = vld [vmem:[%s7249_s4 + $0x4c4] sm:$0xf] }
 0x362   : > { %3262 = vmatmul.bf16.vlgmr.msrb.gmra.mxu2 %v6389_v11  ;;  %3457 = vmatmul.bf16.vlgmr.msrb.gmra.mxu1 %v6322_v15  ;;  %v5228_v16 = vld [vmem:[%s7249_s4 + $0x5e4] sm:$0xf]  ;;  %v4677_v45 = vld [vmem:[%s7249_s4 + $0x490] sm:$0xf0] }
 0x363   : > { %3280 = vmatpush.bf16.msra.mxu2 %v4216_v34  ;;  %3273 = vmatpush.bf16.msrb.mxu3 %v4756_v60  ;;  %v5080_v34 = vld [vmem:[%s7249_s4 + $0x144] sm:$0xf]  ;;  %v4613_v38 = vld [vmem:[%s7249_s4 + $0x410] sm:$0xf0] }
 0x364   : > { %3470 = vmatmul.bf16.vlgmr.msra.gmra.mxu0 %v6370_v36  ;;  %3505 = vmatpush.bf16.msra.mxu1 %v4800_v10  ;;  %v4264_v40 = vor.u32 %v5080_v34, %v4261_v12  ;;  %v5128_v60 = vld [vmem:[%s7249_s4 + $0x2c4] sm:$0xf]  ;;  %v4709_v34 = vld [vmem:[%s7249_s4 + $0x4d0] sm:$0xf0] }
 0x365   : > { %v5124_v10 = vld [vmem:[%s7249_s4 + $0x2a4] sm:$0xf]  ;;  %v4712_v50 = vor.u32 %v5192_v49, %v4709_v34  ;;  %v4757_v41 = vld [vmem:[%s7249_s4 + $0x530] sm:$0xf0]  ;;  %v4475_v49 = vld [vmem:[%s7249_s4 + $0x2e8] sm:$0xf] }
 0x366   : > { %v4440_v3 = vor.u32 %v5124_v10, %v4437_v62  ;;  %v5224_v48 = vld [vmem:[%s7249_s4 + $0x5c4] sm:$0xf]  ;;  %v4837_v10 = vld [vmem:[%s7249_s4 + $0x5d0] sm:$0xf0]  ;;  %v5135_v34 = vld [vmem:[%s7249_s4 + $0x2f4] sm:$0xf0] }
 0x367   : > { %3281 = vmatpush.bf16.msra.mxu2 %v4200_v54  ;;  %3274 = vmatpush.bf16.msrb.mxu3 %v4740_v42  ;;  %v4453_v54 = vld [vmem:[%s7249_s4 + $0x2d0] sm:$0xf0]  ;;  %v4600_v42 = vor.u32 %v5164_v7, %v4597_v17  ;;  %v4840_v7 = vor.u32 %v5224_v48, %v4837_v10  ;;  %v5180_v17 = vld [vmem:[%s7249_s4 + $0x464] sm:$0xf]  ;;  %v4443_v10 = vld [vmem:[%s7249_s4 + $0x2a8] sm:$0xf] }
 0x368   : > { %3506 = vmatpush.bf16.msra.mxu1 %v4784_v26  ;;  %v4456_v53 = vor.u32 %v5128_v60, %v4453_v54  ;;  %v5168_v24 = vld [vmem:[%s7249_s4 + $0x404] sm:$0xf] }
 0x369   : > { %v5236_v48 = vld [vmem:[%s7251_s6 + $0x20] sm:$0xff] }
 0x36a   : > { %3275 = vmatmul.bf16.vlgmr.msrb.gmra.mxu3 %v6519_v29 }
 0x36b   : > { %3282 = vmatpush.bf16.msra.mxu2 %v4184_v57  ;;  %3293 = vmatpush.bf16.msra.mxu3 %v4344_v27  ;;  %v4421_v57 = vld [vmem:[%s7249_s4 + $0x290] sm:$0xf0]  ;;  %v5160_v27 = vld [vmem:[%s7249_s4 + $0x3c4] sm:$0xf] }
 0x36c   : > { %3507 = vmatpush.bf16.msra.mxu1 %v4768_v8  ;;  %v4424_v26 = vor.u32 %v5120_v6, %v4421_v57  ;;  %v4584_v20 = vor.u32 %v5160_v27, %v4581_v59  ;;  %v4389_v8 = vld [vmem:[%s7249_s4 + $0x250] sm:$0xf0]  ;;  %v5176_v27 = vld [vmem:[%s7249_s4 + $0x444] sm:$0xf] }
 0x36d   : > { %v4392_v2 = vor.u32 %v5112_v30, %v4389_v8  ;;  %v4645_v59 = vld [vmem:[%s7249_s4 + $0x450] sm:$0xf0] }
 0x36f   : > { %3283 = vmatpush.bf16.msra.mxu2 %v4168_v32  ;;  %3294 = vmatpush.bf16.msra.mxu3 %v4328_v63  ;;  %v4408_v32 = vor.u32 %v5116_v22, %v4405_v1  ;;  %v4568_v63 = vor.u32 %v5156_v25, %v4565_v0  ;;  %v4648_v22 = vor.u32 %v5176_v27, %v4645_v59  ;;  %v5172_v25 = vld [vmem:[%s7249_s4 + $0x424] sm:$0xf]  ;;  %v4629_v0 = vld [vmem:[%s7249_s4 + $0x430] sm:$0xf0]  ;;  %v5123_v27 = vld [vmem:[%s7249_s4 + $0x294] sm:$0xf0] }
 0x370   : > { %3508 = vmatpush.bf16.msra.mxu1 %v4752_v31  ;;  %v4533_v31 = vld [vmem:[%s7249_s4 + $0x370] sm:$0xf0]  ;;  %v4632_v30 = vor.u32 %v5172_v25, %v4629_v0  ;;  %v4411_v0 = vld [vmem:[%s7249_s4 + $0x268] sm:$0xf] }
 0x371   : > { %v5234_v25 = vld [vmem:[%s7251_s6 + $0x10] sm:$0xff] }
 0x373   : > { %3284 = vmatpush.bf16.msra.mxu2 %v4152_v47  ;;  %3295 = vmatpush.bf16.msra.mxu3 %v4312_v46  ;;  %v4373_v47 = vld [vmem:[%s7249_s4 + $0x230] sm:$0xf0]  ;;  %v5148_v46 = vld [vmem:[%s7249_s4 + $0x364] sm:$0xf] }
 0x374   : > { %3509 = vmatmul.bf16.vlgmr.msra.gmra.mxu1 %v6519_v29  ;;  %v4376_v14 = vor.u32 %v5108_v9, %v4373_v47  ;;  %v4536_v37 = vor.u32 %v5148_v46, %v4533_v31  ;;  %v4347_v9 = vld [vmem:[%s7249_s4 + $0x1e8] sm:$0xf]  ;;  %v5103_v47 = vld [vmem:[%s7249_s4 + $0x1f4] sm:$0xf0]  ;;  %v4616_v46 = vor.u32 %v5168_v24, %v4613_v38 }
 0x375   : > { %v5075_v24 = vld [vmem:[%s7249_s4 + $0x114] sm:$0xf0]  ;;  %v4395_v38 = vld [vmem:[%s7249_s4 + $0x248] sm:$0xf] }
 0x377   : > { %3285 = vmatpush.bf16.msra.mxu2 %v4136_v39  ;;  %3296 = vmatpush.bf16.msra.mxu3 %v4296_v56  ;;  %v5144_v39 = vld [vmem:[%s7249_s4 + $0x344] sm:$0xf]  ;;  %v4517_v56 = vld [vmem:[%s7249_s4 + $0x350] sm:$0xf0] }
 0x378   : > { %v4520_v19 = vor.u32 %v5144_v39, %v4517_v56  ;;  %v5099_v39 = vld [vmem:[%s7249_s4 + $0x1d4] sm:$0xf0] }
 0x379   : > { %v5239_v56 = vld [vmem:[%s7251_s6 + $0x38] sm:$0xff] }
 0x37a   : > { %3778 = vmatpush.bf16.msrb.mxu0 %v5239_v56  ;;  %v5232_v56 = vld [vmem:[%s7251_s6] sm:$0xff] }
 0x37b   : > { %3286 = vmatpush.bf16.msra.mxu2 %v4120_v58  ;;  %3297 = vmatpush.bf16.msra.mxu3 %v4280_v43  ;;  %v4728_v58 = vor.u32 %v5196_v35, %v4725_v33  ;;  %v5140_v43 = vld [vmem:[%s7249_s4 + $0x324] sm:$0xf]  ;;  %v4332_v33 = vor.u32 %v5099_v39, %v4331_v21  ;;  %v4379_v39 = vld [vmem:[%s7249_s4 + $0x228] sm:$0xf] }
 0x37c   : > { %v4504_v12 = vor.u32 %v5140_v43, %v4501_v44  ;;  %v5095_v43 = vld [vmem:[%s7249_s4 + $0x1b4] sm:$0xf0]  ;;  %v5238_v44 = vld [vmem:[%s7251_s6 + $0x30] sm:$0xff] }
 0x37e   : > { %3779 = vmatpush.bf16.msrb.mxu0 %v5238_v44  ;;  %v4363_v44 = vld [vmem:[%s7249_s4 + $0x208] sm:$0xf] }
 0x37f   : > { %3287 = vmatpush.bf16.msra.mxu2 %v4104_v5  ;;  %3298 = vmatpush.bf16.msra.mxu3 %v4264_v40  ;;  %v4485_v5 = vld [vmem:[%s7249_s4 + $0x310] sm:$0xf0]  ;;  %v5188_v40 = vld [vmem:[%s7249_s4 + $0x4a4] sm:$0xf] }
 0x380   : > { %v4488_v60 = vor.u32 %v5136_v23, %v4485_v5  ;;  %v4476_v23 = vor.u32 %v5135_v34, %v4475_v49  ;;  %v4299_v5 = vld [vmem:[%s7249_s4 + $0x188] sm:$0xf] }
 0x382   : > { %3288 = vmatmul.bf16.vlgmr.msra.gmra.mxu2 %v6275_v55 }
 0x383   : > { %3306 = vmatpush.bf16.msrb.mxu2 %v4472_v13  ;;  %3299 = vmatpush.bf16.msra.mxu3 %v4248_v61  ;;  %v4693_v13 = vld [vmem:[%s7249_s4 + $0x4b0] sm:$0xf0]  ;;  %v4856_v61 = vor.u32 %v5228_v16, %v4853_v28  ;;  %v4459_v16 = vld [vmem:[%s7249_s4 + $0x2c8] sm:$0xf]  ;;  %v5131_v28 = vld [vmem:[%s7249_s4 + $0x2d4] sm:$0xf0] }
 0x384   : > { %v4696_v54 = vor.u32 %v5188_v40, %v4693_v13  ;;  %v5091_v40 = vld [vmem:[%s7249_s4 + $0x194] sm:$0xf0]  ;;  %v5237_v13 = vld [vmem:[%s7251_s6 + $0x28] sm:$0xff] }
 0x385   : > { %3780 = vmatpush.bf16.msrb.mxu0 %v5237_v13 }
 0x387   : > { %3307 = vmatpush.bf16.msrb.mxu2 %v4456_v53  ;;  %3300 = vmatpush.bf16.msra.mxu3 %v4232_v18  ;;  %v5184_v53 = vld [vmem:[%s7249_s4 + $0x484] sm:$0xf]  ;;  %v4661_v18 = vld [vmem:[%s7249_s4 + $0x470] sm:$0xf0] }
 0x388   : > { %v4680_v62 = vor.u32 %v5184_v53, %v4677_v45  ;;  %v4664_v6 = vor.u32 %v5180_v17, %v4661_v18  ;;  %v4283_v53 = vld [vmem:[%s7249_s4 + $0x168] sm:$0xf]  ;;  %v5087_v45 = vld [vmem:[%s7249_s4 + $0x174] sm:$0xf0] }
 0x389   : > { %3781 = vmatpush.bf16.msrb.mxu0 %v5236_v48  ;;  %v4267_v18 = vld [vmem:[%s7249_s4 + $0x148] sm:$0xf]  ;;  %v4205_v48 = vld [vmem:[%s7249_s4 + $0xd8] sm:$0xf0] }
 0x38a   : > { %3301 = vmatmul.bf16.vlgmr.msra.gmra.mxu3 %v6322_v15 }
 0x38b   : > { %3308 = vmatpush.bf16.msrb.mxu2 %v4440_v3  ;;  %3319 = vmatpush.bf16.msrb.mxu3 %v4600_v42  ;;  %v5220_v3 = vld [vmem:[%s7249_s4 + $0x5a4] sm:$0xf]  ;;  %v4821_v42 = vld [vmem:[%s7249_s4 + $0x5b0] sm:$0xf0] }
 0x38c   : > { %v4824_v57 = vor.u32 %v5220_v3, %v4821_v42  ;;  %v5083_v3 = vld [vmem:[%s7249_s4 + $0x154] sm:$0xf0] }
 0x38d   : > { %v5235_v42 = vld [vmem:[%s7251_s6 + $0x18] sm:$0xff] }
 0x38e   : > { %3782 = vmatpush.bf16.msrb.mxu0 %v5235_v42  ;;  %v5061_v42 = vld [vmem:[%s7249_s4 + $0xac] sm:$0xf] }
 0x38f   : > { %3309 = vmatpush.bf16.msrb.mxu2 %v4424_v26  ;;  %3320 = vmatpush.bf16.msrb.mxu3 %v4584_v20  ;;  %v5216_v26 = vld [vmem:[%s7249_s4 + $0x584] sm:$0xf]  ;;  %v4805_v20 = vld [vmem:[%s7249_s4 + $0x590] sm:$0xf0] }
 0x390   : > { %v4808_v1 = vor.u32 %v5216_v26, %v4805_v20  ;;  %v4268_v26 = vor.u32 %v5083_v3, %v4267_v18  ;;  %v4795_v18 = vld [vmem:[%s7249_s4 + $0x568] sm:$0xf]  ;;  %v5215_v3 = vld [vmem:[%s7249_s4 + $0x574] sm:$0xf0] }
 0x392   : > { %3783 = vmatpush.bf16.msrb.mxu0 %v5234_v25  ;;  %v4779_v25 = vld [vmem:[%s7249_s4 + $0x548] sm:$0xf] }
 0x393   : > { %3310 = vmatpush.bf16.msrb.mxu2 %v4408_v32  ;;  %3321 = vmatpush.bf16.msrb.mxu3 %v4568_v63  ;;  %v5212_v32 = vld [vmem:[%s7249_s4 + $0x564] sm:$0xf]  ;;  %v4789_v63 = vld [vmem:[%s7249_s4 + $0x570] sm:$0xf0] }
 0x394   : > { %v4792_v8 = vor.u32 %v5212_v32, %v4789_v63  ;;  %v5119_v32 = vld [vmem:[%s7249_s4 + $0x274] sm:$0xf0] }
 0x397   : > { %3311 = vmatpush.bf16.msrb.mxu2 %v4392_v2  ;;  %3322 = vmatpush.bf16.msrb.mxu3 %v4552_v52  ;;  %v5208_v2 = vld [vmem:[%s7249_s4 + $0x544] sm:$0xf]  ;;  %v4773_v52 = vld [vmem:[%s7249_s4 + $0x550] sm:$0xf0] }
 0x398   : > { %v4776_v31 = vor.u32 %v5208_v2, %v4773_v52  ;;  %v5233_v2 = vld [vmem:[%s7251_s6 + $0x8] sm:$0xff] }
 0x399   : > { %3784 = vmatpush.bf16.msrb.mxu0 %v5233_v2  ;;  %v4763_v2 = vld [vmem:[%s7249_s4 + $0x528] sm:$0xf] }
 0x39b   : > { %3312 = vmatpush.bf16.msrb.mxu2 %v4376_v14  ;;  %3323 = vmatpush.bf16.msrb.mxu3 %v4536_v37  ;;  %v4348_v14 = vor.u32 %v5103_v47, %v4347_v9  ;;  %v5204_v37 = vld [vmem:[%s7249_s4 + $0x524] sm:$0xf]  ;;  %v5115_v47 = vld [vmem:[%s7249_s4 + $0x254] sm:$0xf0] }
 0x39c   : > { %v4760_v35 = vor.u32 %v5204_v37, %v4757_v41  ;;  %v4396_v41 = vor.u32 %v5115_v47, %v4395_v38 }
 0x39d   : > { %3785 = vmatpush.bf16.msrb.mxu0 %v5232_v56  ;;  %v4747_v56 = vld [vmem:[%s7249_s4 + $0x508] sm:$0xf] }
 0x39f   : > { %3313 = vmatpush.bf16.msrb.mxu2 %v4360_v51  ;;  %3324 = vmatpush.bf16.msrb.mxu3 %v4520_v19  ;;  %v5200_v51 = vld [vmem:[%s7249_s4 + $0x504] sm:$0xf]  ;;  %v4741_v19 = vld [vmem:[%s7249_s4 + $0x510] sm:$0xf0] }
 0x3a2   : > { %3314 = vmatmul.bf16.vlgmr.msrb.gmra.mxu2 %v6370_v36 }
 0x3a3   : > { %3332 = vmatpush.bf16.msra.mxu2 %v4728_v58  ;;  %3325 = vmatpush.bf16.msrb.mxu3 %v4504_v12  ;;  %v4315_v58 = vld [vmem:[%s7249_s4 + $0x1a8] sm:$0xf]  ;;  %v4744_v12 = vor.u32 %v5200_v51, %v4741_v19  ;;  %v5227_v19 = vld [vmem:[%s7249_s4 + $0x5d4] sm:$0xf0] }
 0x3a4   : > { %v4843_v51 = vld [vmem:[%s7249_s4 + $0x5c8] sm:$0xf] }
 0x3a7   : > { %3333 = vmatpush.bf16.msra.mxu2 %v4712_v50  ;;  %3326 = vmatpush.bf16.msrb.mxu3 %v4488_v60  ;;  %v4316_v50 = vor.u32 %v5095_v43, %v4315_v58  ;;  %v4844_v43 = vor.u32 %v5227_v19, %v4843_v51  ;;  %v4141_v19 = vld [vmem:[%s7249_s4 + $0x58] sm:$0xf0] }
 0x3aa   : > { %3327 = vmatmul.bf16.vlgmr.msrb.gmra.mxu3 %v6372_v4 }
 0x3ab   : > { %3334 = vmatpush.bf16.msra.mxu2 %v4696_v54  ;;  %3345 = vmatpush.bf16.msra.mxu3 %v4856_v61  ;;  %v4300_v54 = vor.u32 %v5091_v40, %v4299_v5  ;;  %v4460_v61 = vor.u32 %v5131_v28, %v4459_v16  ;;  %v5069_v5 = vld [vmem:[%s7249_s4 + $0xec] sm:$0xf]  ;;  %v4221_v40 = vld [vmem:[%s7249_s4 + $0xf8] sm:$0xf0] }
 0x3af   : > { %3335 = vmatpush.bf16.msra.mxu2 %v4680_v62  ;;  %3346 = vmatpush.bf16.msra.mxu3 %v4840_v7  ;;  %v5127_v62 = vld [vmem:[%s7249_s4 + $0x2b4] sm:$0xf0]  ;;  %v4284_v7 = vor.u32 %v5087_v45, %v4283_v53  ;;  %v4811_v53 = vld [vmem:[%s7249_s4 + $0x588] sm:$0xf]  ;;  %v5065_v45 = vld [vmem:[%s7249_s4 + $0xcc] sm:$0xf] }
 0x3b0   : > { %v4444_v17 = vor.u32 %v5127_v62, %v4443_v10 }
 0x3b3   : > { %3336 = vmatpush.bf16.msra.mxu2 %v4664_v6  ;;  %3347 = vmatpush.bf16.msra.mxu3 %v4824_v57  ;;  %v4427_v57 = vld [vmem:[%s7249_s4 + $0x288] sm:$0xf] }
 0x3b4   : > { %v4428_v20 = vor.u32 %v5123_v27, %v4427_v57  ;;  %v4189_v57 = vld [vmem:[%s7249_s4 + $0xb8] sm:$0xf0]  ;;  %v6969_v27 = vld [vmem:[%s7250_s5] sm:$0xf] }
 0x3b7   : > { %3337 = vmatpush.bf16.msra.mxu2 %v4648_v22  ;;  %3348 = vmatpush.bf16.msra.mxu3 %v4808_v1  ;;  %v4251_v22 = vld [vmem:[%s7249_s4 + $0x128] sm:$0xf]  ;;  %v5079_v1 = vld [vmem:[%s7249_s4 + $0x134] sm:$0xf0] }
 0x3b8   : > { %v4252_v63 = vor.u32 %v5079_v1, %v4251_v22  ;;  %v4192_v1 = vor.u32 %v5061_v42, %v4189_v57 }
 0x3bb   : > { %3338 = vmatpush.bf16.msra.mxu2 %v4632_v30  ;;  %3349 = vmatpush.bf16.msra.mxu3 %v4792_v8  ;;  %v4235_v30 = vld [vmem:[%s7249_s4 + $0x108] sm:$0xf]  ;;  %v4412_v8 = vor.u32 %v5119_v32, %v4411_v0  ;;  %v5211_v0 = vld [vmem:[%s7249_s4 + $0x554] sm:$0xf0]  ;;  %v4173_v32 = vld [vmem:[%s7249_s4 + $0x98] sm:$0xf0] }
 0x3bc   : > { %v4236_v37 = vor.u32 %v5075_v24, %v4235_v30  ;;  %v4780_v30 = vor.u32 %v5211_v0, %v4779_v25 }
 0x3bf   : > { %3339 = vmatpush.bf16.msra.mxu2 %v4616_v46  ;;  %3350 = vmatpush.bf16.msra.mxu3 %v4776_v31  ;;  %v6831_v60 = vpop.f32.mrf.mxu0  ;;  %v4859_v46 = vld [vmem:[%s7249_s4 + $0x5e8] sm:$0xf]  ;;  %v5231_v31 = vld [vmem:[%s7249_s4 + $0x5f4] sm:$0xf0] }
 0x3c0   : > { %v4860_v21 = vor.u32 %v5231_v31, %v4859_v46  ;;  %v4157_v46 = vld [vmem:[%s7249_s4 + $0x78] sm:$0xf0] }
 0x3c2   : > { %3340 = vmatmul.bf16.vlgmr.msra.gmra.mxu2 %v6389_v11 }
 0x3c3   : > { %3371 = vmatpush.bf16.msrb.mxu2 %v4348_v14  ;;  %3351 = vmatpush.bf16.msra.mxu3 %v4760_v35 }
 0x3c5   : > { %v6858_v6 = vpop.f32.mrf.mxu2 }
 0x3c7   : > { %3372 = vmatpush.bf16.msrb.mxu2 %v4332_v33  ;;  %3352 = vmatpush.bf16.msra.mxu3 %v4744_v12  ;;  %v3369_v59 = vpop.f32.mrf.mxu0  ;;  %v5111_v33 = vld [vmem:[%s7249_s4 + $0x234] sm:$0xf0] }
 0x3c8   : > { %v4380_v58 = vor.u32 %v5111_v33, %v4379_v39  ;;  %v5107_v12 = vld [vmem:[%s7249_s4 + $0x214] sm:$0xf0]  ;;  %v5049_v33 = vld [vmem:[%s7249_s4 + $0x4c] sm:$0xf] }
 0x3c9   : > { %v4364_v16 = vor.u32 %v5107_v12, %v4363_v44 }
 0x3ca   : > { %3353 = vmatmul.bf16.vlgmr.msra.gmra.mxu3 %v6519_v29 }
 0x3cb   : > { %3373 = vmatpush.bf16.msrb.mxu2 %v4316_v50  ;;  %3384 = vmatpush.bf16.msrb.mxu3 %v4476_v23  ;;  %v4827_v50 = vld [vmem:[%s7249_s4 + $0x5a8] sm:$0xf]  ;;  %v5223_v23 = vld [vmem:[%s7249_s4 + $0x5b4] sm:$0xf0] }
 0x3cc   : > { %v4828_v28 = vor.u32 %v5223_v23, %v4827_v50  ;;  %v4144_v50 = vor.u32 %v5049_v33, %v4141_v19  ;;  %v5137_v33 = vld [vmem:[%s7249_s4 + $0x30c] sm:$0xf] }
 0x3cd   : > { %v3213_v52 = vpop.f32.mrf.mxu2  ;;  %v6893_v9 = vpop.f32.mrf.mxu3  ;;  %v5177_v19 = vld [vmem:[%s7249_s4 + $0x44c] sm:$0xf] }
 0x3ce   : > { %v5207_v52 = vld [vmem:[%s7249_s4 + $0x534] sm:$0xf0] }
 0x3cf   : > { %3374 = vmatpush.bf16.msrb.mxu2 %v4300_v54  ;;  %3385 = vmatpush.bf16.msrb.mxu3 %v4460_v61  ;;  %v6904_v14 = vpop.f32.mrf.mxu1  ;;  %v4224_v61 = vor.u32 %v5069_v5, %v4221_v40  ;;  %v5045_v5 = vld [vmem:[%s7249_s4 + $0x2c] sm:$0xf] }
 0x3d1   : > { %v6912_v35 = vpop.f32.mrf.mxu0 }
 0x3d3   : > { %3375 = vmatpush.bf16.msrb.mxu2 %v4284_v7  ;;  %3386 = vmatpush.bf16.msrb.mxu3 %v4444_v17  ;;  %v4208_v17 = vor.u32 %v5065_v45, %v4205_v48  ;;  %v5041_v45 = vld [vmem:[%s7249_s4 + $0xc] sm:$0xf]  ;;  %v4109_v48 = vld [vmem:[%s7249_s4 + $0x18] sm:$0xf0] }
 0x3d5   : > { %v3226_v49 = vpop.f32.mrf.mxu3  ;;  %v3237_v34 = vpop.f32.mrf.mxu2 }
 0x3d7   : > { %3376 = vmatpush.bf16.msrb.mxu2 %v4268_v26  ;;  %3387 = vmatpush.bf16.msrb.mxu3 %v4428_v20  ;;  %v3408_v13 = vpop.f32.mrf.mxu1  ;;  %v2234_v26 = vperm.slane %v6969_v27, 0  ;;  %v4796_v20 = vor.u32 %v5215_v3, %v4795_v18  ;;  %v4112_v3 = vor.u32 %v5041_v45, %v4109_v48  ;;  %v5242_v45 = vld [vmem:[%s7251_s6 + $0x50] sm:$0xff] }
 0x3d8   : > { %v4125_v13 = vld [vmem:[%s7249_s4 + $0x38] sm:$0xf0] }
 0x3d9   : > { %v3421_v54 = vpop.f32.mrf.mxu0 }
 0x3db   : > { %3377 = vmatpush.bf16.msrb.mxu2 %v4252_v63  ;;  %3388 = vmatpush.bf16.msrb.mxu3 %v4412_v8  ;;  %v3212_v63 = vadd.f32 %v6858_v6, %v2234_v26  ;;  %v5053_v6 = vld [vmem:[%s7249_s4 + $0x6c] sm:$0xf] }
 0x3dc   : > { %v4160_v39 = vor.u32 %v5053_v6, %v4157_v46  ;;  %v5153_v26 = vld [vmem:[%s7249_s4 + $0x38c] sm:$0xf] }
 0x3dd   : > { %v3239_v62 = vpop.f32.mrf.mxu2  ;;  %v3250_v7 = vpop.f32.mrf.mxu3  ;;  %v3225_v47 = vadd.f32 %v6893_v9, %v3212_v63  ;;  %v5203_v9 = vld [vmem:[%s7249_s4 + $0x514] sm:$0xf0]  ;;  %v4541_v63 = vld [vmem:[%s7249_s4 + $0x378] sm:$0xf0] }
 0x3de   : > { %v4748_v49 = vor.u32 %v5203_v9, %v4747_v56  ;;  %v4573_v62 = vld [vmem:[%s7249_s4 + $0x3b8] sm:$0xf0] }
 0x3df   : > { %3378 = vmatpush.bf16.msrb.mxu2 %v4236_v37  ;;  %3389 = vmatpush.bf16.msrb.mxu3 %v4396_v41  ;;  %v6972_v59 = vpop.f32.mrf.mxu1  ;;  %v3238_v37 = vadd.f32 %v3237_v34, %v3225_v47  ;;  %v4764_v41 = vor.u32 %v5207_v52, %v4763_v2  ;;  %v5145_v2 = vld [vmem:[%s7249_s4 + $0x34c] sm:$0xf]  ;;  %v4525_v52 = vld [vmem:[%s7249_s4 + $0x358] sm:$0xf0] }
 0x3e0   : > { %v5185_v47 = vld [vmem:[%s7249_s4 + $0x48c] sm:$0xf]  ;;  %v4528_v6 = vor.u32 %v5145_v2, %v4525_v52  ;;  %v5250_v2 = vld [vmem:[%s7251_s6 + $0x90] sm:$0xff] }
 0x3e1   : > { %v6975_v22 = vpop.f32.mrf.mxu0  ;;  %v3251_v51 = vadd.f32 %v3250_v7, %v3238_v37  ;;  %v5197_v7 = vld [vmem:[%s7249_s4 + $0x4ec] sm:$0xf] }
 0x3e2   : > { %3379 = vmatmul.bf16.vlgmr.msrb.gmra.mxu2 %v6322_v15  ;;  %v5219_v15 = vld [vmem:[%s7249_s4 + $0x594] sm:$0xf0]  ;;  %v5141_v37 = vld [vmem:[%s7249_s4 + $0x32c] sm:$0xf] }
 0x3e3   : > { %3423 = vmatpush.bf16.msra.mxu2 %v4860_v21  ;;  %3390 = vmatpush.bf16.msrb.mxu3 %v4380_v58  ;;  %v4812_v10 = vor.u32 %v5219_v15, %v4811_v53  ;;  %v5165_v58 = vld [vmem:[%s7249_s4 + $0x3ec] sm:$0xf]  ;;  %v4128_v53 = vor.u32 %v5045_v5, %v4125_v13 }
 0x3e4   : > { %v5169_v13 = vld [vmem:[%s7249_s4 + $0x40c] sm:$0xf] }
 0x3e5   : > { %v3252_v8 = vpop.f32.mrf.mxu3  ;;  %v3263_v24 = vpop.f32.mrf.mxu2  ;;  %v5249_v52 = vld [vmem:[%s7251_s6 + $0x88] sm:$0xff] }
 0x3e6   : > { %v3264_v44 = vadd.f32 %v3263_v24, %v3251_v51  ;;  %v4701_v8 = vld [vmem:[%s7249_s4 + $0x4b8] sm:$0xf0] }
 0x3e7   : > { %3424 = vmatpush.bf16.msra.mxu2 %v4844_v43  ;;  %3391 = vmatpush.bf16.msrb.mxu3 %v4364_v16  ;;  %v3460_v31 = vpop.f32.mrf.mxu1  ;;  %v4605_v43 = vld [vmem:[%s7249_s4 + $0x3f8] sm:$0xf0]  ;;  %v5161_v16 = vld [vmem:[%s7249_s4 + $0x3cc] sm:$0xf] }
 0x3e8   : > { %v4608_v23 = vor.u32 %v5165_v58, %v4605_v43  ;;  %v4493_v51 = vld [vmem:[%s7249_s4 + $0x318] sm:$0xf0] }
 0x3e9   : > { %v3473_v21 = vpop.f32.mrf.mxu0  ;;  %v4653_v58 = vld [vmem:[%s7249_s4 + $0x458] sm:$0xf0]  ;;  %v4496_v43 = vor.u32 %v5137_v33, %v4493_v51  ;;  %v5260_v51 = vld [vmem:[%s7251_s6 + $0xe0] sm:$0xff] }
 0x3ea   : > { %3392 = vmatmul.bf16.vlgmr.msrb.gmra.mxu3 %v6370_v36  ;;  %v5057_v36 = vld [vmem:[%s7249_s4 + $0x8c] sm:$0xf] }
 0x3eb   : > { %3425 = vmatpush.bf16.msra.mxu2 %v4828_v28  ;;  %3436 = vmatpush.bf16.msra.mxu3 %v4224_v61  ;;  %v4176_v38 = vor.u32 %v5057_v36, %v4173_v32  ;;  %v4589_v28 = vld [vmem:[%s7249_s4 + $0x3d8] sm:$0xf0]  ;;  %v5149_v32 = vld [vmem:[%s7249_s4 + $0x36c] sm:$0xf] }
 0x3ec   : > { %v4592_v15 = vor.u32 %v5161_v16, %v4589_v28  ;;  %v4544_v24 = vor.u32 %v5149_v32, %v4541_v63  ;;  %v5181_v21 = vld [vmem:[%s7249_s4 + $0x46c] sm:$0xf]  ;;  %v4621_v16 = vld [vmem:[%s7249_s4 + $0x418] sm:$0xf0] }
 0x3ed   : > { %v3265_v34 = vpop.f32.mrf.mxu2  ;;  %v3276_v12 = vpop.f32.mrf.mxu3  ;;  %v4624_v28 = vor.u32 %v5169_v13, %v4621_v16  ;;  %v2237_v13 = vperm.slane %v6969_v27, 3 }
 0x3ee   : > { %v3277_v40 = vadd.f32 %v3276_v12, %v3264_v44  ;;  %v5247_v34 = vld [vmem:[%s7251_s6 + $0x78] sm:$0xff] }
 0x3ef   : > { %3426 = vmatpush.bf16.msra.mxu2 %v4812_v10  ;;  %3437 = vmatpush.bf16.msra.mxu3 %v4208_v17  ;;  %v5157_v10 = vld [vmem:[%s7249_s4 + $0x3ac] sm:$0xf]  ;;  %v4733_v17 = vld [vmem:[%s7249_s4 + $0x4f8] sm:$0xf0] }
 0x3f0   : > { %v3514_v54 = vpack.c.bf16 %v3277_v40, %v3277_v40  ;;  %v4576_v42 = vor.u32 %v5157_v10, %v4573_v62  ;;  %v4736_v57 = vor.u32 %v5197_v7, %v4733_v17  ;;  %v5246_v40 = vld [vmem:[%s7251_s6 + $0x70] sm:$0xff]  ;;  %v5241_v10 = vld [vmem:[%s7251_s6 + $0x48] sm:$0xff] }
 0x3f1   : > { %v7033_v61 = vpop.f32.mrf.mxu1 }
 0x3f2   : > { %3786 = vmatmul.bf16.vlgmr.msrb.gmra.mxu0 %v3514_v54  ;;  %v5245_v54 = vld [vmem:[%s7251_s6 + $0x68] sm:$0xff] }
 0x3f3   : > { %3427 = vmatpush.bf16.msra.mxu2 %v4796_v20  ;;  %3438 = vmatpush.bf16.msra.mxu3 %v4192_v1  ;;  %v5193_v20 = vld [vmem:[%s7249_s4 + $0x4cc] sm:$0xf]  ;;  %v4717_v1 = vld [vmem:[%s7249_s4 + $0x4d8] sm:$0xf0] }
 0x3f4   : > { %v4720_v36 = vor.u32 %v5193_v20, %v4717_v1 }
 0x3f5   : > { %v3278_v18 = vpop.f32.mrf.mxu3 }
 0x3f6   : > { %v2235_v18 = vperm.slane %v6969_v27, 1 }
 0x3f7   : > { %3428 = vmatpush.bf16.msra.mxu2 %v4780_v30  ;;  %3439 = vmatpush.bf16.msra.mxu3 %v4176_v38  ;;  %v5189_v30 = vld [vmem:[%s7249_s4 + $0x4ac] sm:$0xf] }
 0x3f8   : > { %v4704_v38 = vor.u32 %v5189_v30, %v4701_v8  ;;  %v5252_v30 = vld [vmem:[%s7251_s6 + $0xa0] sm:$0xff] }
 0x3f9   : > { %v3512_v25 = vpop.f32.mrf.mxu1 }
 0x3fb   : > { %3429 = vmatpush.bf16.msra.mxu2 %v4764_v41  ;;  %3440 = vmatpush.bf16.msra.mxu3 %v4160_v39  ;;  %v4509_v41 = vld [vmem:[%s7249_s4 + $0x338] sm:$0xf0] }
 0x3fc   : > { %v4669_v39 = vld [vmem:[%s7249_s4 + $0x478] sm:$0xf0]  ;;  %v4512_v56 = vor.u32 %v5141_v37, %v4509_v41  ;;  %v2236_v37 = vperm.slane %v6969_v27, 2  ;;  %v5262_v41 = vld [vmem:[%s7251_s6 + $0xf0] sm:$0xff]  ;;  %v5332_v27 = vld [vmem:[%s7252_s7] ss:$0 sm:$0xff] }
 0x3fd   : > { %v4672_v9 = vor.u32 %v5181_v21, %v4669_v39  ;;  %v5261_v39 = vld [vmem:[%s7251_s6 + $0xe8] sm:$0xff] }
 0x3fe   : > { %v3368_v21 = vadd.f32 %v6831_v60, %v2236_v37  ;;  %v5259_v60 = vld [vmem:[%s7251_s6 + $0xd8] sm:$0xff] }
 0x3ff   : > { %3430 = vmatpush.bf16.msra.mxu2 %v4748_v49  ;;  %3441 = vmatpush.bf16.msra.mxu3 %v4144_v50  ;;  %v4656_v49 = vor.u32 %v5177_v19, %v4653_v58  ;;  %v5173_v50 = vld [vmem:[%s7249_s4 + $0x42c] sm:$0xf] }
 0x402   : > { %3431 = vmatmul.bf16.vlgmr.msra.gmra.mxu2 %v6519_v29  ;;  %v4557_v29 = vld [vmem:[%s7249_s4 + $0x398] sm:$0xf0] }
 0x403   : > { %3475 = vmatpush.bf16.msrb.mxu2 %v4608_v23  ;;  %3442 = vmatpush.bf16.msra.mxu3 %v4128_v53  ;;  %v4560_v0 = vor.u32 %v5153_v26, %v4557_v29  ;;  %v4637_v23 = vld [vmem:[%s7249_s4 + $0x438] sm:$0xf0]  ;;  %v5254_v26 = vld [vmem:[%s7251_s6 + $0xb0] sm:$0xff] }
 0x404   : > { %v4640_v5 = vor.u32 %v5173_v50, %v4637_v23 }
 0x405   : > { %v3289_v46 = vpop.f32.mrf.mxu2 }
 0x407   : > { %3476 = vmatpush.bf16.msrb.mxu2 %v4592_v15  ;;  %3443 = vmatpush.bf16.msra.mxu3 %v4112_v3  ;;  %v5244_v15 = vld [vmem:[%s7251_s6 + $0x60] sm:$0xff]  ;;  %v5255_v3 = vld [vmem:[%s7251_s6 + $0xb8] sm:$0xff] }
 0x40a   : > { %3444 = vmatmul.bf16.vlgmr.msra.gmra.mxu3 %v6275_v55  ;;  %v4685_v55 = vld [vmem:[%s7249_s4 + $0x498] sm:$0xf0] }
 0x40b   : > { %3477 = vmatpush.bf16.msrb.mxu2 %v4576_v42  ;;  %3488 = vmatpush.bf16.msrb.mxu3 %v4736_v57  ;;  %v4688_v31 = vor.u32 %v5185_v47, %v4685_v55  ;;  %v3290_v42 = vadd.f32 %v3289_v46, %v2235_v18  ;;  %v5248_v47 = vld [vmem:[%s7251_s6 + $0x80] sm:$0xff] }
 0x40d   : > { %v3291_v44 = vpop.f32.mrf.mxu2  ;;  %v3302_v12 = vpop.f32.mrf.mxu3 }
 0x40e   : > { %v3303_v29 = vadd.f32 %v3302_v12, %v3290_v42  ;;  %v5258_v44 = vld [vmem:[%s7251_s6 + $0xd0] sm:$0xff] }
 0x40f   : > { %3478 = vmatpush.bf16.msrb.mxu2 %v4560_v0  ;;  %3489 = vmatpush.bf16.msrb.mxu3 %v4720_v36  ;;  %v5253_v36 = vld [vmem:[%s7251_s6 + $0xa8] sm:$0xff] }
 0x413   : > { %3479 = vmatpush.bf16.msrb.mxu2 %v4544_v24  ;;  %3490 = vmatpush.bf16.msrb.mxu3 %v4704_v38  ;;  %v5251_v24 = vld [vmem:[%s7251_s6 + $0x98] sm:$0xff] }
 0x415   : > { %v3304_v53 = vpop.f32.mrf.mxu3 }
 0x417   : > { %3480 = vmatpush.bf16.msrb.mxu2 %v4528_v6  ;;  %3491 = vmatpush.bf16.msrb.mxu3 %v4688_v31  ;;  %v5263_v31 = vld [vmem:[%s7251_s6 + $0xf8] sm:$0xff] }
 0x418   : > { %3817 = vmatpush.bf16.msrb.mxu1 %v5263_v31 }
 0x41b   : > { %3481 = vmatpush.bf16.msrb.mxu2 %v4512_v56  ;;  %3492 = vmatpush.bf16.msrb.mxu3 %v4672_v9 }
 0x41c   : > { %3818 = vmatpush.bf16.msrb.mxu1 %v5262_v41 }
 0x41f   : > { %3482 = vmatpush.bf16.msrb.mxu2 %v4496_v43  ;;  %3493 = vmatpush.bf16.msrb.mxu3 %v4656_v49 }
 0x420   : > { %3819 = vmatpush.bf16.msrb.mxu1 %v5261_v39 }
 0x422   : > { %3483 = vmatmul.bf16.vlgmr.msrb.gmra.mxu2 %v6372_v4  ;;  %v5243_v4 = vld [vmem:[%s7251_s6 + $0x58] sm:$0xff] }
 0x423   : > { %3791 = vmatpush.bf16.msra.mxu2 %v5247_v34  ;;  %3494 = vmatpush.bf16.msrb.mxu3 %v4640_v5 }
 0x424   : > { %3820 = vmatpush.bf16.msrb.mxu1 %v5260_v51 }
 0x425   : > { %v3315_v48 = vpop.f32.mrf.mxu2 }
 0x426   : > { %v3316_v20 = vadd.f32 %v3315_v48, %v3303_v29 }
 0x427   : > { %3792 = vmatpush.bf16.msra.mxu2 %v5246_v40  ;;  %3495 = vmatpush.bf16.msrb.mxu3 %v4624_v28 }
 0x428   : > { %3821 = vmatpush.bf16.msrb.mxu1 %v5259_v60 }
 0x42a   : > { %3496 = vmatmul.bf16.vlgmr.msrb.gmra.mxu3 %v6389_v11  ;;  %v5240_v11 = vld [vmem:[%s7251_s6 + $0x40] sm:$0xff] }
 0x42b   : > { %3793 = vmatpush.bf16.msra.mxu2 %v5245_v54  ;;  %3804 = vmatpush.bf16.msra.mxu3 %v5255_v3 }
 0x42c   : > { %3822 = vmatpush.bf16.msrb.mxu1 %v5258_v44 }
 0x42d   : > { %v3317_v62 = vpop.f32.mrf.mxu2  ;;  %v3328_v7 = vpop.f32.mrf.mxu3 }
 0x42e   : > { %v3329_v1 = vadd.f32 %v3328_v7, %v3316_v20 }
 0x42f   : > { %3794 = vmatpush.bf16.msra.mxu2 %v5244_v15  ;;  %3805 = vmatpush.bf16.msra.mxu3 %v5254_v26 }
 0x433   : > { %3795 = vmatpush.bf16.msra.mxu2 %v5243_v4  ;;  %3806 = vmatpush.bf16.msra.mxu3 %v5253_v36 }
 0x435   : > { %v3330_v17 = vpop.f32.mrf.mxu3 }
 0x437   : > { %3796 = vmatpush.bf16.msra.mxu2 %v5242_v45  ;;  %3807 = vmatpush.bf16.msra.mxu3 %v5252_v30 }
 0x43b   : > { %3797 = vmatpush.bf16.msra.mxu2 %v5241_v10  ;;  %3808 = vmatpush.bf16.msra.mxu3 %v5251_v24 }
 0x43f   : > { %3798 = vmatpush.bf16.msra.mxu2 %v5240_v11  ;;  %3809 = vmatpush.bf16.msra.mxu3 %v5250_v2 }
 0x443   : > { %3810 = vmatpush.bf16.msra.mxu3 %v5249_v52 }
 0x445   : > { %v3341_v57 = vpop.f32.mrf.mxu2 }
 0x446   : > { %v3342_v25 = vadd.f32 %v3341_v57, %v3329_v1 }
 0x447   : > { %3811 = vmatpush.bf16.msra.mxu3 %v5248_v47 }
 0x44d   : > { %v3343_v0 = vpop.f32.mrf.mxu2  ;;  %v3354_v32 = vpop.f32.mrf.mxu3 }
 0x44e   : > { %v3355_v63 = vadd.f32 %v3354_v32, %v3342_v25 }
 0x450   : > { %v3515_v8 = vpack.c.bf16 %v3355_v63, %v3355_v63 }
 0x452   : > { %3799 = vmatmul.bf16.vlgmr.msra.gmra.mxu2 %v3515_v8 }
 0x455   : > { %v3356_v38 = vpop.f32.mrf.mxu3 }
 0x465   : > { %v3380_v55 = vpop.f32.mrf.mxu2 }
 0x466   : > { %v3381_v9 = vadd.f32 %v3380_v55, %v3368_v21 }
 0x46d   : > { %v3382_v6 = vpop.f32.mrf.mxu2  ;;  %v3393_v46 = vpop.f32.mrf.mxu3 }
 0x46e   : > { %v3394_v33 = vadd.f32 %v3393_v46, %v3381_v9 }
 0x46f   : > { %v3787_v19 = vpop.f32.mrf.mxu0 }
 0x470   : > { %v3407_v58 = vadd.f32 %v6904_v14, %v3394_v33  ;;  %v5257_v14 = vld [vmem:[%s7251_s6 + $0xc8] sm:$0xff]  ;;  %v3788_v7 = vadd.f32 %v5332_v27, %v3787_v19 }
 0x471   : > { %3823 = vmatpush.bf16.msrb.mxu1 %v5257_v14 }
 0x472   : > { %v3420_v43 = vadd.f32 %v6912_v35, %v3407_v58  ;;  %v5256_v35 = vld [vmem:[%s7251_s6 + $0xc0] sm:$0xff] }
 0x475   : > { %v3395_v56 = vpop.f32.mrf.mxu3  ;;  %3824 = vmatpush.bf16.msrb.mxu1 %v5256_v35 }
 0x477   : > { %v3789_v12 = vpop.f32.mrf.mxu0 }
 0x485   : > { %v3432_v49 = vpop.f32.mrf.mxu2 }
 0x486   : > { %v3433_v34 = vadd.f32 %v3432_v49, %v3420_v43 }
 0x488   : > { %v3516_v50 = vpack.c.bf16 %v3433_v34, %v3433_v34 }
 0x48a   : > { %3812 = vmatmul.bf16.vlgmr.msra.gmra.mxu3 %v3516_v50 }
 0x48d   : > { %v3434_v23 = vpop.f32.mrf.mxu2  ;;  %v3445_v5 = vpop.f32.mrf.mxu3 }
 0x48e   : > { %v3446_v16 = vadd.f32 %v3445_v5, %v2237_v13 }
 0x490   : > { %v3459_v54 = vadd.f32 %v6972_v59, %v3446_v16 }
 0x492   : > { %v3472_v53 = vadd.f32 %v6975_v22, %v3459_v54 }
 0x495   : > { %v3447_v40 = vpop.f32.mrf.mxu3 }
 0x4a5   : > { %v3484_v28 = vpop.f32.mrf.mxu2 }
 0x4a6   : > { %v3485_v15 = vadd.f32 %v3484_v28, %v3472_v53 }
 0x4ad   : > { %v3486_v4 = vpop.f32.mrf.mxu2  ;;  %v3497_v45 = vpop.f32.mrf.mxu3 }
 0x4ae   : > { %v3498_v48 = vadd.f32 %v3497_v45, %v3485_v15 }
 0x4b0   : > { %v3511_v10 = vadd.f32 %v7033_v61, %v3498_v48 }
 0x4b2   : > { %v3517_v11 = vpack.c.bf16 %v3511_v10, %v3511_v10 }
 0x4b4   : > { %3825 = vmatmul.bf16.vlgmr.msrb.gmra.mxu1 %v3517_v11 }
 0x4b5   : > { %v3499_v62 = vpop.f32.mrf.mxu3 }
 0x4d5   : > { %v3800_v17 = vpop.f32.mrf.mxu2 }
 0x4d6   : > { %v3801_v59 = vadd.f32 %v3800_v17, %v3788_v7 }
 0x4dd   : > { %v3802_v18 = vpop.f32.mrf.mxu2 }
 0x50d   : > { %v3813_v22 = vpop.f32.mrf.mxu3 }
 0x50e   : > { %v3814_v61 = vadd.f32 %v3813_v22, %v3801_v59 }
 0x515   : > { %v3815_v3 = vpop.f32.mrf.mxu3 }
 0x531   : > { %v3826_v42 = vpop.f32.mrf.mxu1 }
 0x532   : > { %v3827_v57 = vadd.f32 %v3826_v42, %v3814_v61 }
 0x534   : > { %3830 = vst [vmem:[%s299_s13] sm:$0xff] %v3827_v57 }
 0x535   : > { %5361 = shalt.err (!%p5358_p3)
}
 0x536   : > { %5264 = dma.vmem_to_hbm [thread:$0]  (%p5484_p5), %s3845_s22, 128, %s3847_s10, %s3832_s23  }
 0x539   : > { %v3828_v26 = vpop.f32.mrf.mxu1 }
 0x53a PF: > { %p5270_p4 = scmp.ge.s32.totalorder %s5396_s30, 2  ;;  %s3858_s12 = sand.u32 1, %s5384_s27  }
 0x53b   : > { %s3859_s20 = scalar_lea.sflag [#allocation5], %s3858_s12 }
 0x53c   : > { %p5267_p7 = pnand %p5270_p4, %p5488_p6 }
 0x53e   : > { %p5268_p8 = pneg %p5267_p7 }
 0x540   : > { %5379 = dma.done.wait (%p5268_p8), %s3859_s20, 128  }
 0x541   : > { %5381 = vsyncadd (%p5268_p8), %s3859_s20, 4294967168  ;;  %p18_p9 = scmp.ge.s32.totalorder %s5471_s11, 4   ;;  %s7256_s27 = smov %s5388_s28 }
 0x542   : > { %s7257_s28 = smov %s5392_s29  ;;  %s7258_s29 = smov %s5482_s14 }
 0x543   : > { %s7259_s30 = smov %s5471_s11  ;;  %20 = sbr.rel (!%p18_p9) target bundleno = 3 (0x3), region = 108 }
 0x548   :  { %3865 = vsyncpa [#allocation5], 1 }
 0x549   :  { %3867 = vsyncpa [#allocation5 + $0x1], 1 }

</bundles_post_ra>
